<compile_context>
chip_gen: v5e
topology: v5e:2x2
jax: 0.10.0
libtpu: 0.0.40
codegen_flags: <defaults>
</compile_context>

<pallas_src>
import functools
import math

import jax
import jax.numpy as jnp
from jax.experimental import pallas as pl
from jax.experimental.pallas import tpu as pltpu


# ----------------------------------------------------------------------------
# Fused forward kernel: embed MLP -> L attention layers -> JK(cat) -> decision
# One grid step == one graph.  w_ref / b_ref are packed parameter slabs.
# ----------------------------------------------------------------------------
def _fused_forward_kernel(x_ref, adj_ref, w_ref, b_ref, o_ref, *,
                          num_heads, num_layers, hidden_dim, din_pad):
    f32 = jnp.float32
    H = hidden_dim
    L = num_layers
    dh = H // num_heads
    eps = f32(1e-5)

    x = x_ref[...].astype(f32)              # [N, din_pad]  (zero-padded lanes)
    adj = adj_ref[...].astype(f32)          # [N, N]
    n = x.shape[0]

    # Graph mask as an additive bias, computed ONCE (hoisted out of the
    # head/layer loops).  Self-loops guarantee every row has a 0 entry.
    mask_bias = jnp.where(adj > 0, f32(0.0), f32(-1e9))

    def dot(a, b):
        return jnp.dot(a, b, preferred_element_type=f32)

    def layer_norm(h, g_row, b_row):
        g = b_ref[g_row:g_row + 1, 0:H]
        b = b_ref[b_row:b_row + 1, 0:H]
        mu = jnp.mean(h, axis=-1, keepdims=True)
        var = jnp.mean((h - mu) ** 2, axis=-1, keepdims=True)
        return (h - mu) * jax.lax.rsqrt(var + eps) * g + b

    # ---- embed_layer: MLP(input_dim, hidden, hidden, skip=True) ----
    ew1 = w_ref[0:din_pad, 0:H]
    ew2 = w_ref[din_pad:din_pad + H, 0:H]
    ews = w_ref[din_pad + H:2 * din_pad + H, 0:H]
    t = jnp.maximum(dot(x, ew1) + b_ref[0:1, 0:H], 0.0)
    h = dot(t, ew2) + b_ref[1:2, 0:H] + dot(x, ews) + b_ref[2:3, 0:H]

    xs = [h]
    layer_w0 = 2 * din_pad + H                       # first layer's row offset

    # ---- message passing: graph-masked transformer blocks (static unroll) ----
    for l in range(L):
        wb = layer_w0 + l * 7 * H
        bb = 8 + l * 16
        # 1/sqrt(dh) is folded into the Q weights/bias at init time.
        q = dot(h, w_ref[wb:wb + H, 0:H]) + b_ref[bb:bb + 1, 0:H]
        k = dot(h, w_ref[wb + H:wb + 2 * H, 0:H]) + b_ref[bb + 1:bb + 2, 0:H]
        v = dot(h, w_ref[wb + 2 * H:wb + 3 * H, 0:H]) + b_ref[bb + 2:bb + 3, 0:H]

        attn = jnp.zeros((n, H), f32)
        wo_base = wb + 3 * H
        for hd in range(num_heads):                  # static, tiny per-head dots
            lo = hd * dh
            qh = q[:, lo:lo + dh]
            kh = k[:, lo:lo + dh]
            vh = v[:, lo:lo + dh]
            # Contract the shared last dim directly (no explicit kh.T).
            s = jax.lax.dot_general(qh, kh, (((1,), (1,)), ((), ())),
                                    preferred_element_type=f32)
            s = s + mask_bias
            s = s - jnp.max(s, axis=-1, keepdims=True)
            p = jnp.exp(s)
            p = p * pl.reciprocal(jnp.sum(p, axis=-1, keepdims=True), approx=True)
            ho = dot(p, vh)                          # [N, dh]
            # Accumulate head output through the matching rows of W_o
            # (avoids the lane concat of head outputs entirely).
            attn = attn + dot(ho, w_ref[wo_base + lo:wo_base + lo + dh, 0:H])
        attn = attn + b_ref[bb + 3:bb + 4, 0:H]

        h1 = layer_norm(h + attn, bb + 6, bb + 7)

        wf1 = w_ref[wb + 4 * H:wb + 5 * H, 0:2 * H]
        wf2 = w_ref[wb + 5 * H:wb + 7 * H, 0:H]
        f = jnp.maximum(dot(h1, wf1) + b_ref[bb + 4:bb + 5, 0:2 * H], 0.0)
        f = dot(f, wf2) + b_ref[bb + 5:bb + 6, 0:H]

        h = layer_norm(h1 + f, bb + 8, bb + 9)
        xs.append(h)

    # ---- JumpingKnowledge('cat') + decision MLP ----
    # concat(xs, -1) @ dw1  ==  sum_l xs[l] @ dw1[l*H:(l+1)*H]   (no concat)
    db = layer_w0 + L * 7 * H
    bdb = 8 + 16 * L
    acc = dot(xs[0], w_ref[db:db + H, 0:H])
    for i in range(1, L + 1):
        acc = acc + dot(xs[i], w_ref[db + i * H:db + (i + 1) * H, 0:H])
    d1 = jnp.maximum(acc + b_ref[bdb:bdb + 1, 0:H], 0.0)
    out = dot(d1, w_ref[db + (L + 1) * H:db + (L + 2) * H, :]) \
        + b_ref[bdb + 1:bdb + 2, :]
    o_ref[...] = out.astype(o_ref.dtype)             # lane-dense [N, 128] store


# ----------------------------------------------------------------------------
# Wrapper: one pallas_call, grid over graphs, weight/bias slabs stay resident.
# Accepts single-graph (adj [N,N], x [N,Din]) or batched ([B,N,N], [B,N,Din]).
# ----------------------------------------------------------------------------
def edge_property_prediction_model2(params, adj, x, num_heads, output_dim):
    single = (x.ndim == 2)
    if single:
        x = x[None]
        adj = adj[None]
    B, N, din = x.shape
    H = params["hidden_dim"]
    L = params["num_layers"]
    din_pad = params["din_pad"]
    LANES = params["w"].shape[1]                     # 128 (lane-dense slabs)

    x_pad = jnp.zeros((B, N, din_pad), jnp.float32)
    x_pad = x_pad.at[..., :din].set(x.astype(jnp.float32))
    adj = adj.astype(jnp.float32)

    kernel = functools.partial(_fused_forward_kernel,
                               num_heads=num_heads,
                               num_layers=L,
                               hidden_dim=H,
                               din_pad=din_pad)

    out = pl.pallas_call(
        kernel,
        out_shape=jax.ShapeDtypeStruct((B, N, LANES), jnp.float32),
        grid=(B,),
        in_specs=[
            pl.BlockSpec((None, N, din_pad), lambda b: (b, 0, 0)),
            pl.BlockSpec((None, N, N), lambda b: (b, 0, 0)),
            pl.BlockSpec(params["w"].shape, lambda b: (0, 0)),   # resident
            pl.BlockSpec(params["b"].shape, lambda b: (0, 0)),   # resident
        ],
        out_specs=pl.BlockSpec((None, N, LANES), lambda b: (b, 0, 0)),
        compiler_params=pltpu.CompilerParams(
            dimension_semantics=("parallel",)),      # both TCs on v7x
    )(x_pad, adj, params["w"], params["b"])

    out = out[..., :output_dim]
    return out[0] if single else out


# ----------------------------------------------------------------------------
# Parameter init (torch.nn.Linear-style uniform), packed into two slabs:
#   weight slab  [K, 128]   (each W at its own row block, lane offset 0)
#   bias/LN slab [rows, 128] (one row per bias / gamma / beta vector)
# ----------------------------------------------------------------------------
def _dense(key, din, dout):
    kw, kb = jax.random.split(key)
    bound = 1.0 / math.sqrt(din)
    w = jax.random.uniform(kw, (din, dout), jnp.float32, -bound, bound)
    b = jax.random.uniform(kb, (dout,), jnp.float32, -bound, bound)
    return w, b


def init_params(key, input_dim, hidden_dim, output_dim, num_layers, num_heads):
    H = hidden_dim
    L = num_layers
    dh = H // num_heads
    LANES = 128
    din_pad = ((max(input_dim, 1) + 7) // 8) * 8

    w_rows = 2 * din_pad + H + L * 7 * H + (L + 2) * H
    b_rows = 8 + 16 * L + 8
    wslab = jnp.zeros((w_rows, LANES), jnp.float32)
    bslab = jnp.zeros((b_rows, LANES), jnp.float32)

    def put_w(slab, row, w):
        return slab.at[row:row + w.shape[0], :w.shape[1]].set(w)

    def put_b(slab, row, b):
        return slab.at[row, :b.shape[0]].set(b)

    keys = jax.random.split(key, 2 + L)

    # embed MLP (skip=True)
    k1, k2, k3 = jax.random.split(keys[0], 3)
    ew1, eb1 = _dense(k1, input_dim, H)
    ew2, eb2 = _dense(k2, H, H)
    ews, ebs = _dense(k3, input_dim, H)
    wslab = put_w(wslab, 0, ew1)
    wslab = put_w(wslab, din_pad, ew2)
    wslab = put_w(wslab, din_pad + H, ews)
    bslab = put_b(bslab, 0, eb1)
    bslab = put_b(bslab, 1, eb2)
    bslab = put_b(bslab, 2, ebs)

    # attention layers (scale folded into Q weights/bias)
    scale = 1.0 / math.sqrt(dh)
    layer_w0 = 2 * din_pad + H
    for l in range(L):
        ks = jax.random.split(keys[1 + l], 6)
        wq, bq = _dense(ks[0], H, H)
        wk, bk = _dense(ks[1], H, H)
        wv, bv = _dense(ks[2], H, H)
        wo, bo = _dense(ks[3], H, H)
        wf1, bf1 = _dense(ks[4], H, 2 * H)
        wf2, bf2 = _dense(ks[5], 2 * H, H)
        wb = layer_w0 + l * 7 * H
        bb = 8 + 16 * l
        wslab = put_w(wslab, wb, wq * scale)
        wslab = put_w(wslab, wb + H, wk)
        wslab = put_w(wslab, wb + 2 * H, wv)
        wslab = put_w(wslab, wb + 3 * H, wo)
        wslab = put_w(wslab, wb + 4 * H, wf1)
        wslab = put_w(wslab, wb + 5 * H, wf2)
        bslab = put_b(bslab, bb, bq * scale)
        bslab = put_b(bslab, bb + 1, bk)
        bslab = put_b(bslab, bb + 2, bv)
        bslab = put_b(bslab, bb + 3, bo)
        bslab = put_b(bslab, bb + 4, bf1)
        bslab = put_b(bslab, bb + 5, bf2)
        bslab = put_b(bslab, bb + 6, jnp.ones((H,), jnp.float32))   # LN1 gamma
        bslab = put_b(bslab, bb + 8, jnp.ones((H,), jnp.float32))   # LN2 gamma
        # LN betas (bb+7, bb+9) stay zero.

    # decision MLP; second weight padded to the 128-lane-dense output slab
    kd1, kd2 = jax.random.split(keys[1 + L], 2)
    dw1, db1 = _dense(kd1, H * (L + 1), H)
    dw2, db2 = _dense(kd2, H, output_dim)
    db_row = layer_w0 + L * 7 * H
    wslab = put_w(wslab, db_row, dw1)
    wslab = put_w(wslab, db_row + (L + 1) * H, dw2)
    bdb = 8 + 16 * L
    bslab = put_b(bslab, bdb, db1)
    bslab = put_b(bslab, bdb + 1, db2)

    return {"w": wslab, "b": bslab,
            "hidden_dim": H, "num_layers": L,
            "din_pad": din_pad, "num_heads": num_heads}


# ----------------------------------------------------------------------------
if __name__ == "__main__":
    B = 2            # graphs per call (batched to amortize launch/DMA overhead)
    N = 8            # nodes per graph (TSP line-graph edges)
    INPUT_DIM = 4
    HIDDEN_DIM = 32
    OUTPUT_DIM = 1
    NUM_LAYERS = 4
    NUM_HEADS = 4    # head_dim = 8

    key = jax.random.PRNGKey(0)
    kx, kadj, kp = jax.random.split(key, 3)

    x = jax.random.normal(kx, (B, N, INPUT_DIM), jnp.float32)
    a = (jax.random.uniform(kadj, (B, N, N)) < 0.4).astype(jnp.float32)
    adj = jnp.maximum(a, jnp.swapaxes(a, -1, -2))                     # symmetric
    adj = jnp.maximum(adj, jnp.eye(N, dtype=jnp.float32)[None])       # self-loops

    params = init_params(kp, INPUT_DIM, HIDDEN_DIM, OUTPUT_DIM,
                         NUM_LAYERS, NUM_HEADS)

    out = edge_property_prediction_model2(params, adj, x, NUM_HEADS, OUTPUT_DIM)
    out = jax.block_until_ready(out)
    assert out.shape == (B, N, OUTPUT_DIM), out.shape
    assert bool(jnp.all(jnp.isfinite(out)))
    print("KERNEL_OK")
</pallas_src>

<mosaic_0001>
module attributes {stable_mosaic.version = 11 : i64} {
  func.func @_fused_forward_kernel(%arg0: i32, %arg1: memref<1x8x8xf32, #tpu.memory_space<vmem>>, %arg2: memref<1x8x8xf32, #tpu.memory_space<vmem>>, %arg3: memref<1136x128xf32, #tpu.memory_space<vmem>>, %arg4: memref<80x128xf32, #tpu.memory_space<vmem>>, %arg5: memref<1x8x128xf32, #tpu.memory_space<vmem>>) attributes {dimension_semantics = [#tpu.dimension_semantics<parallel>], iteration_bounds = array<i64: 2>, scalar_prefetch = 0 : i64, scratch_operands = 0 : i64, tpu.core_type = #tpu.core_type<tc>, window_params = [{transform_indices = @transform_0, window_bounds = array<i64: 1, 8, 8>}, {transform_indices = @transform_1, window_bounds = array<i64: 1, 8, 8>}, {pipeline_mode = #tpu.pipeline_mode<synchronous>, transform_indices = @transform_2, window_bounds = array<i64: 1136, 128>}, {pipeline_mode = #tpu.pipeline_mode<synchronous>, transform_indices = @transform_3, window_bounds = array<i64: 80, 128>}, {transform_indices = @transform_4, window_bounds = array<i64: 1, 8, 128>}]} {
    %c0 = arith.constant 0 : index
    %c0_0 = arith.constant 0 : index
    %c0_1 = arith.constant 0 : index
    %0 = vector.load %arg1[%c0, %c0_0, %c0_1] : memref<1x8x8xf32, #tpu.memory_space<vmem>>, vector<1x8x8xf32>
    %1 = vector.shape_cast %0 : vector<1x8x8xf32> to vector<8x8xf32>
    %c0_2 = arith.constant 0 : index
    %c0_3 = arith.constant 0 : index
    %c0_4 = arith.constant 0 : index
    %2 = vector.load %arg2[%c0_2, %c0_3, %c0_4] : memref<1x8x8xf32, #tpu.memory_space<vmem>>, vector<1x8x8xf32>
    %3 = vector.shape_cast %2 : vector<1x8x8xf32> to vector<8x8xf32>
    %cst = arith.constant 0.000000e+00 : f32
    %4 = vector.broadcast %cst : f32 to vector<8x8xf32>
    %5 = arith.cmpf ogt, %3, %4 : vector<8x8xf32>
    %cst_5 = arith.constant 0.000000e+00 : f32
    %cst_6 = arith.constant -1.000000e+09 : f32
    %6 = vector.broadcast %cst_5 : f32 to vector<8x8xf32>
    %7 = vector.broadcast %cst_6 : f32 to vector<8x8xf32>
    %8 = arith.select %5, %6, %7 : vector<8x8xi1>, vector<8x8xf32>
    %c0_7 = arith.constant 0 : index
    %c0_8 = arith.constant 0 : index
    %9 = vector.load %arg3[%c0_7, %c0_8] : memref<1136x128xf32, #tpu.memory_space<vmem>>, vector<8x32xf32>
    %c8 = arith.constant 8 : index
    %c0_9 = arith.constant 0 : index
    %10 = vector.load %arg3[%c8, %c0_9] : memref<1136x128xf32, #tpu.memory_space<vmem>>, vector<32x32xf32>
    %c40 = arith.constant 40 : index
    %c0_10 = arith.constant 0 : index
    %11 = vector.load %arg3[%c40, %c0_10] : memref<1136x128xf32, #tpu.memory_space<vmem>>, vector<8x32xf32>
    %cst_11 = arith.constant dense<0.000000e+00> : vector<8x32xf32>
    %12 = tpu.matmul %1, %9, %cst_11 {dimension_numbers = #tpu.dot_dimension_numbers<[1], [0], [0], [1], [0, 0, 1, 1], [], []>} : vector<8x8xf32>, vector<8x32xf32>, vector<8x32xf32> -> vector<8x32xf32>
    %c0_12 = arith.constant 0 : index
    %c0_13 = arith.constant 0 : index
    %13 = vector.load %arg4[%c0_12, %c0_13] : memref<80x128xf32, #tpu.memory_space<vmem>>, vector<1x32xf32>
    %14 = vector.broadcast %13 : vector<1x32xf32> to vector<8x32xf32>
    %15 = arith.addf %12, %14 : vector<8x32xf32>
    %cst_14 = arith.constant 0.000000e+00 : f32
    %16 = vector.broadcast %cst_14 : f32 to vector<8x32xf32>
    %17 = arith.maximumf %15, %16 : vector<8x32xf32>
    %cst_15 = arith.constant dense<0.000000e+00> : vector<8x32xf32>
    %18 = tpu.matmul %17, %10, %cst_15 {dimension_numbers = #tpu.dot_dimension_numbers<[1], [0], [0], [1], [0, 0, 1, 1], [], []>} : vector<8x32xf32>, vector<32x32xf32>, vector<8x32xf32> -> vector<8x32xf32>
    %c1 = arith.constant 1 : index
    %c0_16 = arith.constant 0 : index
    %19 = vector.load %arg4[%c1, %c0_16] : memref<80x128xf32, #tpu.memory_space<vmem>>, vector<1x32xf32>
    %20 = vector.broadcast %19 : vector<1x32xf32> to vector<8x32xf32>
    %21 = arith.addf %18, %20 : vector<8x32xf32>
    %cst_17 = arith.constant dense<0.000000e+00> : vector<8x32xf32>
    %22 = tpu.matmul %1, %11, %cst_17 {dimension_numbers = #tpu.dot_dimension_numbers<[1], [0], [0], [1], [0, 0, 1, 1], [], []>} : vector<8x8xf32>, vector<8x32xf32>, vector<8x32xf32> -> vector<8x32xf32>
    %23 = arith.addf %21, %22 : vector<8x32xf32>
    %c2 = arith.constant 2 : index
    %c0_18 = arith.constant 0 : index
    %24 = vector.load %arg4[%c2, %c0_18] : memref<80x128xf32, #tpu.memory_space<vmem>>, vector<1x32xf32>
    %25 = vector.broadcast %24 : vector<1x32xf32> to vector<8x32xf32>
    %26 = arith.addf %23, %25 : vector<8x32xf32>
    %c48 = arith.constant 48 : index
    %c0_19 = arith.constant 0 : index
    %27 = vector.load %arg3[%c48, %c0_19] : memref<1136x128xf32, #tpu.memory_space<vmem>>, vector<32x32xf32>
    %cst_20 = arith.constant dense<0.000000e+00> : vector<8x32xf32>
    %28 = tpu.matmul %26, %27, %cst_20 {dimension_numbers = #tpu.dot_dimension_numbers<[1], [0], [0], [1], [0, 0, 1, 1], [], []>} : vector<8x32xf32>, vector<32x32xf32>, vector<8x32xf32> -> vector<8x32xf32>
    %c8_21 = arith.constant 8 : index
    %c0_22 = arith.constant 0 : index
    %29 = vector.load %arg4[%c8_21, %c0_22] : memref<80x128xf32, #tpu.memory_space<vmem>>, vector<1x32xf32>
    %30 = vector.broadcast %29 : vector<1x32xf32> to vector<8x32xf32>
    %31 = arith.addf %28, %30 : vector<8x32xf32>
    %c80 = arith.constant 80 : index
    %c0_23 = arith.constant 0 : index
    %32 = vector.load %arg3[%c80, %c0_23] : memref<1136x128xf32, #tpu.memory_space<vmem>>, vector<32x32xf32>
    %cst_24 = arith.constant dense<0.000000e+00> : vector<8x32xf32>
    %33 = tpu.matmul %26, %32, %cst_24 {dimension_numbers = #tpu.dot_dimension_numbers<[1], [0], [0], [1], [0, 0, 1, 1], [], []>} : vector<8x32xf32>, vector<32x32xf32>, vector<8x32xf32> -> vector<8x32xf32>
    %c9 = arith.constant 9 : index
    %c0_25 = arith.constant 0 : index
    %34 = vector.load %arg4[%c9, %c0_25] : memref<80x128xf32, #tpu.memory_space<vmem>>, vector<1x32xf32>
    %35 = vector.broadcast %34 : vector<1x32xf32> to vector<8x32xf32>
    %36 = arith.addf %33, %35 : vector<8x32xf32>
    %c112 = arith.constant 112 : index
    %c0_26 = arith.constant 0 : index
    %37 = vector.load %arg3[%c112, %c0_26] : memref<1136x128xf32, #tpu.memory_space<vmem>>, vector<32x32xf32>
    %cst_27 = arith.constant dense<0.000000e+00> : vector<8x32xf32>
    %38 = tpu.matmul %26, %37, %cst_27 {dimension_numbers = #tpu.dot_dimension_numbers<[1], [0], [0], [1], [0, 0, 1, 1], [], []>} : vector<8x32xf32>, vector<32x32xf32>, vector<8x32xf32> -> vector<8x32xf32>
    %c10 = arith.constant 10 : index
    %c0_28 = arith.constant 0 : index
    %39 = vector.load %arg4[%c10, %c0_28] : memref<80x128xf32, #tpu.memory_space<vmem>>, vector<1x32xf32>
    %40 = vector.broadcast %39 : vector<1x32xf32> to vector<8x32xf32>
    %41 = arith.addf %38, %40 : vector<8x32xf32>
    %cst_29 = arith.constant 0.000000e+00 : f32
    %42 = vector.broadcast %cst_29 : f32 to vector<8x32xf32>
    %43 = vector.extract_strided_slice %31 {offsets = [0, 0], sizes = [8, 8], strides = [1, 1]} : vector<8x32xf32> to vector<8x8xf32>
    %44 = vector.extract_strided_slice %36 {offsets = [0, 0], sizes = [8, 8], strides = [1, 1]} : vector<8x32xf32> to vector<8x8xf32>
    %45 = vector.extract_strided_slice %41 {offsets = [0, 0], sizes = [8, 8], strides = [1, 1]} : vector<8x32xf32> to vector<8x8xf32>
    %cst_30 = arith.constant dense<0.000000e+00> : vector<8x8xf32>
    %46 = tpu.matmul %43, %44, %cst_30 {dimension_numbers = #tpu.dot_dimension_numbers<[1], [1], [0], [0], [0, 0, 1, 0], [], []>} : vector<8x8xf32>, vector<8x8xf32>, vector<8x8xf32> -> vector<8x8xf32>
    %47 = arith.addf %46, %8 : vector<8x8xf32>
    %cst_31 = arith.constant dense<0xFF800000> : vector<8xf32>
    %48 = vector.multi_reduction <maximumf>, %47, %cst_31 [1] : vector<8x8xf32> to vector<8xf32>
    %49 = vector.shape_cast %48 : vector<8xf32> to vector<8x1xf32>
    %50 = vector.broadcast %49 : vector<8x1xf32> to vector<8x8xf32>
    %51 = arith.subf %47, %50 : vector<8x8xf32>
    %52 = math.exp %51 : vector<8x8xf32>
    %cst_32 = arith.constant dense<0.000000e+00> : vector<8xf32>
    %53 = vector.multi_reduction <add>, %52, %cst_32 [1] : vector<8x8xf32> to vector<8xf32>
    %54 = vector.shape_cast %53 : vector<8xf32> to vector<8x1xf32>
    %55 = tpu.reciprocal %54 {approx = true} : vector<8x1xf32> -> vector<8x1xf32>
    %56 = vector.broadcast %55 : vector<8x1xf32> to vector<8x8xf32>
    %57 = arith.mulf %52, %56 : vector<8x8xf32>
    %cst_33 = arith.constant dense<0.000000e+00> : vector<8x8xf32>
    %58 = tpu.matmul %57, %45, %cst_33 {dimension_numbers = #tpu.dot_dimension_numbers<[1], [0], [0], [1], [0, 0, 1, 1], [], []>} : vector<8x8xf32>, vector<8x8xf32>, vector<8x8xf32> -> vector<8x8xf32>
    %c144 = arith.constant 144 : index
    %c0_34 = arith.constant 0 : index
    %59 = vector.load %arg3[%c144, %c0_34] : memref<1136x128xf32, #tpu.memory_space<vmem>>, vector<8x32xf32>
    %cst_35 = arith.constant dense<0.000000e+00> : vector<8x32xf32>
    %60 = tpu.matmul %58, %59, %cst_35 {dimension_numbers = #tpu.dot_dimension_numbers<[1], [0], [0], [1], [0, 0, 1, 1], [], []>} : vector<8x8xf32>, vector<8x32xf32>, vector<8x32xf32> -> vector<8x32xf32>
    %61 = arith.addf %42, %60 : vector<8x32xf32>
    %62 = vector.extract_strided_slice %31 {offsets = [0, 8], sizes = [8, 8], strides = [1, 1]} : vector<8x32xf32> to vector<8x8xf32>
    %63 = vector.extract_strided_slice %36 {offsets = [0, 8], sizes = [8, 8], strides = [1, 1]} : vector<8x32xf32> to vector<8x8xf32>
    %64 = vector.extract_strided_slice %41 {offsets = [0, 8], sizes = [8, 8], strides = [1, 1]} : vector<8x32xf32> to vector<8x8xf32>
    %cst_36 = arith.constant dense<0.000000e+00> : vector<8x8xf32>
    %65 = tpu.matmul %62, %63, %cst_36 {dimension_numbers = #tpu.dot_dimension_numbers<[1], [1], [0], [0], [0, 0, 1, 0], [], []>} : vector<8x8xf32>, vector<8x8xf32>, vector<8x8xf32> -> vector<8x8xf32>
    %66 = arith.addf %65, %8 : vector<8x8xf32>
    %cst_37 = arith.constant dense<0xFF800000> : vector<8xf32>
    %67 = vector.multi_reduction <maximumf>, %66, %cst_37 [1] : vector<8x8xf32> to vector<8xf32>
    %68 = vector.shape_cast %67 : vector<8xf32> to vector<8x1xf32>
    %69 = vector.broadcast %68 : vector<8x1xf32> to vector<8x8xf32>
    %70 = arith.subf %66, %69 : vector<8x8xf32>
    %71 = math.exp %70 : vector<8x8xf32>
    %cst_38 = arith.constant dense<0.000000e+00> : vector<8xf32>
    %72 = vector.multi_reduction <add>, %71, %cst_38 [1] : vector<8x8xf32> to vector<8xf32>
    %73 = vector.shape_cast %72 : vector<8xf32> to vector<8x1xf32>
    %74 = tpu.reciprocal %73 {approx = true} : vector<8x1xf32> -> vector<8x1xf32>
    %75 = vector.broadcast %74 : vector<8x1xf32> to vector<8x8xf32>
    %76 = arith.mulf %71, %75 : vector<8x8xf32>
    %cst_39 = arith.constant dense<0.000000e+00> : vector<8x8xf32>
    %77 = tpu.matmul %76, %64, %cst_39 {dimension_numbers = #tpu.dot_dimension_numbers<[1], [0], [0], [1], [0, 0, 1, 1], [], []>} : vector<8x8xf32>, vector<8x8xf32>, vector<8x8xf32> -> vector<8x8xf32>
    %c152 = arith.constant 152 : index
    %c0_40 = arith.constant 0 : index
    %78 = vector.load %arg3[%c152, %c0_40] : memref<1136x128xf32, #tpu.memory_space<vmem>>, vector<8x32xf32>
    %cst_41 = arith.constant dense<0.000000e+00> : vector<8x32xf32>
    %79 = tpu.matmul %77, %78, %cst_41 {dimension_numbers = #tpu.dot_dimension_numbers<[1], [0], [0], [1], [0, 0, 1, 1], [], []>} : vector<8x8xf32>, vector<8x32xf32>, vector<8x32xf32> -> vector<8x32xf32>
    %80 = arith.addf %61, %79 : vector<8x32xf32>
    %81 = vector.extract_strided_slice %31 {offsets = [0, 16], sizes = [8, 8], strides = [1, 1]} : vector<8x32xf32> to vector<8x8xf32>
    %82 = vector.extract_strided_slice %36 {offsets = [0, 16], sizes = [8, 8], strides = [1, 1]} : vector<8x32xf32> to vector<8x8xf32>
    %83 = vector.extract_strided_slice %41 {offsets = [0, 16], sizes = [8, 8], strides = [1, 1]} : vector<8x32xf32> to vector<8x8xf32>
    %cst_42 = arith.constant dense<0.000000e+00> : vector<8x8xf32>
    %84 = tpu.matmul %81, %82, %cst_42 {dimension_numbers = #tpu.dot_dimension_numbers<[1], [1], [0], [0], [0, 0, 1, 0], [], []>} : vector<8x8xf32>, vector<8x8xf32>, vector<8x8xf32> -> vector<8x8xf32>
    %85 = arith.addf %84, %8 : vector<8x8xf32>
    %cst_43 = arith.constant dense<0xFF800000> : vector<8xf32>
    %86 = vector.multi_reduction <maximumf>, %85, %cst_43 [1] : vector<8x8xf32> to vector<8xf32>
    %87 = vector.shape_cast %86 : vector<8xf32> to vector<8x1xf32>
    %88 = vector.broadcast %87 : vector<8x1xf32> to vector<8x8xf32>
    %89 = arith.subf %85, %88 : vector<8x8xf32>
    %90 = math.exp %89 : vector<8x8xf32>
    %cst_44 = arith.constant dense<0.000000e+00> : vector<8xf32>
    %91 = vector.multi_reduction <add>, %90, %cst_44 [1] : vector<8x8xf32> to vector<8xf32>
    %92 = vector.shape_cast %91 : vector<8xf32> to vector<8x1xf32>
    %93 = tpu.reciprocal %92 {approx = true} : vector<8x1xf32> -> vector<8x1xf32>
    %94 = vector.broadcast %93 : vector<8x1xf32> to vector<8x8xf32>
    %95 = arith.mulf %90, %94 : vector<8x8xf32>
    %cst_45 = arith.constant dense<0.000000e+00> : vector<8x8xf32>
    %96 = tpu.matmul %95, %83, %cst_45 {dimension_numbers = #tpu.dot_dimension_numbers<[1], [0], [0], [1], [0, 0, 1, 1], [], []>} : vector<8x8xf32>, vector<8x8xf32>, vector<8x8xf32> -> vector<8x8xf32>
    %c160 = arith.constant 160 : index
    %c0_46 = arith.constant 0 : index
    %97 = vector.load %arg3[%c160, %c0_46] : memref<1136x128xf32, #tpu.memory_space<vmem>>, vector<8x32xf32>
    %cst_47 = arith.constant dense<0.000000e+00> : vector<8x32xf32>
    %98 = tpu.matmul %96, %97, %cst_47 {dimension_numbers = #tpu.dot_dimension_numbers<[1], [0], [0], [1], [0, 0, 1, 1], [], []>} : vector<8x8xf32>, vector<8x32xf32>, vector<8x32xf32> -> vector<8x32xf32>
    %99 = arith.addf %80, %98 : vector<8x32xf32>
    %100 = vector.extract_strided_slice %31 {offsets = [0, 24], sizes = [8, 8], strides = [1, 1]} : vector<8x32xf32> to vector<8x8xf32>
    %101 = vector.extract_strided_slice %36 {offsets = [0, 24], sizes = [8, 8], strides = [1, 1]} : vector<8x32xf32> to vector<8x8xf32>
    %102 = vector.extract_strided_slice %41 {offsets = [0, 24], sizes = [8, 8], strides = [1, 1]} : vector<8x32xf32> to vector<8x8xf32>
    %cst_48 = arith.constant dense<0.000000e+00> : vector<8x8xf32>
    %103 = tpu.matmul %100, %101, %cst_48 {dimension_numbers = #tpu.dot_dimension_numbers<[1], [1], [0], [0], [0, 0, 1, 0], [], []>} : vector<8x8xf32>, vector<8x8xf32>, vector<8x8xf32> -> vector<8x8xf32>
    %104 = arith.addf %103, %8 : vector<8x8xf32>
    %cst_49 = arith.constant dense<0xFF800000> : vector<8xf32>
    %105 = vector.multi_reduction <maximumf>, %104, %cst_49 [1] : vector<8x8xf32> to vector<8xf32>
    %106 = vector.shape_cast %105 : vector<8xf32> to vector<8x1xf32>
    %107 = vector.broadcast %106 : vector<8x1xf32> to vector<8x8xf32>
    %108 = arith.subf %104, %107 : vector<8x8xf32>
    %109 = math.exp %108 : vector<8x8xf32>
    %cst_50 = arith.constant dense<0.000000e+00> : vector<8xf32>
    %110 = vector.multi_reduction <add>, %109, %cst_50 [1] : vector<8x8xf32> to vector<8xf32>
    %111 = vector.shape_cast %110 : vector<8xf32> to vector<8x1xf32>
    %112 = tpu.reciprocal %111 {approx = true} : vector<8x1xf32> -> vector<8x1xf32>
    %113 = vector.broadcast %112 : vector<8x1xf32> to vector<8x8xf32>
    %114 = arith.mulf %109, %113 : vector<8x8xf32>
    %cst_51 = arith.constant dense<0.000000e+00> : vector<8x8xf32>
    %115 = tpu.matmul %114, %102, %cst_51 {dimension_numbers = #tpu.dot_dimension_numbers<[1], [0], [0], [1], [0, 0, 1, 1], [], []>} : vector<8x8xf32>, vector<8x8xf32>, vector<8x8xf32> -> vector<8x8xf32>
    %c168 = arith.constant 168 : index
    %c0_52 = arith.constant 0 : index
    %116 = vector.load %arg3[%c168, %c0_52] : memref<1136x128xf32, #tpu.memory_space<vmem>>, vector<8x32xf32>
    %cst_53 = arith.constant dense<0.000000e+00> : vector<8x32xf32>
    %117 = tpu.matmul %115, %116, %cst_53 {dimension_numbers = #tpu.dot_dimension_numbers<[1], [0], [0], [1], [0, 0, 1, 1], [], []>} : vector<8x8xf32>, vector<8x32xf32>, vector<8x32xf32> -> vector<8x32xf32>
    %118 = arith.addf %99, %117 : vector<8x32xf32>
    %c11 = arith.constant 11 : index
    %c0_54 = arith.constant 0 : index
    %119 = vector.load %arg4[%c11, %c0_54] : memref<80x128xf32, #tpu.memory_space<vmem>>, vector<1x32xf32>
    %120 = vector.broadcast %119 : vector<1x32xf32> to vector<8x32xf32>
    %121 = arith.addf %118, %120 : vector<8x32xf32>
    %122 = arith.addf %26, %121 : vector<8x32xf32>
    %c14 = arith.constant 14 : index
    %c0_55 = arith.constant 0 : index
    %123 = vector.load %arg4[%c14, %c0_55] : memref<80x128xf32, #tpu.memory_space<vmem>>, vector<1x32xf32>
    %c15 = arith.constant 15 : index
    %c0_56 = arith.constant 0 : index
    %124 = vector.load %arg4[%c15, %c0_56] : memref<80x128xf32, #tpu.memory_space<vmem>>, vector<1x32xf32>
    %cst_57 = arith.constant dense<0.000000e+00> : vector<8xf32>
    %125 = vector.multi_reduction <add>, %122, %cst_57 [1] : vector<8x32xf32> to vector<8xf32>
    %126 = vector.shape_cast %125 : vector<8xf32> to vector<8x1xf32>
    %cst_58 = arith.constant 3.200000e+01 : f32
    %127 = vector.broadcast %cst_58 : f32 to vector<8x1xf32>
    %128 = arith.divf %126, %127 : vector<8x1xf32>
    %129 = vector.broadcast %128 : vector<8x1xf32> to vector<8x32xf32>
    %130 = arith.subf %122, %129 : vector<8x32xf32>
    %131 = arith.mulf %130, %130 : vector<8x32xf32>
    %cst_59 = arith.constant dense<0.000000e+00> : vector<8xf32>
    %132 = vector.multi_reduction <add>, %131, %cst_59 [1] : vector<8x32xf32> to vector<8xf32>
    %133 = vector.shape_cast %132 : vector<8xf32> to vector<8x1xf32>
    %cst_60 = arith.constant 3.200000e+01 : f32
    %134 = vector.broadcast %cst_60 : f32 to vector<8x1xf32>
    %135 = arith.divf %133, %134 : vector<8x1xf32>
    %136 = vector.broadcast %128 : vector<8x1xf32> to vector<8x32xf32>
    %137 = arith.subf %122, %136 : vector<8x32xf32>
    %cst_61 = arith.constant 9.99999974E-6 : f32
    %138 = vector.broadcast %cst_61 : f32 to vector<8x1xf32>
    %139 = arith.addf %135, %138 : vector<8x1xf32>
    %140 = math.rsqrt %139 : vector<8x1xf32>
    %141 = vector.broadcast %140 : vector<8x1xf32> to vector<8x32xf32>
    %142 = arith.mulf %137, %141 : vector<8x32xf32>
    %143 = vector.broadcast %123 : vector<1x32xf32> to vector<8x32xf32>
    %144 = arith.mulf %142, %143 : vector<8x32xf32>
    %145 = vector.broadcast %124 : vector<1x32xf32> to vector<8x32xf32>
    %146 = arith.addf %144, %145 : vector<8x32xf32>
    %c176 = arith.constant 176 : index
    %c0_62 = arith.constant 0 : index
    %147 = vector.load %arg3[%c176, %c0_62] : memref<1136x128xf32, #tpu.memory_space<vmem>>, vector<32x64xf32>
    %c208 = arith.constant 208 : index
    %c0_63 = arith.constant 0 : index
    %148 = vector.load %arg3[%c208, %c0_63] : memref<1136x128xf32, #tpu.memory_space<vmem>>, vector<64x32xf32>
    %cst_64 = arith.constant dense<0.000000e+00> : vector<8x64xf32>
    %149 = tpu.matmul %146, %147, %cst_64 {dimension_numbers = #tpu.dot_dimension_numbers<[1], [0], [0], [1], [0, 0, 1, 1], [], []>} : vector<8x32xf32>, vector<32x64xf32>, vector<8x64xf32> -> vector<8x64xf32>
    %c12 = arith.constant 12 : index
    %c0_65 = arith.constant 0 : index
    %150 = vector.load %arg4[%c12, %c0_65] : memref<80x128xf32, #tpu.memory_space<vmem>>, vector<1x64xf32>
    %151 = vector.broadcast %150 : vector<1x64xf32> to vector<8x64xf32>
    %152 = arith.addf %149, %151 : vector<8x64xf32>
    %cst_66 = arith.constant 0.000000e+00 : f32
    %153 = vector.broadcast %cst_66 : f32 to vector<8x64xf32>
    %154 = arith.maximumf %152, %153 : vector<8x64xf32>
    %cst_67 = arith.constant dense<0.000000e+00> : vector<8x32xf32>
    %155 = tpu.matmul %154, %148, %cst_67 {dimension_numbers = #tpu.dot_dimension_numbers<[1], [0], [0], [1], [0, 0, 1, 1], [], []>} : vector<8x64xf32>, vector<64x32xf32>, vector<8x32xf32> -> vector<8x32xf32>
    %c13 = arith.constant 13 : index
    %c0_68 = arith.constant 0 : index
    %156 = vector.load %arg4[%c13, %c0_68] : memref<80x128xf32, #tpu.memory_space<vmem>>, vector<1x32xf32>
    %157 = vector.broadcast %156 : vector<1x32xf32> to vector<8x32xf32>
    %158 = arith.addf %155, %157 : vector<8x32xf32>
    %159 = arith.addf %146, %158 : vector<8x32xf32>
    %c16 = arith.constant 16 : index
    %c0_69 = arith.constant 0 : index
    %160 = vector.load %arg4[%c16, %c0_69] : memref<80x128xf32, #tpu.memory_space<vmem>>, vector<1x32xf32>
    %c17 = arith.constant 17 : index
    %c0_70 = arith.constant 0 : index
    %161 = vector.load %arg4[%c17, %c0_70] : memref<80x128xf32, #tpu.memory_space<vmem>>, vector<1x32xf32>
    %cst_71 = arith.constant dense<0.000000e+00> : vector<8xf32>
    %162 = vector.multi_reduction <add>, %159, %cst_71 [1] : vector<8x32xf32> to vector<8xf32>
    %163 = vector.shape_cast %162 : vector<8xf32> to vector<8x1xf32>
    %cst_72 = arith.constant 3.200000e+01 : f32
    %164 = vector.broadcast %cst_72 : f32 to vector<8x1xf32>
    %165 = arith.divf %163, %164 : vector<8x1xf32>
    %166 = vector.broadcast %165 : vector<8x1xf32> to vector<8x32xf32>
    %167 = arith.subf %159, %166 : vector<8x32xf32>
    %168 = arith.mulf %167, %167 : vector<8x32xf32>
    %cst_73 = arith.constant dense<0.000000e+00> : vector<8xf32>
    %169 = vector.multi_reduction <add>, %168, %cst_73 [1] : vector<8x32xf32> to vector<8xf32>
    %170 = vector.shape_cast %169 : vector<8xf32> to vector<8x1xf32>
    %cst_74 = arith.constant 3.200000e+01 : f32
    %171 = vector.broadcast %cst_74 : f32 to vector<8x1xf32>
    %172 = arith.divf %170, %171 : vector<8x1xf32>
    %173 = vector.broadcast %165 : vector<8x1xf32> to vector<8x32xf32>
    %174 = arith.subf %159, %173 : vector<8x32xf32>
    %cst_75 = arith.constant 9.99999974E-6 : f32
    %175 = vector.broadcast %cst_75 : f32 to vector<8x1xf32>
    %176 = arith.addf %172, %175 : vector<8x1xf32>
    %177 = math.rsqrt %176 : vector<8x1xf32>
    %178 = vector.broadcast %177 : vector<8x1xf32> to vector<8x32xf32>
    %179 = arith.mulf %174, %178 : vector<8x32xf32>
    %180 = vector.broadcast %160 : vector<1x32xf32> to vector<8x32xf32>
    %181 = arith.mulf %179, %180 : vector<8x32xf32>
    %182 = vector.broadcast %161 : vector<1x32xf32> to vector<8x32xf32>
    %183 = arith.addf %181, %182 : vector<8x32xf32>
    %c272 = arith.constant 272 : index
    %c0_76 = arith.constant 0 : index
    %184 = vector.load %arg3[%c272, %c0_76] : memref<1136x128xf32, #tpu.memory_space<vmem>>, vector<32x32xf32>
    %cst_77 = arith.constant dense<0.000000e+00> : vector<8x32xf32>
    %185 = tpu.matmul %183, %184, %cst_77 {dimension_numbers = #tpu.dot_dimension_numbers<[1], [0], [0], [1], [0, 0, 1, 1], [], []>} : vector<8x32xf32>, vector<32x32xf32>, vector<8x32xf32> -> vector<8x32xf32>
    %c24 = arith.constant 24 : index
    %c0_78 = arith.constant 0 : index
    %186 = vector.load %arg4[%c24, %c0_78] : memref<80x128xf32, #tpu.memory_space<vmem>>, vector<1x32xf32>
    %187 = vector.broadcast %186 : vector<1x32xf32> to vector<8x32xf32>
    %188 = arith.addf %185, %187 : vector<8x32xf32>
    %c304 = arith.constant 304 : index
    %c0_79 = arith.constant 0 : index
    %189 = vector.load %arg3[%c304, %c0_79] : memref<1136x128xf32, #tpu.memory_space<vmem>>, vector<32x32xf32>
    %cst_80 = arith.constant dense<0.000000e+00> : vector<8x32xf32>
    %190 = tpu.matmul %183, %189, %cst_80 {dimension_numbers = #tpu.dot_dimension_numbers<[1], [0], [0], [1], [0, 0, 1, 1], [], []>} : vector<8x32xf32>, vector<32x32xf32>, vector<8x32xf32> -> vector<8x32xf32>
    %c25 = arith.constant 25 : index
    %c0_81 = arith.constant 0 : index
    %191 = vector.load %arg4[%c25, %c0_81] : memref<80x128xf32, #tpu.memory_space<vmem>>, vector<1x32xf32>
    %192 = vector.broadcast %191 : vector<1x32xf32> to vector<8x32xf32>
    %193 = arith.addf %190, %192 : vector<8x32xf32>
    %c336 = arith.constant 336 : index
    %c0_82 = arith.constant 0 : index
    %194 = vector.load %arg3[%c336, %c0_82] : memref<1136x128xf32, #tpu.memory_space<vmem>>, vector<32x32xf32>
    %cst_83 = arith.constant dense<0.000000e+00> : vector<8x32xf32>
    %195 = tpu.matmul %183, %194, %cst_83 {dimension_numbers = #tpu.dot_dimension_numbers<[1], [0], [0], [1], [0, 0, 1, 1], [], []>} : vector<8x32xf32>, vector<32x32xf32>, vector<8x32xf32> -> vector<8x32xf32>
    %c26 = arith.constant 26 : index
    %c0_84 = arith.constant 0 : index
    %196 = vector.load %arg4[%c26, %c0_84] : memref<80x128xf32, #tpu.memory_space<vmem>>, vector<1x32xf32>
    %197 = vector.broadcast %196 : vector<1x32xf32> to vector<8x32xf32>
    %198 = arith.addf %195, %197 : vector<8x32xf32>
    %cst_85 = arith.constant 0.000000e+00 : f32
    %199 = vector.broadcast %cst_85 : f32 to vector<8x32xf32>
    %200 = vector.extract_strided_slice %188 {offsets = [0, 0], sizes = [8, 8], strides = [1, 1]} : vector<8x32xf32> to vector<8x8xf32>
    %201 = vector.extract_strided_slice %193 {offsets = [0, 0], sizes = [8, 8], strides = [1, 1]} : vector<8x32xf32> to vector<8x8xf32>
    %202 = vector.extract_strided_slice %198 {offsets = [0, 0], sizes = [8, 8], strides = [1, 1]} : vector<8x32xf32> to vector<8x8xf32>
    %cst_86 = arith.constant dense<0.000000e+00> : vector<8x8xf32>
    %203 = tpu.matmul %200, %201, %cst_86 {dimension_numbers = #tpu.dot_dimension_numbers<[1], [1], [0], [0], [0, 0, 1, 0], [], []>} : vector<8x8xf32>, vector<8x8xf32>, vector<8x8xf32> -> vector<8x8xf32>
    %204 = arith.addf %203, %8 : vector<8x8xf32>
    %cst_87 = arith.constant dense<0xFF800000> : vector<8xf32>
    %205 = vector.multi_reduction <maximumf>, %204, %cst_87 [1] : vector<8x8xf32> to vector<8xf32>
    %206 = vector.shape_cast %205 : vector<8xf32> to vector<8x1xf32>
    %207 = vector.broadcast %206 : vector<8x1xf32> to vector<8x8xf32>
    %208 = arith.subf %204, %207 : vector<8x8xf32>
    %209 = math.exp %208 : vector<8x8xf32>
    %cst_88 = arith.constant dense<0.000000e+00> : vector<8xf32>
    %210 = vector.multi_reduction <add>, %209, %cst_88 [1] : vector<8x8xf32> to vector<8xf32>
    %211 = vector.shape_cast %210 : vector<8xf32> to vector<8x1xf32>
    %212 = tpu.reciprocal %211 {approx = true} : vector<8x1xf32> -> vector<8x1xf32>
    %213 = vector.broadcast %212 : vector<8x1xf32> to vector<8x8xf32>
    %214 = arith.mulf %209, %213 : vector<8x8xf32>
    %cst_89 = arith.constant dense<0.000000e+00> : vector<8x8xf32>
    %215 = tpu.matmul %214, %202, %cst_89 {dimension_numbers = #tpu.dot_dimension_numbers<[1], [0], [0], [1], [0, 0, 1, 1], [], []>} : vector<8x8xf32>, vector<8x8xf32>, vector<8x8xf32> -> vector<8x8xf32>
    %c368 = arith.constant 368 : index
    %c0_90 = arith.constant 0 : index
    %216 = vector.load %arg3[%c368, %c0_90] : memref<1136x128xf32, #tpu.memory_space<vmem>>, vector<8x32xf32>
    %cst_91 = arith.constant dense<0.000000e+00> : vector<8x32xf32>
    %217 = tpu.matmul %215, %216, %cst_91 {dimension_numbers = #tpu.dot_dimension_numbers<[1], [0], [0], [1], [0, 0, 1, 1], [], []>} : vector<8x8xf32>, vector<8x32xf32>, vector<8x32xf32> -> vector<8x32xf32>
    %218 = arith.addf %199, %217 : vector<8x32xf32>
    %219 = vector.extract_strided_slice %188 {offsets = [0, 8], sizes = [8, 8], strides = [1, 1]} : vector<8x32xf32> to vector<8x8xf32>
    %220 = vector.extract_strided_slice %193 {offsets = [0, 8], sizes = [8, 8], strides = [1, 1]} : vector<8x32xf32> to vector<8x8xf32>
    %221 = vector.extract_strided_slice %198 {offsets = [0, 8], sizes = [8, 8], strides = [1, 1]} : vector<8x32xf32> to vector<8x8xf32>
    %cst_92 = arith.constant dense<0.000000e+00> : vector<8x8xf32>
    %222 = tpu.matmul %219, %220, %cst_92 {dimension_numbers = #tpu.dot_dimension_numbers<[1], [1], [0], [0], [0, 0, 1, 0], [], []>} : vector<8x8xf32>, vector<8x8xf32>, vector<8x8xf32> -> vector<8x8xf32>
    %223 = arith.addf %222, %8 : vector<8x8xf32>
    %cst_93 = arith.constant dense<0xFF800000> : vector<8xf32>
    %224 = vector.multi_reduction <maximumf>, %223, %cst_93 [1] : vector<8x8xf32> to vector<8xf32>
    %225 = vector.shape_cast %224 : vector<8xf32> to vector<8x1xf32>
    %226 = vector.broadcast %225 : vector<8x1xf32> to vector<8x8xf32>
    %227 = arith.subf %223, %226 : vector<8x8xf32>
    %228 = math.exp %227 : vector<8x8xf32>
    %cst_94 = arith.constant dense<0.000000e+00> : vector<8xf32>
    %229 = vector.multi_reduction <add>, %228, %cst_94 [1] : vector<8x8xf32> to vector<8xf32>
    %230 = vector.shape_cast %229 : vector<8xf32> to vector<8x1xf32>
    %231 = tpu.reciprocal %230 {approx = true} : vector<8x1xf32> -> vector<8x1xf32>
    %232 = vector.broadcast %231 : vector<8x1xf32> to vector<8x8xf32>
    %233 = arith.mulf %228, %232 : vector<8x8xf32>
    %cst_95 = arith.constant dense<0.000000e+00> : vector<8x8xf32>
    %234 = tpu.matmul %233, %221, %cst_95 {dimension_numbers = #tpu.dot_dimension_numbers<[1], [0], [0], [1], [0, 0, 1, 1], [], []>} : vector<8x8xf32>, vector<8x8xf32>, vector<8x8xf32> -> vector<8x8xf32>
    %c376 = arith.constant 376 : index
    %c0_96 = arith.constant 0 : index
    %235 = vector.load %arg3[%c376, %c0_96] : memref<1136x128xf32, #tpu.memory_space<vmem>>, vector<8x32xf32>
    %cst_97 = arith.constant dense<0.000000e+00> : vector<8x32xf32>
    %236 = tpu.matmul %234, %235, %cst_97 {dimension_numbers = #tpu.dot_dimension_numbers<[1], [0], [0], [1], [0, 0, 1, 1], [], []>} : vector<8x8xf32>, vector<8x32xf32>, vector<8x32xf32> -> vector<8x32xf32>
    %237 = arith.addf %218, %236 : vector<8x32xf32>
    %238 = vector.extract_strided_slice %188 {offsets = [0, 16], sizes = [8, 8], strides = [1, 1]} : vector<8x32xf32> to vector<8x8xf32>
    %239 = vector.extract_strided_slice %193 {offsets = [0, 16], sizes = [8, 8], strides = [1, 1]} : vector<8x32xf32> to vector<8x8xf32>
    %240 = vector.extract_strided_slice %198 {offsets = [0, 16], sizes = [8, 8], strides = [1, 1]} : vector<8x32xf32> to vector<8x8xf32>
    %cst_98 = arith.constant dense<0.000000e+00> : vector<8x8xf32>
    %241 = tpu.matmul %238, %239, %cst_98 {dimension_numbers = #tpu.dot_dimension_numbers<[1], [1], [0], [0], [0, 0, 1, 0], [], []>} : vector<8x8xf32>, vector<8x8xf32>, vector<8x8xf32> -> vector<8x8xf32>
    %242 = arith.addf %241, %8 : vector<8x8xf32>
    %cst_99 = arith.constant dense<0xFF800000> : vector<8xf32>
    %243 = vector.multi_reduction <maximumf>, %242, %cst_99 [1] : vector<8x8xf32> to vector<8xf32>
    %244 = vector.shape_cast %243 : vector<8xf32> to vector<8x1xf32>
    %245 = vector.broadcast %244 : vector<8x1xf32> to vector<8x8xf32>
    %246 = arith.subf %242, %245 : vector<8x8xf32>
    %247 = math.exp %246 : vector<8x8xf32>
    %cst_100 = arith.constant dense<0.000000e+00> : vector<8xf32>
    %248 = vector.multi_reduction <add>, %247, %cst_100 [1] : vector<8x8xf32> to vector<8xf32>
    %249 = vector.shape_cast %248 : vector<8xf32> to vector<8x1xf32>
    %250 = tpu.reciprocal %249 {approx = true} : vector<8x1xf32> -> vector<8x1xf32>
    %251 = vector.broadcast %250 : vector<8x1xf32> to vector<8x8xf32>
    %252 = arith.mulf %247, %251 : vector<8x8xf32>
    %cst_101 = arith.constant dense<0.000000e+00> : vector<8x8xf32>
    %253 = tpu.matmul %252, %240, %cst_101 {dimension_numbers = #tpu.dot_dimension_numbers<[1], [0], [0], [1], [0, 0, 1, 1], [], []>} : vector<8x8xf32>, vector<8x8xf32>, vector<8x8xf32> -> vector<8x8xf32>
    %c384 = arith.constant 384 : index
    %c0_102 = arith.constant 0 : index
    %254 = vector.load %arg3[%c384, %c0_102] : memref<1136x128xf32, #tpu.memory_space<vmem>>, vector<8x32xf32>
    %cst_103 = arith.constant dense<0.000000e+00> : vector<8x32xf32>
    %255 = tpu.matmul %253, %254, %cst_103 {dimension_numbers = #tpu.dot_dimension_numbers<[1], [0], [0], [1], [0, 0, 1, 1], [], []>} : vector<8x8xf32>, vector<8x32xf32>, vector<8x32xf32> -> vector<8x32xf32>
    %256 = arith.addf %237, %255 : vector<8x32xf32>
    %257 = vector.extract_strided_slice %188 {offsets = [0, 24], sizes = [8, 8], strides = [1, 1]} : vector<8x32xf32> to vector<8x8xf32>
    %258 = vector.extract_strided_slice %193 {offsets = [0, 24], sizes = [8, 8], strides = [1, 1]} : vector<8x32xf32> to vector<8x8xf32>
    %259 = vector.extract_strided_slice %198 {offsets = [0, 24], sizes = [8, 8], strides = [1, 1]} : vector<8x32xf32> to vector<8x8xf32>
    %cst_104 = arith.constant dense<0.000000e+00> : vector<8x8xf32>
    %260 = tpu.matmul %257, %258, %cst_104 {dimension_numbers = #tpu.dot_dimension_numbers<[1], [1], [0], [0], [0, 0, 1, 0], [], []>} : vector<8x8xf32>, vector<8x8xf32>, vector<8x8xf32> -> vector<8x8xf32>
    %261 = arith.addf %260, %8 : vector<8x8xf32>
    %cst_105 = arith.constant dense<0xFF800000> : vector<8xf32>
    %262 = vector.multi_reduction <maximumf>, %261, %cst_105 [1] : vector<8x8xf32> to vector<8xf32>
    %263 = vector.shape_cast %262 : vector<8xf32> to vector<8x1xf32>
    %264 = vector.broadcast %263 : vector<8x1xf32> to vector<8x8xf32>
    %265 = arith.subf %261, %264 : vector<8x8xf32>
    %266 = math.exp %265 : vector<8x8xf32>
    %cst_106 = arith.constant dense<0.000000e+00> : vector<8xf32>
    %267 = vector.multi_reduction <add>, %266, %cst_106 [1] : vector<8x8xf32> to vector<8xf32>
    %268 = vector.shape_cast %267 : vector<8xf32> to vector<8x1xf32>
    %269 = tpu.reciprocal %268 {approx = true} : vector<8x1xf32> -> vector<8x1xf32>
    %270 = vector.broadcast %269 : vector<8x1xf32> to vector<8x8xf32>
    %271 = arith.mulf %266, %270 : vector<8x8xf32>
    %cst_107 = arith.constant dense<0.000000e+00> : vector<8x8xf32>
    %272 = tpu.matmul %271, %259, %cst_107 {dimension_numbers = #tpu.dot_dimension_numbers<[1], [0], [0], [1], [0, 0, 1, 1], [], []>} : vector<8x8xf32>, vector<8x8xf32>, vector<8x8xf32> -> vector<8x8xf32>
    %c392 = arith.constant 392 : index
    %c0_108 = arith.constant 0 : index
    %273 = vector.load %arg3[%c392, %c0_108] : memref<1136x128xf32, #tpu.memory_space<vmem>>, vector<8x32xf32>
    %cst_109 = arith.constant dense<0.000000e+00> : vector<8x32xf32>
    %274 = tpu.matmul %272, %273, %cst_109 {dimension_numbers = #tpu.dot_dimension_numbers<[1], [0], [0], [1], [0, 0, 1, 1], [], []>} : vector<8x8xf32>, vector<8x32xf32>, vector<8x32xf32> -> vector<8x32xf32>
    %275 = arith.addf %256, %274 : vector<8x32xf32>
    %c27 = arith.constant 27 : index
    %c0_110 = arith.constant 0 : index
    %276 = vector.load %arg4[%c27, %c0_110] : memref<80x128xf32, #tpu.memory_space<vmem>>, vector<1x32xf32>
    %277 = vector.broadcast %276 : vector<1x32xf32> to vector<8x32xf32>
    %278 = arith.addf %275, %277 : vector<8x32xf32>
    %279 = arith.addf %183, %278 : vector<8x32xf32>
    %c30 = arith.constant 30 : index
    %c0_111 = arith.constant 0 : index
    %280 = vector.load %arg4[%c30, %c0_111] : memref<80x128xf32, #tpu.memory_space<vmem>>, vector<1x32xf32>
    %c31 = arith.constant 31 : index
    %c0_112 = arith.constant 0 : index
    %281 = vector.load %arg4[%c31, %c0_112] : memref<80x128xf32, #tpu.memory_space<vmem>>, vector<1x32xf32>
    %cst_113 = arith.constant dense<0.000000e+00> : vector<8xf32>
    %282 = vector.multi_reduction <add>, %279, %cst_113 [1] : vector<8x32xf32> to vector<8xf32>
    %283 = vector.shape_cast %282 : vector<8xf32> to vector<8x1xf32>
    %cst_114 = arith.constant 3.200000e+01 : f32
    %284 = vector.broadcast %cst_114 : f32 to vector<8x1xf32>
    %285 = arith.divf %283, %284 : vector<8x1xf32>
    %286 = vector.broadcast %285 : vector<8x1xf32> to vector<8x32xf32>
    %287 = arith.subf %279, %286 : vector<8x32xf32>
    %288 = arith.mulf %287, %287 : vector<8x32xf32>
    %cst_115 = arith.constant dense<0.000000e+00> : vector<8xf32>
    %289 = vector.multi_reduction <add>, %288, %cst_115 [1] : vector<8x32xf32> to vector<8xf32>
    %290 = vector.shape_cast %289 : vector<8xf32> to vector<8x1xf32>
    %cst_116 = arith.constant 3.200000e+01 : f32
    %291 = vector.broadcast %cst_116 : f32 to vector<8x1xf32>
    %292 = arith.divf %290, %291 : vector<8x1xf32>
    %293 = vector.broadcast %285 : vector<8x1xf32> to vector<8x32xf32>
    %294 = arith.subf %279, %293 : vector<8x32xf32>
    %cst_117 = arith.constant 9.99999974E-6 : f32
    %295 = vector.broadcast %cst_117 : f32 to vector<8x1xf32>
    %296 = arith.addf %292, %295 : vector<8x1xf32>
    %297 = math.rsqrt %296 : vector<8x1xf32>
    %298 = vector.broadcast %297 : vector<8x1xf32> to vector<8x32xf32>
    %299 = arith.mulf %294, %298 : vector<8x32xf32>
    %300 = vector.broadcast %280 : vector<1x32xf32> to vector<8x32xf32>
    %301 = arith.mulf %299, %300 : vector<8x32xf32>
    %302 = vector.broadcast %281 : vector<1x32xf32> to vector<8x32xf32>
    %303 = arith.addf %301, %302 : vector<8x32xf32>
    %c400 = arith.constant 400 : index
    %c0_118 = arith.constant 0 : index
    %304 = vector.load %arg3[%c400, %c0_118] : memref<1136x128xf32, #tpu.memory_space<vmem>>, vector<32x64xf32>
    %c432 = arith.constant 432 : index
    %c0_119 = arith.constant 0 : index
    %305 = vector.load %arg3[%c432, %c0_119] : memref<1136x128xf32, #tpu.memory_space<vmem>>, vector<64x32xf32>
    %cst_120 = arith.constant dense<0.000000e+00> : vector<8x64xf32>
    %306 = tpu.matmul %303, %304, %cst_120 {dimension_numbers = #tpu.dot_dimension_numbers<[1], [0], [0], [1], [0, 0, 1, 1], [], []>} : vector<8x32xf32>, vector<32x64xf32>, vector<8x64xf32> -> vector<8x64xf32>
    %c28 = arith.constant 28 : index
    %c0_121 = arith.constant 0 : index
    %307 = vector.load %arg4[%c28, %c0_121] : memref<80x128xf32, #tpu.memory_space<vmem>>, vector<1x64xf32>
    %308 = vector.broadcast %307 : vector<1x64xf32> to vector<8x64xf32>
    %309 = arith.addf %306, %308 : vector<8x64xf32>
    %cst_122 = arith.constant 0.000000e+00 : f32
    %310 = vector.broadcast %cst_122 : f32 to vector<8x64xf32>
    %311 = arith.maximumf %309, %310 : vector<8x64xf32>
    %cst_123 = arith.constant dense<0.000000e+00> : vector<8x32xf32>
    %312 = tpu.matmul %311, %305, %cst_123 {dimension_numbers = #tpu.dot_dimension_numbers<[1], [0], [0], [1], [0, 0, 1, 1], [], []>} : vector<8x64xf32>, vector<64x32xf32>, vector<8x32xf32> -> vector<8x32xf32>
    %c29 = arith.constant 29 : index
    %c0_124 = arith.constant 0 : index
    %313 = vector.load %arg4[%c29, %c0_124] : memref<80x128xf32, #tpu.memory_space<vmem>>, vector<1x32xf32>
    %314 = vector.broadcast %313 : vector<1x32xf32> to vector<8x32xf32>
    %315 = arith.addf %312, %314 : vector<8x32xf32>
    %316 = arith.addf %303, %315 : vector<8x32xf32>
    %c32 = arith.constant 32 : index
    %c0_125 = arith.constant 0 : index
    %317 = vector.load %arg4[%c32, %c0_125] : memref<80x128xf32, #tpu.memory_space<vmem>>, vector<1x32xf32>
    %c33 = arith.constant 33 : index
    %c0_126 = arith.constant 0 : index
    %318 = vector.load %arg4[%c33, %c0_126] : memref<80x128xf32, #tpu.memory_space<vmem>>, vector<1x32xf32>
    %cst_127 = arith.constant dense<0.000000e+00> : vector<8xf32>
    %319 = vector.multi_reduction <add>, %316, %cst_127 [1] : vector<8x32xf32> to vector<8xf32>
    %320 = vector.shape_cast %319 : vector<8xf32> to vector<8x1xf32>
    %cst_128 = arith.constant 3.200000e+01 : f32
    %321 = vector.broadcast %cst_128 : f32 to vector<8x1xf32>
    %322 = arith.divf %320, %321 : vector<8x1xf32>
    %323 = vector.broadcast %322 : vector<8x1xf32> to vector<8x32xf32>
    %324 = arith.subf %316, %323 : vector<8x32xf32>
    %325 = arith.mulf %324, %324 : vector<8x32xf32>
    %cst_129 = arith.constant dense<0.000000e+00> : vector<8xf32>
    %326 = vector.multi_reduction <add>, %325, %cst_129 [1] : vector<8x32xf32> to vector<8xf32>
    %327 = vector.shape_cast %326 : vector<8xf32> to vector<8x1xf32>
    %cst_130 = arith.constant 3.200000e+01 : f32
    %328 = vector.broadcast %cst_130 : f32 to vector<8x1xf32>
    %329 = arith.divf %327, %328 : vector<8x1xf32>
    %330 = vector.broadcast %322 : vector<8x1xf32> to vector<8x32xf32>
    %331 = arith.subf %316, %330 : vector<8x32xf32>
    %cst_131 = arith.constant 9.99999974E-6 : f32
    %332 = vector.broadcast %cst_131 : f32 to vector<8x1xf32>
    %333 = arith.addf %329, %332 : vector<8x1xf32>
    %334 = math.rsqrt %333 : vector<8x1xf32>
    %335 = vector.broadcast %334 : vector<8x1xf32> to vector<8x32xf32>
    %336 = arith.mulf %331, %335 : vector<8x32xf32>
    %337 = vector.broadcast %317 : vector<1x32xf32> to vector<8x32xf32>
    %338 = arith.mulf %336, %337 : vector<8x32xf32>
    %339 = vector.broadcast %318 : vector<1x32xf32> to vector<8x32xf32>
    %340 = arith.addf %338, %339 : vector<8x32xf32>
    %c496 = arith.constant 496 : index
    %c0_132 = arith.constant 0 : index
    %341 = vector.load %arg3[%c496, %c0_132] : memref<1136x128xf32, #tpu.memory_space<vmem>>, vector<32x32xf32>
    %cst_133 = arith.constant dense<0.000000e+00> : vector<8x32xf32>
    %342 = tpu.matmul %340, %341, %cst_133 {dimension_numbers = #tpu.dot_dimension_numbers<[1], [0], [0], [1], [0, 0, 1, 1], [], []>} : vector<8x32xf32>, vector<32x32xf32>, vector<8x32xf32> -> vector<8x32xf32>
    %c40_134 = arith.constant 40 : index
    %c0_135 = arith.constant 0 : index
    %343 = vector.load %arg4[%c40_134, %c0_135] : memref<80x128xf32, #tpu.memory_space<vmem>>, vector<1x32xf32>
    %344 = vector.broadcast %343 : vector<1x32xf32> to vector<8x32xf32>
    %345 = arith.addf %342, %344 : vector<8x32xf32>
    %c528 = arith.constant 528 : index
    %c0_136 = arith.constant 0 : index
    %346 = vector.load %arg3[%c528, %c0_136] : memref<1136x128xf32, #tpu.memory_space<vmem>>, vector<32x32xf32>
    %cst_137 = arith.constant dense<0.000000e+00> : vector<8x32xf32>
    %347 = tpu.matmul %340, %346, %cst_137 {dimension_numbers = #tpu.dot_dimension_numbers<[1], [0], [0], [1], [0, 0, 1, 1], [], []>} : vector<8x32xf32>, vector<32x32xf32>, vector<8x32xf32> -> vector<8x32xf32>
    %c41 = arith.constant 41 : index
    %c0_138 = arith.constant 0 : index
    %348 = vector.load %arg4[%c41, %c0_138] : memref<80x128xf32, #tpu.memory_space<vmem>>, vector<1x32xf32>
    %349 = vector.broadcast %348 : vector<1x32xf32> to vector<8x32xf32>
    %350 = arith.addf %347, %349 : vector<8x32xf32>
    %c560 = arith.constant 560 : index
    %c0_139 = arith.constant 0 : index
    %351 = vector.load %arg3[%c560, %c0_139] : memref<1136x128xf32, #tpu.memory_space<vmem>>, vector<32x32xf32>
    %cst_140 = arith.constant dense<0.000000e+00> : vector<8x32xf32>
    %352 = tpu.matmul %340, %351, %cst_140 {dimension_numbers = #tpu.dot_dimension_numbers<[1], [0], [0], [1], [0, 0, 1, 1], [], []>} : vector<8x32xf32>, vector<32x32xf32>, vector<8x32xf32> -> vector<8x32xf32>
    %c42 = arith.constant 42 : index
    %c0_141 = arith.constant 0 : index
    %353 = vector.load %arg4[%c42, %c0_141] : memref<80x128xf32, #tpu.memory_space<vmem>>, vector<1x32xf32>
    %354 = vector.broadcast %353 : vector<1x32xf32> to vector<8x32xf32>
    %355 = arith.addf %352, %354 : vector<8x32xf32>
    %cst_142 = arith.constant 0.000000e+00 : f32
    %356 = vector.broadcast %cst_142 : f32 to vector<8x32xf32>
    %357 = vector.extract_strided_slice %345 {offsets = [0, 0], sizes = [8, 8], strides = [1, 1]} : vector<8x32xf32> to vector<8x8xf32>
    %358 = vector.extract_strided_slice %350 {offsets = [0, 0], sizes = [8, 8], strides = [1, 1]} : vector<8x32xf32> to vector<8x8xf32>
    %359 = vector.extract_strided_slice %355 {offsets = [0, 0], sizes = [8, 8], strides = [1, 1]} : vector<8x32xf32> to vector<8x8xf32>
    %cst_143 = arith.constant dense<0.000000e+00> : vector<8x8xf32>
    %360 = tpu.matmul %357, %358, %cst_143 {dimension_numbers = #tpu.dot_dimension_numbers<[1], [1], [0], [0], [0, 0, 1, 0], [], []>} : vector<8x8xf32>, vector<8x8xf32>, vector<8x8xf32> -> vector<8x8xf32>
    %361 = arith.addf %360, %8 : vector<8x8xf32>
    %cst_144 = arith.constant dense<0xFF800000> : vector<8xf32>
    %362 = vector.multi_reduction <maximumf>, %361, %cst_144 [1] : vector<8x8xf32> to vector<8xf32>
    %363 = vector.shape_cast %362 : vector<8xf32> to vector<8x1xf32>
    %364 = vector.broadcast %363 : vector<8x1xf32> to vector<8x8xf32>
    %365 = arith.subf %361, %364 : vector<8x8xf32>
    %366 = math.exp %365 : vector<8x8xf32>
    %cst_145 = arith.constant dense<0.000000e+00> : vector<8xf32>
    %367 = vector.multi_reduction <add>, %366, %cst_145 [1] : vector<8x8xf32> to vector<8xf32>
    %368 = vector.shape_cast %367 : vector<8xf32> to vector<8x1xf32>
    %369 = tpu.reciprocal %368 {approx = true} : vector<8x1xf32> -> vector<8x1xf32>
    %370 = vector.broadcast %369 : vector<8x1xf32> to vector<8x8xf32>
    %371 = arith.mulf %366, %370 : vector<8x8xf32>
    %cst_146 = arith.constant dense<0.000000e+00> : vector<8x8xf32>
    %372 = tpu.matmul %371, %359, %cst_146 {dimension_numbers = #tpu.dot_dimension_numbers<[1], [0], [0], [1], [0, 0, 1, 1], [], []>} : vector<8x8xf32>, vector<8x8xf32>, vector<8x8xf32> -> vector<8x8xf32>
    %c592 = arith.constant 592 : index
    %c0_147 = arith.constant 0 : index
    %373 = vector.load %arg3[%c592, %c0_147] : memref<1136x128xf32, #tpu.memory_space<vmem>>, vector<8x32xf32>
    %cst_148 = arith.constant dense<0.000000e+00> : vector<8x32xf32>
    %374 = tpu.matmul %372, %373, %cst_148 {dimension_numbers = #tpu.dot_dimension_numbers<[1], [0], [0], [1], [0, 0, 1, 1], [], []>} : vector<8x8xf32>, vector<8x32xf32>, vector<8x32xf32> -> vector<8x32xf32>
    %375 = arith.addf %356, %374 : vector<8x32xf32>
    %376 = vector.extract_strided_slice %345 {offsets = [0, 8], sizes = [8, 8], strides = [1, 1]} : vector<8x32xf32> to vector<8x8xf32>
    %377 = vector.extract_strided_slice %350 {offsets = [0, 8], sizes = [8, 8], strides = [1, 1]} : vector<8x32xf32> to vector<8x8xf32>
    %378 = vector.extract_strided_slice %355 {offsets = [0, 8], sizes = [8, 8], strides = [1, 1]} : vector<8x32xf32> to vector<8x8xf32>
    %cst_149 = arith.constant dense<0.000000e+00> : vector<8x8xf32>
    %379 = tpu.matmul %376, %377, %cst_149 {dimension_numbers = #tpu.dot_dimension_numbers<[1], [1], [0], [0], [0, 0, 1, 0], [], []>} : vector<8x8xf32>, vector<8x8xf32>, vector<8x8xf32> -> vector<8x8xf32>
    %380 = arith.addf %379, %8 : vector<8x8xf32>
    %cst_150 = arith.constant dense<0xFF800000> : vector<8xf32>
    %381 = vector.multi_reduction <maximumf>, %380, %cst_150 [1] : vector<8x8xf32> to vector<8xf32>
    %382 = vector.shape_cast %381 : vector<8xf32> to vector<8x1xf32>
    %383 = vector.broadcast %382 : vector<8x1xf32> to vector<8x8xf32>
    %384 = arith.subf %380, %383 : vector<8x8xf32>
    %385 = math.exp %384 : vector<8x8xf32>
    %cst_151 = arith.constant dense<0.000000e+00> : vector<8xf32>
    %386 = vector.multi_reduction <add>, %385, %cst_151 [1] : vector<8x8xf32> to vector<8xf32>
    %387 = vector.shape_cast %386 : vector<8xf32> to vector<8x1xf32>
    %388 = tpu.reciprocal %387 {approx = true} : vector<8x1xf32> -> vector<8x1xf32>
    %389 = vector.broadcast %388 : vector<8x1xf32> to vector<8x8xf32>
    %390 = arith.mulf %385, %389 : vector<8x8xf32>
    %cst_152 = arith.constant dense<0.000000e+00> : vector<8x8xf32>
    %391 = tpu.matmul %390, %378, %cst_152 {dimension_numbers = #tpu.dot_dimension_numbers<[1], [0], [0], [1], [0, 0, 1, 1], [], []>} : vector<8x8xf32>, vector<8x8xf32>, vector<8x8xf32> -> vector<8x8xf32>
    %c600 = arith.constant 600 : index
    %c0_153 = arith.constant 0 : index
    %392 = vector.load %arg3[%c600, %c0_153] : memref<1136x128xf32, #tpu.memory_space<vmem>>, vector<8x32xf32>
    %cst_154 = arith.constant dense<0.000000e+00> : vector<8x32xf32>
    %393 = tpu.matmul %391, %392, %cst_154 {dimension_numbers = #tpu.dot_dimension_numbers<[1], [0], [0], [1], [0, 0, 1, 1], [], []>} : vector<8x8xf32>, vector<8x32xf32>, vector<8x32xf32> -> vector<8x32xf32>
    %394 = arith.addf %375, %393 : vector<8x32xf32>
    %395 = vector.extract_strided_slice %345 {offsets = [0, 16], sizes = [8, 8], strides = [1, 1]} : vector<8x32xf32> to vector<8x8xf32>
    %396 = vector.extract_strided_slice %350 {offsets = [0, 16], sizes = [8, 8], strides = [1, 1]} : vector<8x32xf32> to vector<8x8xf32>
    %397 = vector.extract_strided_slice %355 {offsets = [0, 16], sizes = [8, 8], strides = [1, 1]} : vector<8x32xf32> to vector<8x8xf32>
    %cst_155 = arith.constant dense<0.000000e+00> : vector<8x8xf32>
    %398 = tpu.matmul %395, %396, %cst_155 {dimension_numbers = #tpu.dot_dimension_numbers<[1], [1], [0], [0], [0, 0, 1, 0], [], []>} : vector<8x8xf32>, vector<8x8xf32>, vector<8x8xf32> -> vector<8x8xf32>
    %399 = arith.addf %398, %8 : vector<8x8xf32>
    %cst_156 = arith.constant dense<0xFF800000> : vector<8xf32>
    %400 = vector.multi_reduction <maximumf>, %399, %cst_156 [1] : vector<8x8xf32> to vector<8xf32>
    %401 = vector.shape_cast %400 : vector<8xf32> to vector<8x1xf32>
    %402 = vector.broadcast %401 : vector<8x1xf32> to vector<8x8xf32>
    %403 = arith.subf %399, %402 : vector<8x8xf32>
    %404 = math.exp %403 : vector<8x8xf32>
    %cst_157 = arith.constant dense<0.000000e+00> : vector<8xf32>
    %405 = vector.multi_reduction <add>, %404, %cst_157 [1] : vector<8x8xf32> to vector<8xf32>
    %406 = vector.shape_cast %405 : vector<8xf32> to vector<8x1xf32>
    %407 = tpu.reciprocal %406 {approx = true} : vector<8x1xf32> -> vector<8x1xf32>
    %408 = vector.broadcast %407 : vector<8x1xf32> to vector<8x8xf32>
    %409 = arith.mulf %404, %408 : vector<8x8xf32>
    %cst_158 = arith.constant dense<0.000000e+00> : vector<8x8xf32>
    %410 = tpu.matmul %409, %397, %cst_158 {dimension_numbers = #tpu.dot_dimension_numbers<[1], [0], [0], [1], [0, 0, 1, 1], [], []>} : vector<8x8xf32>, vector<8x8xf32>, vector<8x8xf32> -> vector<8x8xf32>
    %c608 = arith.constant 608 : index
    %c0_159 = arith.constant 0 : index
    %411 = vector.load %arg3[%c608, %c0_159] : memref<1136x128xf32, #tpu.memory_space<vmem>>, vector<8x32xf32>
    %cst_160 = arith.constant dense<0.000000e+00> : vector<8x32xf32>
    %412 = tpu.matmul %410, %411, %cst_160 {dimension_numbers = #tpu.dot_dimension_numbers<[1], [0], [0], [1], [0, 0, 1, 1], [], []>} : vector<8x8xf32>, vector<8x32xf32>, vector<8x32xf32> -> vector<8x32xf32>
    %413 = arith.addf %394, %412 : vector<8x32xf32>
    %414 = vector.extract_strided_slice %345 {offsets = [0, 24], sizes = [8, 8], strides = [1, 1]} : vector<8x32xf32> to vector<8x8xf32>
    %415 = vector.extract_strided_slice %350 {offsets = [0, 24], sizes = [8, 8], strides = [1, 1]} : vector<8x32xf32> to vector<8x8xf32>
    %416 = vector.extract_strided_slice %355 {offsets = [0, 24], sizes = [8, 8], strides = [1, 1]} : vector<8x32xf32> to vector<8x8xf32>
    %cst_161 = arith.constant dense<0.000000e+00> : vector<8x8xf32>
    %417 = tpu.matmul %414, %415, %cst_161 {dimension_numbers = #tpu.dot_dimension_numbers<[1], [1], [0], [0], [0, 0, 1, 0], [], []>} : vector<8x8xf32>, vector<8x8xf32>, vector<8x8xf32> -> vector<8x8xf32>
    %418 = arith.addf %417, %8 : vector<8x8xf32>
    %cst_162 = arith.constant dense<0xFF800000> : vector<8xf32>
    %419 = vector.multi_reduction <maximumf>, %418, %cst_162 [1] : vector<8x8xf32> to vector<8xf32>
    %420 = vector.shape_cast %419 : vector<8xf32> to vector<8x1xf32>
    %421 = vector.broadcast %420 : vector<8x1xf32> to vector<8x8xf32>
    %422 = arith.subf %418, %421 : vector<8x8xf32>
    %423 = math.exp %422 : vector<8x8xf32>
    %cst_163 = arith.constant dense<0.000000e+00> : vector<8xf32>
    %424 = vector.multi_reduction <add>, %423, %cst_163 [1] : vector<8x8xf32> to vector<8xf32>
    %425 = vector.shape_cast %424 : vector<8xf32> to vector<8x1xf32>
    %426 = tpu.reciprocal %425 {approx = true} : vector<8x1xf32> -> vector<8x1xf32>
    %427 = vector.broadcast %426 : vector<8x1xf32> to vector<8x8xf32>
    %428 = arith.mulf %423, %427 : vector<8x8xf32>
    %cst_164 = arith.constant dense<0.000000e+00> : vector<8x8xf32>
    %429 = tpu.matmul %428, %416, %cst_164 {dimension_numbers = #tpu.dot_dimension_numbers<[1], [0], [0], [1], [0, 0, 1, 1], [], []>} : vector<8x8xf32>, vector<8x8xf32>, vector<8x8xf32> -> vector<8x8xf32>
    %c616 = arith.constant 616 : index
    %c0_165 = arith.constant 0 : index
    %430 = vector.load %arg3[%c616, %c0_165] : memref<1136x128xf32, #tpu.memory_space<vmem>>, vector<8x32xf32>
    %cst_166 = arith.constant dense<0.000000e+00> : vector<8x32xf32>
    %431 = tpu.matmul %429, %430, %cst_166 {dimension_numbers = #tpu.dot_dimension_numbers<[1], [0], [0], [1], [0, 0, 1, 1], [], []>} : vector<8x8xf32>, vector<8x32xf32>, vector<8x32xf32> -> vector<8x32xf32>
    %432 = arith.addf %413, %431 : vector<8x32xf32>
    %c43 = arith.constant 43 : index
    %c0_167 = arith.constant 0 : index
    %433 = vector.load %arg4[%c43, %c0_167] : memref<80x128xf32, #tpu.memory_space<vmem>>, vector<1x32xf32>
    %434 = vector.broadcast %433 : vector<1x32xf32> to vector<8x32xf32>
    %435 = arith.addf %432, %434 : vector<8x32xf32>
    %436 = arith.addf %340, %435 : vector<8x32xf32>
    %c46 = arith.constant 46 : index
    %c0_168 = arith.constant 0 : index
    %437 = vector.load %arg4[%c46, %c0_168] : memref<80x128xf32, #tpu.memory_space<vmem>>, vector<1x32xf32>
    %c47 = arith.constant 47 : index
    %c0_169 = arith.constant 0 : index
    %438 = vector.load %arg4[%c47, %c0_169] : memref<80x128xf32, #tpu.memory_space<vmem>>, vector<1x32xf32>
    %cst_170 = arith.constant dense<0.000000e+00> : vector<8xf32>
    %439 = vector.multi_reduction <add>, %436, %cst_170 [1] : vector<8x32xf32> to vector<8xf32>
    %440 = vector.shape_cast %439 : vector<8xf32> to vector<8x1xf32>
    %cst_171 = arith.constant 3.200000e+01 : f32
    %441 = vector.broadcast %cst_171 : f32 to vector<8x1xf32>
    %442 = arith.divf %440, %441 : vector<8x1xf32>
    %443 = vector.broadcast %442 : vector<8x1xf32> to vector<8x32xf32>
    %444 = arith.subf %436, %443 : vector<8x32xf32>
    %445 = arith.mulf %444, %444 : vector<8x32xf32>
    %cst_172 = arith.constant dense<0.000000e+00> : vector<8xf32>
    %446 = vector.multi_reduction <add>, %445, %cst_172 [1] : vector<8x32xf32> to vector<8xf32>
    %447 = vector.shape_cast %446 : vector<8xf32> to vector<8x1xf32>
    %cst_173 = arith.constant 3.200000e+01 : f32
    %448 = vector.broadcast %cst_173 : f32 to vector<8x1xf32>
    %449 = arith.divf %447, %448 : vector<8x1xf32>
    %450 = vector.broadcast %442 : vector<8x1xf32> to vector<8x32xf32>
    %451 = arith.subf %436, %450 : vector<8x32xf32>
    %cst_174 = arith.constant 9.99999974E-6 : f32
    %452 = vector.broadcast %cst_174 : f32 to vector<8x1xf32>
    %453 = arith.addf %449, %452 : vector<8x1xf32>
    %454 = math.rsqrt %453 : vector<8x1xf32>
    %455 = vector.broadcast %454 : vector<8x1xf32> to vector<8x32xf32>
    %456 = arith.mulf %451, %455 : vector<8x32xf32>
    %457 = vector.broadcast %437 : vector<1x32xf32> to vector<8x32xf32>
    %458 = arith.mulf %456, %457 : vector<8x32xf32>
    %459 = vector.broadcast %438 : vector<1x32xf32> to vector<8x32xf32>
    %460 = arith.addf %458, %459 : vector<8x32xf32>
    %c624 = arith.constant 624 : index
    %c0_175 = arith.constant 0 : index
    %461 = vector.load %arg3[%c624, %c0_175] : memref<1136x128xf32, #tpu.memory_space<vmem>>, vector<32x64xf32>
    %c656 = arith.constant 656 : index
    %c0_176 = arith.constant 0 : index
    %462 = vector.load %arg3[%c656, %c0_176] : memref<1136x128xf32, #tpu.memory_space<vmem>>, vector<64x32xf32>
    %cst_177 = arith.constant dense<0.000000e+00> : vector<8x64xf32>
    %463 = tpu.matmul %460, %461, %cst_177 {dimension_numbers = #tpu.dot_dimension_numbers<[1], [0], [0], [1], [0, 0, 1, 1], [], []>} : vector<8x32xf32>, vector<32x64xf32>, vector<8x64xf32> -> vector<8x64xf32>
    %c44 = arith.constant 44 : index
    %c0_178 = arith.constant 0 : index
    %464 = vector.load %arg4[%c44, %c0_178] : memref<80x128xf32, #tpu.memory_space<vmem>>, vector<1x64xf32>
    %465 = vector.broadcast %464 : vector<1x64xf32> to vector<8x64xf32>
    %466 = arith.addf %463, %465 : vector<8x64xf32>
    %cst_179 = arith.constant 0.000000e+00 : f32
    %467 = vector.broadcast %cst_179 : f32 to vector<8x64xf32>
    %468 = arith.maximumf %466, %467 : vector<8x64xf32>
    %cst_180 = arith.constant dense<0.000000e+00> : vector<8x32xf32>
    %469 = tpu.matmul %468, %462, %cst_180 {dimension_numbers = #tpu.dot_dimension_numbers<[1], [0], [0], [1], [0, 0, 1, 1], [], []>} : vector<8x64xf32>, vector<64x32xf32>, vector<8x32xf32> -> vector<8x32xf32>
    %c45 = arith.constant 45 : index
    %c0_181 = arith.constant 0 : index
    %470 = vector.load %arg4[%c45, %c0_181] : memref<80x128xf32, #tpu.memory_space<vmem>>, vector<1x32xf32>
    %471 = vector.broadcast %470 : vector<1x32xf32> to vector<8x32xf32>
    %472 = arith.addf %469, %471 : vector<8x32xf32>
    %473 = arith.addf %460, %472 : vector<8x32xf32>
    %c48_182 = arith.constant 48 : index
    %c0_183 = arith.constant 0 : index
    %474 = vector.load %arg4[%c48_182, %c0_183] : memref<80x128xf32, #tpu.memory_space<vmem>>, vector<1x32xf32>
    %c49 = arith.constant 49 : index
    %c0_184 = arith.constant 0 : index
    %475 = vector.load %arg4[%c49, %c0_184] : memref<80x128xf32, #tpu.memory_space<vmem>>, vector<1x32xf32>
    %cst_185 = arith.constant dense<0.000000e+00> : vector<8xf32>
    %476 = vector.multi_reduction <add>, %473, %cst_185 [1] : vector<8x32xf32> to vector<8xf32>
    %477 = vector.shape_cast %476 : vector<8xf32> to vector<8x1xf32>
    %cst_186 = arith.constant 3.200000e+01 : f32
    %478 = vector.broadcast %cst_186 : f32 to vector<8x1xf32>
    %479 = arith.divf %477, %478 : vector<8x1xf32>
    %480 = vector.broadcast %479 : vector<8x1xf32> to vector<8x32xf32>
    %481 = arith.subf %473, %480 : vector<8x32xf32>
    %482 = arith.mulf %481, %481 : vector<8x32xf32>
    %cst_187 = arith.constant dense<0.000000e+00> : vector<8xf32>
    %483 = vector.multi_reduction <add>, %482, %cst_187 [1] : vector<8x32xf32> to vector<8xf32>
    %484 = vector.shape_cast %483 : vector<8xf32> to vector<8x1xf32>
    %cst_188 = arith.constant 3.200000e+01 : f32
    %485 = vector.broadcast %cst_188 : f32 to vector<8x1xf32>
    %486 = arith.divf %484, %485 : vector<8x1xf32>
    %487 = vector.broadcast %479 : vector<8x1xf32> to vector<8x32xf32>
    %488 = arith.subf %473, %487 : vector<8x32xf32>
    %cst_189 = arith.constant 9.99999974E-6 : f32
    %489 = vector.broadcast %cst_189 : f32 to vector<8x1xf32>
    %490 = arith.addf %486, %489 : vector<8x1xf32>
    %491 = math.rsqrt %490 : vector<8x1xf32>
    %492 = vector.broadcast %491 : vector<8x1xf32> to vector<8x32xf32>
    %493 = arith.mulf %488, %492 : vector<8x32xf32>
    %494 = vector.broadcast %474 : vector<1x32xf32> to vector<8x32xf32>
    %495 = arith.mulf %493, %494 : vector<8x32xf32>
    %496 = vector.broadcast %475 : vector<1x32xf32> to vector<8x32xf32>
    %497 = arith.addf %495, %496 : vector<8x32xf32>
    %c720 = arith.constant 720 : index
    %c0_190 = arith.constant 0 : index
    %498 = vector.load %arg3[%c720, %c0_190] : memref<1136x128xf32, #tpu.memory_space<vmem>>, vector<32x32xf32>
    %cst_191 = arith.constant dense<0.000000e+00> : vector<8x32xf32>
    %499 = tpu.matmul %497, %498, %cst_191 {dimension_numbers = #tpu.dot_dimension_numbers<[1], [0], [0], [1], [0, 0, 1, 1], [], []>} : vector<8x32xf32>, vector<32x32xf32>, vector<8x32xf32> -> vector<8x32xf32>
    %c56 = arith.constant 56 : index
    %c0_192 = arith.constant 0 : index
    %500 = vector.load %arg4[%c56, %c0_192] : memref<80x128xf32, #tpu.memory_space<vmem>>, vector<1x32xf32>
    %501 = vector.broadcast %500 : vector<1x32xf32> to vector<8x32xf32>
    %502 = arith.addf %499, %501 : vector<8x32xf32>
    %c752 = arith.constant 752 : index
    %c0_193 = arith.constant 0 : index
    %503 = vector.load %arg3[%c752, %c0_193] : memref<1136x128xf32, #tpu.memory_space<vmem>>, vector<32x32xf32>
    %cst_194 = arith.constant dense<0.000000e+00> : vector<8x32xf32>
    %504 = tpu.matmul %497, %503, %cst_194 {dimension_numbers = #tpu.dot_dimension_numbers<[1], [0], [0], [1], [0, 0, 1, 1], [], []>} : vector<8x32xf32>, vector<32x32xf32>, vector<8x32xf32> -> vector<8x32xf32>
    %c57 = arith.constant 57 : index
    %c0_195 = arith.constant 0 : index
    %505 = vector.load %arg4[%c57, %c0_195] : memref<80x128xf32, #tpu.memory_space<vmem>>, vector<1x32xf32>
    %506 = vector.broadcast %505 : vector<1x32xf32> to vector<8x32xf32>
    %507 = arith.addf %504, %506 : vector<8x32xf32>
    %c784 = arith.constant 784 : index
    %c0_196 = arith.constant 0 : index
    %508 = vector.load %arg3[%c784, %c0_196] : memref<1136x128xf32, #tpu.memory_space<vmem>>, vector<32x32xf32>
    %cst_197 = arith.constant dense<0.000000e+00> : vector<8x32xf32>
    %509 = tpu.matmul %497, %508, %cst_197 {dimension_numbers = #tpu.dot_dimension_numbers<[1], [0], [0], [1], [0, 0, 1, 1], [], []>} : vector<8x32xf32>, vector<32x32xf32>, vector<8x32xf32> -> vector<8x32xf32>
    %c58 = arith.constant 58 : index
    %c0_198 = arith.constant 0 : index
    %510 = vector.load %arg4[%c58, %c0_198] : memref<80x128xf32, #tpu.memory_space<vmem>>, vector<1x32xf32>
    %511 = vector.broadcast %510 : vector<1x32xf32> to vector<8x32xf32>
    %512 = arith.addf %509, %511 : vector<8x32xf32>
    %cst_199 = arith.constant 0.000000e+00 : f32
    %513 = vector.broadcast %cst_199 : f32 to vector<8x32xf32>
    %514 = vector.extract_strided_slice %502 {offsets = [0, 0], sizes = [8, 8], strides = [1, 1]} : vector<8x32xf32> to vector<8x8xf32>
    %515 = vector.extract_strided_slice %507 {offsets = [0, 0], sizes = [8, 8], strides = [1, 1]} : vector<8x32xf32> to vector<8x8xf32>
    %516 = vector.extract_strided_slice %512 {offsets = [0, 0], sizes = [8, 8], strides = [1, 1]} : vector<8x32xf32> to vector<8x8xf32>
    %cst_200 = arith.constant dense<0.000000e+00> : vector<8x8xf32>
    %517 = tpu.matmul %514, %515, %cst_200 {dimension_numbers = #tpu.dot_dimension_numbers<[1], [1], [0], [0], [0, 0, 1, 0], [], []>} : vector<8x8xf32>, vector<8x8xf32>, vector<8x8xf32> -> vector<8x8xf32>
    %518 = arith.addf %517, %8 : vector<8x8xf32>
    %cst_201 = arith.constant dense<0xFF800000> : vector<8xf32>
    %519 = vector.multi_reduction <maximumf>, %518, %cst_201 [1] : vector<8x8xf32> to vector<8xf32>
    %520 = vector.shape_cast %519 : vector<8xf32> to vector<8x1xf32>
    %521 = vector.broadcast %520 : vector<8x1xf32> to vector<8x8xf32>
    %522 = arith.subf %518, %521 : vector<8x8xf32>
    %523 = math.exp %522 : vector<8x8xf32>
    %cst_202 = arith.constant dense<0.000000e+00> : vector<8xf32>
    %524 = vector.multi_reduction <add>, %523, %cst_202 [1] : vector<8x8xf32> to vector<8xf32>
    %525 = vector.shape_cast %524 : vector<8xf32> to vector<8x1xf32>
    %526 = tpu.reciprocal %525 {approx = true} : vector<8x1xf32> -> vector<8x1xf32>
    %527 = vector.broadcast %526 : vector<8x1xf32> to vector<8x8xf32>
    %528 = arith.mulf %523, %527 : vector<8x8xf32>
    %cst_203 = arith.constant dense<0.000000e+00> : vector<8x8xf32>
    %529 = tpu.matmul %528, %516, %cst_203 {dimension_numbers = #tpu.dot_dimension_numbers<[1], [0], [0], [1], [0, 0, 1, 1], [], []>} : vector<8x8xf32>, vector<8x8xf32>, vector<8x8xf32> -> vector<8x8xf32>
    %c816 = arith.constant 816 : index
    %c0_204 = arith.constant 0 : index
    %530 = vector.load %arg3[%c816, %c0_204] : memref<1136x128xf32, #tpu.memory_space<vmem>>, vector<8x32xf32>
    %cst_205 = arith.constant dense<0.000000e+00> : vector<8x32xf32>
    %531 = tpu.matmul %529, %530, %cst_205 {dimension_numbers = #tpu.dot_dimension_numbers<[1], [0], [0], [1], [0, 0, 1, 1], [], []>} : vector<8x8xf32>, vector<8x32xf32>, vector<8x32xf32> -> vector<8x32xf32>
    %532 = arith.addf %513, %531 : vector<8x32xf32>
    %533 = vector.extract_strided_slice %502 {offsets = [0, 8], sizes = [8, 8], strides = [1, 1]} : vector<8x32xf32> to vector<8x8xf32>
    %534 = vector.extract_strided_slice %507 {offsets = [0, 8], sizes = [8, 8], strides = [1, 1]} : vector<8x32xf32> to vector<8x8xf32>
    %535 = vector.extract_strided_slice %512 {offsets = [0, 8], sizes = [8, 8], strides = [1, 1]} : vector<8x32xf32> to vector<8x8xf32>
    %cst_206 = arith.constant dense<0.000000e+00> : vector<8x8xf32>
    %536 = tpu.matmul %533, %534, %cst_206 {dimension_numbers = #tpu.dot_dimension_numbers<[1], [1], [0], [0], [0, 0, 1, 0], [], []>} : vector<8x8xf32>, vector<8x8xf32>, vector<8x8xf32> -> vector<8x8xf32>
    %537 = arith.addf %536, %8 : vector<8x8xf32>
    %cst_207 = arith.constant dense<0xFF800000> : vector<8xf32>
    %538 = vector.multi_reduction <maximumf>, %537, %cst_207 [1] : vector<8x8xf32> to vector<8xf32>
    %539 = vector.shape_cast %538 : vector<8xf32> to vector<8x1xf32>
    %540 = vector.broadcast %539 : vector<8x1xf32> to vector<8x8xf32>
    %541 = arith.subf %537, %540 : vector<8x8xf32>
    %542 = math.exp %541 : vector<8x8xf32>
    %cst_208 = arith.constant dense<0.000000e+00> : vector<8xf32>
    %543 = vector.multi_reduction <add>, %542, %cst_208 [1] : vector<8x8xf32> to vector<8xf32>
    %544 = vector.shape_cast %543 : vector<8xf32> to vector<8x1xf32>
    %545 = tpu.reciprocal %544 {approx = true} : vector<8x1xf32> -> vector<8x1xf32>
    %546 = vector.broadcast %545 : vector<8x1xf32> to vector<8x8xf32>
    %547 = arith.mulf %542, %546 : vector<8x8xf32>
    %cst_209 = arith.constant dense<0.000000e+00> : vector<8x8xf32>
    %548 = tpu.matmul %547, %535, %cst_209 {dimension_numbers = #tpu.dot_dimension_numbers<[1], [0], [0], [1], [0, 0, 1, 1], [], []>} : vector<8x8xf32>, vector<8x8xf32>, vector<8x8xf32> -> vector<8x8xf32>
    %c824 = arith.constant 824 : index
    %c0_210 = arith.constant 0 : index
    %549 = vector.load %arg3[%c824, %c0_210] : memref<1136x128xf32, #tpu.memory_space<vmem>>, vector<8x32xf32>
    %cst_211 = arith.constant dense<0.000000e+00> : vector<8x32xf32>
    %550 = tpu.matmul %548, %549, %cst_211 {dimension_numbers = #tpu.dot_dimension_numbers<[1], [0], [0], [1], [0, 0, 1, 1], [], []>} : vector<8x8xf32>, vector<8x32xf32>, vector<8x32xf32> -> vector<8x32xf32>
    %551 = arith.addf %532, %550 : vector<8x32xf32>
    %552 = vector.extract_strided_slice %502 {offsets = [0, 16], sizes = [8, 8], strides = [1, 1]} : vector<8x32xf32> to vector<8x8xf32>
    %553 = vector.extract_strided_slice %507 {offsets = [0, 16], sizes = [8, 8], strides = [1, 1]} : vector<8x32xf32> to vector<8x8xf32>
    %554 = vector.extract_strided_slice %512 {offsets = [0, 16], sizes = [8, 8], strides = [1, 1]} : vector<8x32xf32> to vector<8x8xf32>
    %cst_212 = arith.constant dense<0.000000e+00> : vector<8x8xf32>
    %555 = tpu.matmul %552, %553, %cst_212 {dimension_numbers = #tpu.dot_dimension_numbers<[1], [1], [0], [0], [0, 0, 1, 0], [], []>} : vector<8x8xf32>, vector<8x8xf32>, vector<8x8xf32> -> vector<8x8xf32>
    %556 = arith.addf %555, %8 : vector<8x8xf32>
    %cst_213 = arith.constant dense<0xFF800000> : vector<8xf32>
    %557 = vector.multi_reduction <maximumf>, %556, %cst_213 [1] : vector<8x8xf32> to vector<8xf32>
    %558 = vector.shape_cast %557 : vector<8xf32> to vector<8x1xf32>
    %559 = vector.broadcast %558 : vector<8x1xf32> to vector<8x8xf32>
    %560 = arith.subf %556, %559 : vector<8x8xf32>
    %561 = math.exp %560 : vector<8x8xf32>
    %cst_214 = arith.constant dense<0.000000e+00> : vector<8xf32>
    %562 = vector.multi_reduction <add>, %561, %cst_214 [1] : vector<8x8xf32> to vector<8xf32>
    %563 = vector.shape_cast %562 : vector<8xf32> to vector<8x1xf32>
    %564 = tpu.reciprocal %563 {approx = true} : vector<8x1xf32> -> vector<8x1xf32>
    %565 = vector.broadcast %564 : vector<8x1xf32> to vector<8x8xf32>
    %566 = arith.mulf %561, %565 : vector<8x8xf32>
    %cst_215 = arith.constant dense<0.000000e+00> : vector<8x8xf32>
    %567 = tpu.matmul %566, %554, %cst_215 {dimension_numbers = #tpu.dot_dimension_numbers<[1], [0], [0], [1], [0, 0, 1, 1], [], []>} : vector<8x8xf32>, vector<8x8xf32>, vector<8x8xf32> -> vector<8x8xf32>
    %c832 = arith.constant 832 : index
    %c0_216 = arith.constant 0 : index
    %568 = vector.load %arg3[%c832, %c0_216] : memref<1136x128xf32, #tpu.memory_space<vmem>>, vector<8x32xf32>
    %cst_217 = arith.constant dense<0.000000e+00> : vector<8x32xf32>
    %569 = tpu.matmul %567, %568, %cst_217 {dimension_numbers = #tpu.dot_dimension_numbers<[1], [0], [0], [1], [0, 0, 1, 1], [], []>} : vector<8x8xf32>, vector<8x32xf32>, vector<8x32xf32> -> vector<8x32xf32>
    %570 = arith.addf %551, %569 : vector<8x32xf32>
    %571 = vector.extract_strided_slice %502 {offsets = [0, 24], sizes = [8, 8], strides = [1, 1]} : vector<8x32xf32> to vector<8x8xf32>
    %572 = vector.extract_strided_slice %507 {offsets = [0, 24], sizes = [8, 8], strides = [1, 1]} : vector<8x32xf32> to vector<8x8xf32>
    %573 = vector.extract_strided_slice %512 {offsets = [0, 24], sizes = [8, 8], strides = [1, 1]} : vector<8x32xf32> to vector<8x8xf32>
    %cst_218 = arith.constant dense<0.000000e+00> : vector<8x8xf32>
    %574 = tpu.matmul %571, %572, %cst_218 {dimension_numbers = #tpu.dot_dimension_numbers<[1], [1], [0], [0], [0, 0, 1, 0], [], []>} : vector<8x8xf32>, vector<8x8xf32>, vector<8x8xf32> -> vector<8x8xf32>
    %575 = arith.addf %574, %8 : vector<8x8xf32>
    %cst_219 = arith.constant dense<0xFF800000> : vector<8xf32>
    %576 = vector.multi_reduction <maximumf>, %575, %cst_219 [1] : vector<8x8xf32> to vector<8xf32>
    %577 = vector.shape_cast %576 : vector<8xf32> to vector<8x1xf32>
    %578 = vector.broadcast %577 : vector<8x1xf32> to vector<8x8xf32>
    %579 = arith.subf %575, %578 : vector<8x8xf32>
    %580 = math.exp %579 : vector<8x8xf32>
    %cst_220 = arith.constant dense<0.000000e+00> : vector<8xf32>
    %581 = vector.multi_reduction <add>, %580, %cst_220 [1] : vector<8x8xf32> to vector<8xf32>
    %582 = vector.shape_cast %581 : vector<8xf32> to vector<8x1xf32>
    %583 = tpu.reciprocal %582 {approx = true} : vector<8x1xf32> -> vector<8x1xf32>
    %584 = vector.broadcast %583 : vector<8x1xf32> to vector<8x8xf32>
    %585 = arith.mulf %580, %584 : vector<8x8xf32>
    %cst_221 = arith.constant dense<0.000000e+00> : vector<8x8xf32>
    %586 = tpu.matmul %585, %573, %cst_221 {dimension_numbers = #tpu.dot_dimension_numbers<[1], [0], [0], [1], [0, 0, 1, 1], [], []>} : vector<8x8xf32>, vector<8x8xf32>, vector<8x8xf32> -> vector<8x8xf32>
    %c840 = arith.constant 840 : index
    %c0_222 = arith.constant 0 : index
    %587 = vector.load %arg3[%c840, %c0_222] : memref<1136x128xf32, #tpu.memory_space<vmem>>, vector<8x32xf32>
    %cst_223 = arith.constant dense<0.000000e+00> : vector<8x32xf32>
    %588 = tpu.matmul %586, %587, %cst_223 {dimension_numbers = #tpu.dot_dimension_numbers<[1], [0], [0], [1], [0, 0, 1, 1], [], []>} : vector<8x8xf32>, vector<8x32xf32>, vector<8x32xf32> -> vector<8x32xf32>
    %589 = arith.addf %570, %588 : vector<8x32xf32>
    %c59 = arith.constant 59 : index
    %c0_224 = arith.constant 0 : index
    %590 = vector.load %arg4[%c59, %c0_224] : memref<80x128xf32, #tpu.memory_space<vmem>>, vector<1x32xf32>
    %591 = vector.broadcast %590 : vector<1x32xf32> to vector<8x32xf32>
    %592 = arith.addf %589, %591 : vector<8x32xf32>
    %593 = arith.addf %497, %592 : vector<8x32xf32>
    %c62 = arith.constant 62 : index
    %c0_225 = arith.constant 0 : index
    %594 = vector.load %arg4[%c62, %c0_225] : memref<80x128xf32, #tpu.memory_space<vmem>>, vector<1x32xf32>
    %c63 = arith.constant 63 : index
    %c0_226 = arith.constant 0 : index
    %595 = vector.load %arg4[%c63, %c0_226] : memref<80x128xf32, #tpu.memory_space<vmem>>, vector<1x32xf32>
    %cst_227 = arith.constant dense<0.000000e+00> : vector<8xf32>
    %596 = vector.multi_reduction <add>, %593, %cst_227 [1] : vector<8x32xf32> to vector<8xf32>
    %597 = vector.shape_cast %596 : vector<8xf32> to vector<8x1xf32>
    %cst_228 = arith.constant 3.200000e+01 : f32
    %598 = vector.broadcast %cst_228 : f32 to vector<8x1xf32>
    %599 = arith.divf %597, %598 : vector<8x1xf32>
    %600 = vector.broadcast %599 : vector<8x1xf32> to vector<8x32xf32>
    %601 = arith.subf %593, %600 : vector<8x32xf32>
    %602 = arith.mulf %601, %601 : vector<8x32xf32>
    %cst_229 = arith.constant dense<0.000000e+00> : vector<8xf32>
    %603 = vector.multi_reduction <add>, %602, %cst_229 [1] : vector<8x32xf32> to vector<8xf32>
    %604 = vector.shape_cast %603 : vector<8xf32> to vector<8x1xf32>
    %cst_230 = arith.constant 3.200000e+01 : f32
    %605 = vector.broadcast %cst_230 : f32 to vector<8x1xf32>
    %606 = arith.divf %604, %605 : vector<8x1xf32>
    %607 = vector.broadcast %599 : vector<8x1xf32> to vector<8x32xf32>
    %608 = arith.subf %593, %607 : vector<8x32xf32>
    %cst_231 = arith.constant 9.99999974E-6 : f32
    %609 = vector.broadcast %cst_231 : f32 to vector<8x1xf32>
    %610 = arith.addf %606, %609 : vector<8x1xf32>
    %611 = math.rsqrt %610 : vector<8x1xf32>
    %612 = vector.broadcast %611 : vector<8x1xf32> to vector<8x32xf32>
    %613 = arith.mulf %608, %612 : vector<8x32xf32>
    %614 = vector.broadcast %594 : vector<1x32xf32> to vector<8x32xf32>
    %615 = arith.mulf %613, %614 : vector<8x32xf32>
    %616 = vector.broadcast %595 : vector<1x32xf32> to vector<8x32xf32>
    %617 = arith.addf %615, %616 : vector<8x32xf32>
    %c848 = arith.constant 848 : index
    %c0_232 = arith.constant 0 : index
    %618 = vector.load %arg3[%c848, %c0_232] : memref<1136x128xf32, #tpu.memory_space<vmem>>, vector<32x64xf32>
    %c880 = arith.constant 880 : index
    %c0_233 = arith.constant 0 : index
    %619 = vector.load %arg3[%c880, %c0_233] : memref<1136x128xf32, #tpu.memory_space<vmem>>, vector<64x32xf32>
    %cst_234 = arith.constant dense<0.000000e+00> : vector<8x64xf32>
    %620 = tpu.matmul %617, %618, %cst_234 {dimension_numbers = #tpu.dot_dimension_numbers<[1], [0], [0], [1], [0, 0, 1, 1], [], []>} : vector<8x32xf32>, vector<32x64xf32>, vector<8x64xf32> -> vector<8x64xf32>
    %c60 = arith.constant 60 : index
    %c0_235 = arith.constant 0 : index
    %621 = vector.load %arg4[%c60, %c0_235] : memref<80x128xf32, #tpu.memory_space<vmem>>, vector<1x64xf32>
    %622 = vector.broadcast %621 : vector<1x64xf32> to vector<8x64xf32>
    %623 = arith.addf %620, %622 : vector<8x64xf32>
    %cst_236 = arith.constant 0.000000e+00 : f32
    %624 = vector.broadcast %cst_236 : f32 to vector<8x64xf32>
    %625 = arith.maximumf %623, %624 : vector<8x64xf32>
    %cst_237 = arith.constant dense<0.000000e+00> : vector<8x32xf32>
    %626 = tpu.matmul %625, %619, %cst_237 {dimension_numbers = #tpu.dot_dimension_numbers<[1], [0], [0], [1], [0, 0, 1, 1], [], []>} : vector<8x64xf32>, vector<64x32xf32>, vector<8x32xf32> -> vector<8x32xf32>
    %c61 = arith.constant 61 : index
    %c0_238 = arith.constant 0 : index
    %627 = vector.load %arg4[%c61, %c0_238] : memref<80x128xf32, #tpu.memory_space<vmem>>, vector<1x32xf32>
    %628 = vector.broadcast %627 : vector<1x32xf32> to vector<8x32xf32>
    %629 = arith.addf %626, %628 : vector<8x32xf32>
    %630 = arith.addf %617, %629 : vector<8x32xf32>
    %c64 = arith.constant 64 : index
    %c0_239 = arith.constant 0 : index
    %631 = vector.load %arg4[%c64, %c0_239] : memref<80x128xf32, #tpu.memory_space<vmem>>, vector<1x32xf32>
    %c65 = arith.constant 65 : index
    %c0_240 = arith.constant 0 : index
    %632 = vector.load %arg4[%c65, %c0_240] : memref<80x128xf32, #tpu.memory_space<vmem>>, vector<1x32xf32>
    %cst_241 = arith.constant dense<0.000000e+00> : vector<8xf32>
    %633 = vector.multi_reduction <add>, %630, %cst_241 [1] : vector<8x32xf32> to vector<8xf32>
    %634 = vector.shape_cast %633 : vector<8xf32> to vector<8x1xf32>
    %cst_242 = arith.constant 3.200000e+01 : f32
    %635 = vector.broadcast %cst_242 : f32 to vector<8x1xf32>
    %636 = arith.divf %634, %635 : vector<8x1xf32>
    %637 = vector.broadcast %636 : vector<8x1xf32> to vector<8x32xf32>
    %638 = arith.subf %630, %637 : vector<8x32xf32>
    %639 = arith.mulf %638, %638 : vector<8x32xf32>
    %cst_243 = arith.constant dense<0.000000e+00> : vector<8xf32>
    %640 = vector.multi_reduction <add>, %639, %cst_243 [1] : vector<8x32xf32> to vector<8xf32>
    %641 = vector.shape_cast %640 : vector<8xf32> to vector<8x1xf32>
    %cst_244 = arith.constant 3.200000e+01 : f32
    %642 = vector.broadcast %cst_244 : f32 to vector<8x1xf32>
    %643 = arith.divf %641, %642 : vector<8x1xf32>
    %644 = vector.broadcast %636 : vector<8x1xf32> to vector<8x32xf32>
    %645 = arith.subf %630, %644 : vector<8x32xf32>
    %cst_245 = arith.constant 9.99999974E-6 : f32
    %646 = vector.broadcast %cst_245 : f32 to vector<8x1xf32>
    %647 = arith.addf %643, %646 : vector<8x1xf32>
    %648 = math.rsqrt %647 : vector<8x1xf32>
    %649 = vector.broadcast %648 : vector<8x1xf32> to vector<8x32xf32>
    %650 = arith.mulf %645, %649 : vector<8x32xf32>
    %651 = vector.broadcast %631 : vector<1x32xf32> to vector<8x32xf32>
    %652 = arith.mulf %650, %651 : vector<8x32xf32>
    %653 = vector.broadcast %632 : vector<1x32xf32> to vector<8x32xf32>
    %654 = arith.addf %652, %653 : vector<8x32xf32>
    %c944 = arith.constant 944 : index
    %c0_246 = arith.constant 0 : index
    %655 = vector.load %arg3[%c944, %c0_246] : memref<1136x128xf32, #tpu.memory_space<vmem>>, vector<32x32xf32>
    %cst_247 = arith.constant dense<0.000000e+00> : vector<8x32xf32>
    %656 = tpu.matmul %26, %655, %cst_247 {dimension_numbers = #tpu.dot_dimension_numbers<[1], [0], [0], [1], [0, 0, 1, 1], [], []>} : vector<8x32xf32>, vector<32x32xf32>, vector<8x32xf32> -> vector<8x32xf32>
    %c976 = arith.constant 976 : index
    %c0_248 = arith.constant 0 : index
    %657 = vector.load %arg3[%c976, %c0_248] : memref<1136x128xf32, #tpu.memory_space<vmem>>, vector<32x32xf32>
    %cst_249 = arith.constant dense<0.000000e+00> : vector<8x32xf32>
    %658 = tpu.matmul %183, %657, %cst_249 {dimension_numbers = #tpu.dot_dimension_numbers<[1], [0], [0], [1], [0, 0, 1, 1], [], []>} : vector<8x32xf32>, vector<32x32xf32>, vector<8x32xf32> -> vector<8x32xf32>
    %659 = arith.addf %656, %658 : vector<8x32xf32>
    %c1008 = arith.constant 1008 : index
    %c0_250 = arith.constant 0 : index
    %660 = vector.load %arg3[%c1008, %c0_250] : memref<1136x128xf32, #tpu.memory_space<vmem>>, vector<32x32xf32>
    %cst_251 = arith.constant dense<0.000000e+00> : vector<8x32xf32>
    %661 = tpu.matmul %340, %660, %cst_251 {dimension_numbers = #tpu.dot_dimension_numbers<[1], [0], [0], [1], [0, 0, 1, 1], [], []>} : vector<8x32xf32>, vector<32x32xf32>, vector<8x32xf32> -> vector<8x32xf32>
    %662 = arith.addf %659, %661 : vector<8x32xf32>
    %c1040 = arith.constant 1040 : index
    %c0_252 = arith.constant 0 : index
    %663 = vector.load %arg3[%c1040, %c0_252] : memref<1136x128xf32, #tpu.memory_space<vmem>>, vector<32x32xf32>
    %cst_253 = arith.constant dense<0.000000e+00> : vector<8x32xf32>
    %664 = tpu.matmul %497, %663, %cst_253 {dimension_numbers = #tpu.dot_dimension_numbers<[1], [0], [0], [1], [0, 0, 1, 1], [], []>} : vector<8x32xf32>, vector<32x32xf32>, vector<8x32xf32> -> vector<8x32xf32>
    %665 = arith.addf %662, %664 : vector<8x32xf32>
    %c1072 = arith.constant 1072 : index
    %c0_254 = arith.constant 0 : index
    %666 = vector.load %arg3[%c1072, %c0_254] : memref<1136x128xf32, #tpu.memory_space<vmem>>, vector<32x32xf32>
    %cst_255 = arith.constant dense<0.000000e+00> : vector<8x32xf32>
    %667 = tpu.matmul %654, %666, %cst_255 {dimension_numbers = #tpu.dot_dimension_numbers<[1], [0], [0], [1], [0, 0, 1, 1], [], []>} : vector<8x32xf32>, vector<32x32xf32>, vector<8x32xf32> -> vector<8x32xf32>
    %668 = arith.addf %665, %667 : vector<8x32xf32>
    %c72 = arith.constant 72 : index
    %c0_256 = arith.constant 0 : index
    %669 = vector.load %arg4[%c72, %c0_256] : memref<80x128xf32, #tpu.memory_space<vmem>>, vector<1x32xf32>
    %670 = vector.broadcast %669 : vector<1x32xf32> to vector<8x32xf32>
    %671 = arith.addf %668, %670 : vector<8x32xf32>
    %cst_257 = arith.constant 0.000000e+00 : f32
    %672 = vector.broadcast %cst_257 : f32 to vector<8x32xf32>
    %673 = arith.maximumf %671, %672 : vector<8x32xf32>
    %c1104 = arith.constant 1104 : index
    %c0_258 = arith.constant 0 : index
    %674 = vector.load %arg3[%c1104, %c0_258] : memref<1136x128xf32, #tpu.memory_space<vmem>>, vector<32x128xf32>
    %cst_259 = arith.constant dense<0.000000e+00> : vector<8x128xf32>
    %675 = tpu.matmul %673, %674, %cst_259 {dimension_numbers = #tpu.dot_dimension_numbers<[1], [0], [0], [1], [0, 0, 1, 1], [], []>} : vector<8x32xf32>, vector<32x128xf32>, vector<8x128xf32> -> vector<8x128xf32>
    %c73 = arith.constant 73 : index
    %c0_260 = arith.constant 0 : index
    %676 = vector.load %arg4[%c73, %c0_260] : memref<80x128xf32, #tpu.memory_space<vmem>>, vector<1x128xf32>
    %677 = vector.broadcast %676 : vector<1x128xf32> to vector<8x128xf32>
    %678 = arith.addf %675, %677 : vector<8x128xf32>
    %c0_261 = arith.constant 0 : index
    %c0_262 = arith.constant 0 : index
    %c0_263 = arith.constant 0 : index
    %679 = vector.load %arg5[%c0_261, %c0_262, %c0_263] : memref<1x8x128xf32, #tpu.memory_space<vmem>>, vector<1x8x128xf32>
    %680 = vector.shape_cast %679 : vector<1x8x128xf32> to vector<8x128xf32>
    %681 = vector.shape_cast %678 : vector<8x128xf32> to vector<1x8x128xf32>
    tpu.vector_store %arg5[%c0_261, %c0_262, %c0_263], %681 {strides = array<i32>} : memref<1x8x128xf32, #tpu.memory_space<vmem>>, vector<1x8x128xf32>,
    return
  }
  func.func @transform_0(%arg0: i32) -> (i32, i32, i32) {
    %c0_i32 = arith.constant 0 : i32
    %c0_i32_0 = arith.constant 0 : i32
    %c0_i32_1 = arith.constant 0 : i32
    return %arg0, %c0_i32, %c0_i32_0 : i32, i32, i32
  }
  func.func @transform_1(%arg0: i32) -> (i32, i32, i32) {
    %c0_i32 = arith.constant 0 : i32
    %c0_i32_0 = arith.constant 0 : i32
    %c0_i32_1 = arith.constant 0 : i32
    return %arg0, %c0_i32, %c0_i32_0 : i32, i32, i32
  }
  func.func @transform_2(%arg0: i32) -> (i32, i32) {
    %c0_i32 = arith.constant 0 : i32
    %c0_i32_0 = arith.constant 0 : i32
    %c0_i32_1 = arith.constant 0 : i32
    return %c0_i32, %c0_i32_0 : i32, i32
  }
  func.func @transform_3(%arg0: i32) -> (i32, i32) {
    %c0_i32 = arith.constant 0 : i32
    %c0_i32_0 = arith.constant 0 : i32
    %c0_i32_1 = arith.constant 0 : i32
    return %c0_i32, %c0_i32_0 : i32, i32
  }
  func.func @transform_4(%arg0: i32) -> (i32, i32, i32) {
    %c0_i32 = arith.constant 0 : i32
    %c0_i32_0 = arith.constant 0 : i32
    %c0_i32_1 = arith.constant 0 : i32
    return %arg0, %c0_i32, %c0_i32_0 : i32, i32, i32
  }
}

</mosaic_0001>

<bundles_post_ra>
// kernel: tpu_custom_call.1
= control target key start
LH: loop header
LB: loop body
LE: loop exit
PB: predicated region body
PF: predicated region fallthrough
CT: control target
= control target key end

     0   :  { %s3909_s0 = inlined_call_operand.hbm [shape: f32[2,8,8], index: 0, kind: input, shape index: {}]   ;;  %s3910_s1 = inlined_call_operand.hbm [shape: f32[2,8,8], index: 1, kind: input, shape index: {}]   ;;  %s3911_s2 = inlined_call_operand.hbm [shape: f32[1136,128], index: 2, kind: input, shape index: {}]   ;;  %s3912_s3 = inlined_call_operand.hbm [shape: f32[80,128], index: 3, kind: input, shape index: {}]   ;;  %s3913_s4 = inlined_call_operand.hbm [shape: f32[2,8,128], index: 4, kind: output, shape index: {}]  }
   0x1   :  { %3914 = sst [smem:[#allocation17_spill]] %s3911_s2 }
   0x2   :  { %3915 = sst [smem:[#allocation18_spill]] %s3912_s3 }
   0x3   :  { %9 = vsyncpa [#allocation3], 0 }
   0x4   :  { %11 = vsyncpa [#allocation3 + $0x1], 0 }
   0x5   :  { %12 = vsyncpa [#allocation6], 0 }
   0x6   :  { %14 = vsyncpa [#allocation6 + $0x1], 0 }
   0x7   :  { %15 = vsyncpa [#allocation9], 0 }
   0x8   :  { %16 = vsyncpa [#allocation4], 0 }
   0x9   :  { %18 = vsyncpa [#allocation4 + $0x1], 0  ;;  %s3458_s15 = smov 0   ;;  %s3460_s16 = smov 0  }
   0xa   :  { %s3462_s17 = smov 0   ;;  %s3464_s18 = smov 0  }
   0xb LB: > { %s3916_s2 = sld [smem:[#allocation17_spill]]  ;;  %s3482_s22 = sadd.s32 4294967295, %s3422_s18   ;;  %s3422_s18 = sphi %s3464_s18, %s3930_s18   ;;  %s3418_s17 = sphi %s3462_s17, %s3929_s17   ;;  %s3414_s16 = sphi %s3460_s16, %s3928_s16   ;;  %s3410_s15 = sphi %s3458_s15, %s3927_s15  }
   0xc   : > { %p2907_p0 = scmp.ge.s32.totalorder %s3422_s18, 1  ;;  %p45_p1 = scmp.eq.s32.totalorder %s3482_s22, 0 }
   0xd   : > { %p149_p2 = scmp.lt.s32.totalorder %s3422_s18, 3  ;;  %s3424_s24 = smov [#allocation7]  }
   0xe   : > { %s162_s25 = sshll.u32 %s3424_s24, 4  ;;  %s3918_s3 = sld [smem:[#allocation18_spill]]  ;;  %s163_s25 = int_to_ptr.vmem [resolvable:$true] %s162_s25 }
   0xf   : > { %p3487_p3 = pnand %p2907_p0, %p149_p2  ;;  %s3425_s29 = smov [#allocation8]  }
  0x10   : > { %s176_s30 = sshll.u32 %s3425_s29, 4  ;;  %s3426_s5 = smov 128   ;;  %s177_s30 = int_to_ptr.vmem [resolvable:$true] %s176_s30 }
  0x11   : > { %s160_s21 = sshll.u32 %s3916_s2, 4  ;;  %p3032_p4 = pneg %p3487_p3  ;;  %s161_s21 = int_to_ptr.hbm [resolvable:$true] %s160_s21 }
  0x12   : > { %s3427_s6 = smov 8   ;;  %s2906_s7 = sadd.s32 4294967294, %s3422_s18  }
  0x13   : > { %p3033_p6 = pnand %p3032_p4, %p45_p1  ;;  %s3501_s8 = sadd.s32 1, %s3422_s18  }
  0x14   : > { %s174_s28 = sshll.u32 %s3918_s3, 4  ;;  %s28_s9 = ssub.s32 %s3422_s18, %s3501_s8  ;;  %s175_s28 = int_to_ptr.hbm [resolvable:$true] %s174_s28 }
  0x15   : > { %3035 = dma.hbm_to_vmem [thread:$0]  (!%p3033_p6), %s161_s21, 18176, %s163_s25, [#allocation6], %s3426_s5, %s3426_s5, %s3427_s6  }
  0x16   : > { %3038 = dma.hbm_to_vmem [thread:$0]  (!%p3033_p6), %s175_s28, 1280, %s177_s30, [#allocation9], %s3426_s5, %s3426_s5, %s3427_s6  }
  0x17   : > { %s31_s10 = sadd.s32 1, %s3418_s17  ;;  %p29_p7 = scmp.eq.s32.totalorder %s28_s9, 0 }
  0x18   : > { %p38_p8 = scmp.ne.s32.totalorder %s3418_s17, %s3414_s16  ;;  %p39_p9 = scmp.eq.s32.totalorder %s3422_s18, 0 }
  0x19   : > { %p44_p10 = scmp.ne.s32.totalorder %s3414_s16, %s3410_s15  ;;  %p136_p13 = scmp.eq.s32.totalorder %s3482_s22, 1 }
  0x1a   : > { %s3512_s11 = scalar_select %p29_p7, %s3418_s17, %s31_s10  }
  0x1b   : > { %p3514_p11 = por %p39_p9, %p38_p8  ;;  %p3520_p12 = por %p45_p1, %p44_p10 }
  0x1c   : > { %3919 = sst [smem:[#allocation16_spill]] %s3512_s11  ;;  %p142_p0 = scmp.eq.s32.totalorder %s2906_s7, 1 }
  0x1d   : > { %p3052_p2 = scmp.lt.s32.totalorder %s3422_s18, 2  ;;  %s190_s14 = sand.u32 1, %s3418_s17  }
  0x1e   : > { %p3527_p4 = por %p136_p13, %p38_p8  ;;  %p3531_p6 = por %p142_p0, %p44_p10 }
  0x1f   : > { %s3535_s21 = sshll.u32 %s190_s14, 3  ;;  %s2912_s24 = sshll.u32 %s3422_s18, 3 }
  0x20   : > { %s198_s27 = scalar_lea.hbm %s3909_s0, %s2912_s24  ;;  %s194_s28 = scalar_lea.vmem [#allocation2], %s3535_s21 }
  0x21   : > { %s202_s29 = sshll.u32 %s194_s28, 4  ;;  %s200_s30 = sshll.u32 %s198_s27, 4  ;;  %s203_s29 = int_to_ptr.vmem [resolvable:$true] %s202_s29  ;;  %s201_s30 = int_to_ptr.hbm [resolvable:$true] %s200_s30 }
  0x22   : > { %p3544_p7 = pnand %p3052_p2, %p3514_p11  ;;  %s217_s9 = scalar_lea.hbm %s3910_s1, %s2912_s24 }
  0x23   : > { %s209_s10 = sand.u32 1, %s3422_s18   ;;  %s191_s2 = scalar_lea.sflag [#allocation3], %s190_s14 }
  0x24   : > { %s3284_s25 = sshra.s32 %s201_s30, 4  ;;  %p3288_p9 = pneg %p3544_p7  ;;  %s3285_s25 = int_to_ptr.hbm [resolvable:$true] %s3284_s25 }
  0x25   : > { %s3286_s26 = scalar_lea.hbm %s3285_s25, 8  ;;  %s3291_s28 = scalar_lea.hbm %s3909_s0, 16 }
  0x26   : > { %p3287_p8 = scmp.ne.s32.totalorder %s3285_s25, %s3286_s26  ;;  %p3292_p13 = scmp.lt.s32.totalorder %s3285_s25, %s3909_s0 }
  0x27   : > { %p3293_p0 = scmp.lt.s32.totalorder %s3291_s28, %s3286_s26 }
  0x28   : > { %p3289_p10 = pnand %p3288_p9, %p3287_p8 }
  0x29   : > { %p3294_p2 = por %p3293_p0, %p3292_p13 }
  0x2a   : > { %p3290_p11 = pneg %p3289_p10 }
  0x2c   : > { %p3295_p5 = pnand %p3294_p2, %p3290_p11 }
  0x2e   : > { %3298 = shalt.err (!%p3295_p5)
}
  0x2f   : > { %3042 = dma.hbm_to_vmem [thread:$0]  (!%p3544_p7), %s201_s30, 128, %s203_s29, %s191_s2  }
  0x30   : > { %s219_s14 = sshll.u32 %s217_s9, 4  ;;  %s213_s24 = scalar_lea.vmem [#allocation5], %s3535_s21  ;;  %s220_s14 = int_to_ptr.hbm [resolvable:$true] %s219_s14 }
  0x31   : > { %s221_s3 = sshll.u32 %s213_s24, 4  ;;  %s210_s12 = scalar_lea.sflag [#allocation6], %s209_s10  ;;  %s222_s3 = int_to_ptr.vmem [resolvable:$true] %s221_s3 }
  0x32   : > { %s3314_s27 = sshra.s32 %s220_s14, 4  ;;  %s3321_s28 = scalar_lea.hbm %s3910_s1, 16  ;;  %s3315_s27 = int_to_ptr.hbm [resolvable:$true] %s3314_s27 }
  0x33   : > { %s3316_s11 = scalar_lea.hbm %s3315_s27, 8  ;;  %p3322_p5 = scmp.lt.s32.totalorder %s3315_s27, %s3910_s1 }
  0x34   : > { %p3317_p8 = scmp.ne.s32.totalorder %s3315_s27, %s3316_s11  ;;  %p3323_p13 = scmp.lt.s32.totalorder %s3321_s28, %s3316_s11 }
  0x36   : > { %p3319_p10 = pnand %p3317_p8, %p3288_p9  ;;  %p3324_p0 = por %p3323_p13, %p3322_p5 }
  0x38   : > { %p3320_p11 = pneg %p3319_p10 }
  0x3a   : > { %p3325_p2 = pnand %p3324_p0, %p3320_p11 }
  0x3c   : > { %3328 = shalt.err (!%p3325_p2)
}
  0x3d   : > { %3045 = dma.hbm_to_vmem [thread:$0]  (!%p3544_p7), %s220_s14, 128, %s222_s3, %s210_s12  }
  0x3e   : > { %230 = sbr.rel (%p3487_p3) target bundleno = 9084 (0x237c), region = 36  ;;  %s3580_s21 = sand.u32 (!%p3487_p3), 1, %s3414_s16  }
  0x3f   : > { %s3583_s29 = sshll.u32 (!%p3487_p3), %s3580_s21, 3  ;;  %s233_s30 = scalar_lea.sflag (!%p3487_p3), [#allocation3], %s3580_s21 }
  0x40   : > { %s236_s11 = scalar_lea.vmem (!%p3487_p3), [#allocation2], %s3583_s29 }
  0x43   : > { %3389 = dma.done.wait (%p3520_p12), %s233_s30, 128  }
  0x44   : > { %3391 = vsyncadd (%p3520_p12), %s233_s30, 4294967168  ;;  %s242_s3 = sand.u32 1, %s3482_s22   ;;  %s246_s5 = scalar_lea.vmem [#allocation5], %s3583_s29 }
  0x45   : > { %s243_s23 = scalar_lea.sflag [#allocation6], %s242_s3 }
  0x46   : > { %3393 = dma.done.wait (%p3520_p12), %s243_s23, 128  }
  0x47   : > { %3395 = vsyncadd (%p3520_p12), %s243_s23, 4294967168 }
  0x48   : > { %3397 = dma.done.wait (%p45_p1), [#allocation6], 18176  }
  0x49   : > { %3399 = vsyncadd (%p45_p1), [#allocation6], 4294949120 }
  0x4a   : > { %3401 = dma.done.wait (%p45_p1), [#allocation9], 1280  }
  0x4b   : > { %3403 = vsyncadd (%p45_p1), [#allocation9], 4294966016  ;;  %vm299_vm0 = vcmask 64512   ;;  %v291_v0 = vld [vmem:[#allocation7] sm:$0xff]  ;;  %v294_v3 = vld [vmem:[#allocation7 + $0x18] sm:$0xff]  ;;  %vm326_vm1 = vcmask 261120  }
  0x4c   : > { %v287_v1 = vld [vmem:[%s236_s11] sm:$0xff]  ;;  %318 = vmatpush.msra.mxu0 %v291_v0  ;;  %v293_v5 = vld [vmem:[#allocation7 + $0x10] sm:$0xff]  ;;  %v375_v17 = vld [vmem:[#allocation7 + $0x38] sm:$0xff]  ;;  %s3428_s13 = smov 104   ;;  %s3429_s9 = smov 120   ;;  %vm888_vm7 = vcmask 523264  }
  0x4d   : > { %v295_v2 = vld [vmem:[#allocation7 + $0x20] sm:$0xff]  ;;  %2921 = vmatmul.msk.f32.vlgmr.msra.gmra.mxu0 %vm299_vm0, %v287_v1  ;;  %v296_v4 = vld [vmem:[#allocation7 + $0x28] sm:$0xff]  ;;  %v3097_v7 = vld [vmem:[#allocation8] ss:$0 sm:$0xff]  ;;  %s3430_s10 = smov 112   ;;  %s3015_s7 = sshll.u32 %s3482_s22, 3 }
  0x4e   : > { %342 = vmatpush.msra.mxu1 %v295_v2  ;;  %365 = vmatpush.msra.mxu2 %v296_v4  ;;  %v292_v6 = vld [vmem:[#allocation7 + $0x8] sm:$0xff]  ;;  %v376_v14 = vld [vmem:[#allocation7 + $0x40] sm:$0xff]  ;;  %v404_v18 = vld [vmem:[#allocation7 + $0x58] sm:$0xff]  ;;  %v3431_v42 = vmov -1e+09   ;;  %s2789_s12 = scalar_lea.hbm %s3913_s4, %s3015_s7  ;;  %s286_s27 = scalar_lea.vmem [#allocation10], %s3583_s29 }
  0x4f   : > { %2923 = vmatmul.msk.f32.vlgmr.msra.gmra.mxu2 %vm299_vm0, %v287_v1  ;;  %v377_v11 = vld [vmem:[#allocation7 + $0x48] sm:$0xff]  ;;  %v405_v15 = vld [vmem:[#allocation7 + $0x60] sm:$0xff]  ;;  %v430_v19 = vld [vmem:[#allocation7 + $0x78] sm:$0xff]  ;;  %s2791_s25 = sshll.u32 %s286_s27, 4  ;;  %s2793_s26 = sshll.u32 %s2789_s12, 4  ;;  %s2792_s25 = int_to_ptr.vmem [resolvable:$true] %s2791_s25  ;;  %s2794_s26 = int_to_ptr.hbm [resolvable:$true] %s2793_s26 }
  0x50   : > { %343 = vmatpush.msra.mxu1 %v294_v3  ;;  %v406_v12 = vld [vmem:[#allocation7 + $0x68] sm:$0xff]  ;;  %395 = vmatpush.msra.mxu3 %v377_v11  ;;  %v431_v16 = vld [vmem:[#allocation7 + $0x80] sm:$0xff]  ;;  %v374_v20 = vld [vmem:[#allocation7 + $0x30] sm:$0xff]  ;;  %s2779_s28 = scalar_lea.sflag [#allocation4], %s3580_s21  ;;  %s3358_s6 = sshra.s32 %s2794_s26, 4  ;;  %s3359_s6 = int_to_ptr.hbm [resolvable:$true] %s3358_s6 }
  0x51   : > { %v432_v13 = vld [vmem:[#allocation7 + $0x88] sm:$0xff]  ;;  %421 = vmatpush.msrb.mxu0 %v406_v12  ;;  %v403_v21 = vld [vmem:[#allocation7 + $0x50] sm:$0xff]  ;;  %v3100_v30 = vld [vmem:[#allocation8 + $0x9] ss:$0 sm:$0xff]  ;;  %s3360_s2 = scalar_lea.hbm %s3359_s6, 8  ;;  %s3364_s11 = scalar_lea.hbm %s3913_s4, 16 }
  0x52   : > { %344 = vmatpush.msra.mxu1 %v293_v5  ;;  %447 = vmatpush.msrb.mxu2 %v432_v13  ;;  %v429_v22 = vld [vmem:[#allocation7 + $0x70] sm:$0xff]  ;;  %v3101_v33 = vld [vmem:[#allocation8 + $0x8] ss:$0 sm:$0xff]  ;;  %v3102_v34 = vld [vmem:[#allocation8 + $0xa] ss:$0 sm:$0xff]  ;;  %p3361_p1 = scmp.ne.s32.totalorder %s3359_s6, %s3360_s2  ;;  %p3365_p7 = scmp.lt.s32.totalorder %s3359_s6, %s3913_s4 }
  0x53   : > { %396 = vmatpush.msra.mxu3 %v376_v14  ;;  %422 = vmatpush.msrb.mxu0 %v405_v15  ;;  %v3098_v23 = vld [vmem:[#allocation8 + $0x1] ss:$0 sm:$0xff]  ;;  %v3099_v27 = vld [vmem:[#allocation8 + $0x2] ss:$0 sm:$0xff]  ;;  %p3366_p9 = scmp.lt.s32.totalorder %s3364_s11, %s3360_s2 }
  0x54   : > { %345 = vmatpush.msra.mxu1 %v292_v6  ;;  %448 = vmatpush.msrb.mxu2 %v431_v16  ;;  %v288_v41 = vld [vmem:[%s246_s5] sm:$0xff]  ;;  %p3362_p3 = pnand %p3361_p1, %p3527_p4 }
  0x55   : > { %397 = vmatpush.msra.mxu3 %v375_v17  ;;  %423 = vmatpush.msrb.mxu0 %v404_v18  ;;  %vm289_vm2 = vcmp.gt.f32.partialorder %v288_v41, 0.0  ;;  %v515_v55 = vld [vmem:[#allocation7 + $0x90] sm:$0xff]  ;;  %p3367_p8 = por %p3366_p9, %p3365_p7 }
  0x56   : > { %449 = vmatpush.msrb.mxu2 %v430_v19  ;;  %v3630_v43 = vsel %vm289_vm2, 0.0, %v3431_v42  ;;  %p3363_p12 = pneg %p3362_p3 }
  0x57   : > { %398 = vmatpush.msra.mxu3 %v374_v20  ;;  %424 = vmatpush.msrb.mxu0 %v403_v21  ;;  %v582_v21 = vld [vmem:[#allocation7 + $0x98] sm:$0xff] }
  0x58   : > { %450 = vmatpush.msrb.mxu2 %v429_v22  ;;  %p3368_p10 = pnand %p3367_p8, %p3363_p12 }
  0xca   : > { %v320_v8 = vpop.f32.mrf.mxu0 }
  0xcb   : > { %v321_v9 = vadd.f32 %v3097_v7, %v320_v8 }
  0xcd   : > { %v323_v10 = vmax.f32 %v321_v9, 0.0 }
  0xcf   : > { %2922 = vmatmul.msk.f32.vlgmr.msra.gmra.mxu1 %vm326_vm1, %v323_v10 }
  0xd2   : > { %v367_v25 = vpop.f32.mrf.mxu2 }
 0x14c   : > { %v347_v24 = vpop.f32.mrf.mxu1 }
 0x14d   : > { %v348_v26 = vadd.f32 %v3098_v23, %v347_v24 }
 0x14f   : > { %v370_v28 = vadd.f32 %v367_v25, %v348_v26 }
 0x151   : > { %v3608_v29 = vadd.f32 %v3099_v27, %v370_v28 }
 0x153   : > { %2924 = vmatmul.msk.f32.vlgmr.msra.gmra.mxu3 %vm326_vm1, %v3608_v29  ;;  %2925 = vmatmul.msk.f32.vlgmr.msrb.gmra.mxu0 %vm326_vm1, %v3608_v29 }
 0x154   : > { %2926 = vmatmul.msk.f32.vlgmr.msrb.gmra.mxu2 %vm326_vm1, %v3608_v29 }
 0x1d0   : > { %v426_v31 = vpop.f32.mrf.mxu0 }
 0x1d1   : > { %v427_v32 = vadd.f32 %v3100_v30, %v426_v31 }
 0x1d3   : > { %721 = vrot.lane.b32.xlu2 %v427_v32, %s3428_s13  ;;  %518 = vrot.lane.b32.xlu1 %v427_v32, %s3429_s9 }
 0x1d4   : > { %2927 = vmatpush.xpose.msk.msrb.mxu1 %vm299_vm0, %v427_v32 }
 0x1d6   : > { %v400_v35 = vpop.f32.mrf.mxu3 }
 0x1d7   : > { %v401_v36 = vadd.f32 %v3101_v33, %v400_v35  ;;  %v452_v37 = vpop.f32.mrf.mxu2  ;;  %v694_v33 = vld [vmem:[#allocation7 + $0xa0] sm:$0xff] }
 0x1d8   : > { %v3619_v38 = vadd.f32 %v3102_v34, %v452_v37  ;;  %601 = vmatpush.msra.mxu1 %v582_v21  ;;  %v3105_v21 = vld [vmem:[#allocation8 + $0xf] ss:$0 sm:$0xff] }
 0x1d9   : > { %2928 = vmatmul.msk.f32.vlgmr.msrb.gmra.mxu1 %vm299_vm0, %v401_v36 }
 0x1da   : > { %510 = vmatpush.msrb.mxu3 %v3619_v38  ;;  %713 = vmatpush.msrb.mxu1 %v694_v33 }
 0x1db   : > { %719 = vrot.lane.b32.xlu2 %v401_v36, %s3428_s13  ;;  %516 = vrot.lane.b32.xlu1 %v401_v36, %s3429_s9 }
 0x1dc   : > { %624 = vmatpush.msra.mxu3 %v515_v55 }
 0x1e3   : > { %629 = vrot.lane.b32.xlu1 %v401_v36, %s3430_s10 }
 0x22d   : > { %v722_v56 = vpop.permute.xlu2 %721 }
 0x235   : > { %v720_v57 = vpop.permute.xlu2 %719 }
 0x245   : > { %v519_v39 = vpop.permute.xlu1 %518 }
 0x246   : > { %2930 = vmatpush.xpose.msk.msra.mxu0 %vm299_vm0, %v519_v39 }
 0x24d   : > { %v517_v40 = vpop.permute.xlu1 %516 }
 0x24e   : > { %2931 = vmatmul.msk.f32.vlgmr.msra.gmra.mxu0 %vm299_vm0, %v517_v40  ;;  %v784_v40 = vld [vmem:[#allocation7 + $0xa8] sm:$0xff] }
 0x255   : > { %v630_v3 = vpop.permute.xlu1 %629 }
 0x256   : > { %v478_v44 = vpop.f32.mrf.mxu1 }
 0x257   : > { %v479_v45 = vadd.f32 %v478_v44, %v3630_v43 }
 0x259   : > { %v481_v46 = vsel %vm299_vm0, %v479_v45, -inf }
 0x25a   : > { %482 = vmax.xlane.f32.xlu0 %v481_v46  ;;  %v3103_v46 = vld [vmem:[#allocation8 + $0xb] ss:$0 sm:$0xff] }
 0x2cb   : > { %v541_v47 = vpop.f32.mrf.mxu0 }
 0x2cc   : > { %v542_v48 = vadd.f32 %v541_v47, %v3630_v43 }
 0x2cd   : > { %v483_v49 = vpop.xlane.xlu0 %482 }
 0x2ce   : > { %v484_v50 = vsub.f32 %v479_v45, %v483_v49  ;;  %v544_v51 = vsel %vm299_vm0, %v542_v48, -inf }
 0x2cf   : > { %545 = vmax.xlane.f32.xlu2 %v544_v51 }
 0x2d0   : > { %v485_v52 = vmul.f32 1.442695, %v484_v50 }
 0x2d2   : > { %3142 = vpow2.f32 %v485_v52  ;;  %v3432_v52 = vmov 32.0  }
 0x2d8   : > { %v3143_v53 = vpop.eup %3142 }
 0x2d9   : > { %v487_v54 = vsel %vm299_vm0, %v3143_v53, 0.0 }
 0x2da   : > { %488 = vadd.xlane.f32.xlu0 %v487_v54 }
 0x2ee   : > { %631 = vrot.lane.b32.xlu0 %v427_v32, %s3430_s10 }
 0x342   : > { %v546_v58 = vpop.xlane.xlu2 %545 }
 0x343   : > { %v547_v59 = vsub.f32 %v542_v48, %v546_v58 }
 0x345   : > { %v548_v60 = vmul.f32 1.442695, %v547_v59 }
 0x347   : > { %3144 = vpow2.f32 %v548_v60 }
 0x34d   : > { %v3145_v61 = vpop.eup %3144  ;;  %v489_v62 = vpop.xlane.xlu0 %488 }
 0x34e   : > { %3146 = vrcp.f32 %v489_v62  ;;  %v550_v63 = vsel %vm299_vm0, %v3145_v61, 0.0 }
 0x34f   : > { %551 = vadd.xlane.f32.xlu2 %v550_v63 }
 0x354   : > { %v3147_v0 = vpop.eup %3146 }
 0x355   : > { %v491_v1 = vmul.f32 %v3147_v0, %v3143_v53  ;;  %v851_v0 = vld [vmem:[#allocation7 + $0xc8] sm:$0xff] }
 0x357   : > { %2929 = vmatmul.msk.f32.vlgmr.msrb.gmra.mxu3 %vm299_vm0, %v491_v1  ;;  %v850_v1 = vld [vmem:[#allocation7 + $0xc0] sm:$0xff] }
 0x358   : > { %2939 = vmatpush.xpose.msk.msrb.mxu3 %vm299_vm0, %v722_v56 }
 0x360   : > { %v632_v2 = vpop.permute.xlu0 %631 }
 0x361   : > { %2935 = vmatpush.xpose.msk.msrb.mxu0 %vm299_vm0, %v632_v2  ;;  %v849_v2 = vld [vmem:[#allocation7 + $0xb8] sm:$0xff] }
 0x364   : > { %2936 = vmatmul.msk.f32.vlgmr.msrb.gmra.mxu0 %vm299_vm0, %v630_v3  ;;  %v848_v3 = vld [vmem:[#allocation7 + $0xb0] sm:$0xff] }
 0x3c2   : > { %v552_v13 = vpop.xlane.xlu2 %551 }
 0x3da   : > { %v512_v4 = vpop.f32.mrf.mxu3 }
 0x3db   : > { %2934 = vmatmul.msk.f32.vlgmr.msra.gmra.mxu3 %vm299_vm0, %v512_v4  ;;  %v859_v4 = vld [vmem:[#allocation7 + $0x108] sm:$0xff] }
 0x3dc   : > { %900 = vmatpush.msra.mxu3 %v859_v4  ;;  %v3109_v4 = vld [vmem:[#allocation8 + $0x11] ss:$0 sm:$0xff] }
 0x3e1   : > { %v654_v5 = vpop.f32.mrf.mxu0 }
 0x3e2   : > { %v655_v6 = vadd.f32 %v654_v5, %v3630_v43  ;;  %v858_v5 = vld [vmem:[#allocation7 + $0x100] sm:$0xff] }
 0x3e3   : > { %2940 = vmatmul.msk.f32.vlgmr.msrb.gmra.mxu3 %vm299_vm0, %v720_v57 }
 0x3e4   : > { %v657_v7 = vsel %vm299_vm0, %v655_v6, -inf  ;;  %901 = vmatpush.msra.mxu3 %v858_v5 }
 0x3e5   : > { %658 = vmax.xlane.f32.xlu1 %v657_v7 }
 0x3fe   : > { %556 = vrot.lane.b32.xlu1 %v3619_v38, %s3429_s9 }
 0x458   : > { %v659_v8 = vpop.xlane.xlu1 %658 }
 0x459   : > { %v660_v9 = vsub.f32 %v655_v6, %v659_v8  ;;  %v857_v6 = vld [vmem:[#allocation7 + $0xf8] sm:$0xff] }
 0x45a   : > { %902 = vmatpush.msra.mxu3 %v857_v6 }
 0x45b   : > { %v661_v10 = vmul.f32 1.442695, %v660_v9  ;;  %v856_v9 = vld [vmem:[#allocation7 + $0xf0] sm:$0xff] }
 0x45c   : > { %903 = vmatpush.msra.mxu3 %v856_v9 }
 0x45d   : > { %3148 = vpow2.f32 %v661_v10 }
 0x45e   : > { %v626_v11 = vpop.f32.mrf.mxu3  ;;  %3150 = vrcp.f32 %v552_v13 }
 0x463   : > { %v3149_v12 = vpop.eup %3148 }
 0x464   : > { %v663_v14 = vsel %vm299_vm0, %v3149_v12, 0.0  ;;  %v3151_v18 = vpop.eup %3150 }
 0x465   : > { %664 = vadd.xlane.f32.xlu2 %v663_v14  ;;  %v554_v19 = vmul.f32 %v3151_v18, %v3145_v61  ;;  %v3104_v18 = vld [vmem:[#allocation8 + $0xe] ss:$0 sm:$0xff] }
 0x466   : > { %v744_v15 = vpop.f32.mrf.mxu3 }
 0x467   : > { %v745_v16 = vadd.f32 %v744_v15, %v3630_v43 }
 0x469   : > { %v747_v17 = vsel %vm299_vm0, %v745_v16, -inf }
 0x46a   : > { %748 = vmax.xlane.f32.xlu0 %v747_v17 }
 0x470   : > { %v557_v20 = vpop.permute.xlu1 %556 }
 0x471   : > { %577 = vmatpush.msra.mxu2 %v557_v20 }
 0x472   : > { %2932 = vmatmul.msk.f32.vlgmr.msra.gmra.mxu2 %vm299_vm0, %v554_v19 }
 0x47e   : > { %668 = vrot.lane.b32.xlu0 %v3619_v38, %s3430_s10 }
 0x4d8   : > { %v665_v25 = vpop.xlane.xlu2 %664 }
 0x4dd   : > { %v749_v22 = vpop.xlane.xlu0 %748 }
 0x4de   : > { %v750_v23 = vsub.f32 %v745_v16, %v749_v22 }
 0x4e0   : > { %v751_v24 = vmul.f32 1.442695, %v750_v23 }
 0x4e2   : > { %3152 = vpow2.f32 %v751_v24  ;;  %v854_v24 = vld [vmem:[#allocation7 + $0xe0] sm:$0xff] }
 0x4e3   : > { %3154 = vrcp.f32 %v665_v25  ;;  %v853_v25 = vld [vmem:[#allocation7 + $0xd8] sm:$0xff] }
 0x4e8   : > { %v3153_v26 = vpop.eup %3152 }
 0x4e9   : > { %v753_v27 = vsel %vm299_vm0, %v3153_v26, 0.0  ;;  %v3155_v28 = vpop.eup %3154 }
 0x4ea   : > { %754 = vadd.xlane.f32.xlu2 %v753_v27  ;;  %v667_v30 = vmul.f32 %v3155_v28, %v3149_v12  ;;  %v3106_v27 = vld [vmem:[#allocation8 + $0xc] ss:$0 sm:$0xff] }
 0x4f0   : > { %v669_v31 = vpop.permute.xlu0 %668 }
 0x4f1   : > { %689 = vmatpush.msrb.mxu2 %v669_v31 }
 0x4f2   : > { %2937 = vmatmul.msk.f32.vlgmr.msrb.gmra.mxu2 %vm299_vm0, %v667_v30 }
 0x4f3   : > { %803 = vmatpush.msra.mxu2 %v784_v40 }
 0x4f5   : > { %v579_v32 = vpop.f32.mrf.mxu2 }
 0x4f6   : > { %2933 = vmatmul.msk.f32.vlgmr.msra.gmra.mxu1 %vm299_vm0, %v579_v32  ;;  %v3107_v32 = vld [vmem:[#allocation8 + $0xd] ss:$0 sm:$0xff] }
 0x4f7   : > { %877 = vmatpush.msra.mxu1 %v851_v0 }
 0x4f9   : > { %878 = vmatpush.msra.mxu1 %v850_v1  ;;  %v3108_v1 = vld [vmem:[#allocation8 + $0x10] ss:$0 sm:$0xff] }
 0x4fb   : > { %879 = vmatpush.msra.mxu1 %v849_v2 }
 0x4fd   : > { %880 = vmatpush.msra.mxu1 %v848_v3 }
 0x502   : > { %758 = vrot.lane.b32.xlu2 %v3619_v38, %s3428_s13 }
 0x55d   : > { %v755_v34 = vpop.xlane.xlu2 %754 }
 0x55e   : > { %3156 = vrcp.f32 %v755_v34 }
 0x55f   : > { %3158 = vrcp.f32 %v3432_v52  ;;  %v941_v52 = vld [vmem:[#allocation7 + $0x110] sm:$0xff] }
 0x564   : > { %v3157_v35 = vpop.eup %3156 }
 0x565   : > { %v757_v36 = vmul.f32 %v3157_v35, %v3153_v26  ;;  %v759_v37 = vpop.permute.xlu2 %758  ;;  %v3159_v53 = vpop.eup %3158  ;;  %v852_v26 = vld [vmem:[#allocation7 + $0xd0] sm:$0xff] }
 0x566   : > { %779 = vmatpush.msra.mxu0 %v759_v37  ;;  %v819_v54 = vmul.f32 32.0, %v3159_v53  ;;  %vm823_vm3 = vweird.f32 %v3159_v53 }
 0x567   : > { %2941 = vmatmul.msk.f32.vlgmr.msra.gmra.mxu0 %vm299_vm0, %v757_v36 }
 0x568   : > { %v820_v55 = vsub.f32 1.0, %v819_v54  ;;  %v996_v54 = vld [vmem:[#allocation7 + $0x150] sm:$0xff] }
 0x56a   : > { %v821_v56 = vmul.f32 %v3159_v53, %v820_v55 }
 0x56c   : > { %v822_v57 = vadd.f32 %v3159_v53, %v821_v56 }
 0x56e   : > { %v3665_v58 = vsel %vm823_vm3, %v3159_v53, %v822_v57  ;;  %v970_v53 = vld [vmem:[#allocation7 + $0x130] sm:$0xff] }
 0x573   : > { %v603_v42 = vpop.f32.mrf.mxu1 }
 0x574   : > { %v627_v44 = vadd.f32 %v626_v11, %v603_v42  ;;  %v855_v11 = vld [vmem:[#allocation7 + $0xe8] sm:$0xff] }
 0x575   : > { %v691_v39 = vpop.f32.mrf.mxu2  ;;  %904 = vmatpush.msra.mxu3 %v855_v11  ;;  %v3110_v11 = vld [vmem:[#allocation8 + $0x18] ss:$0 sm:$0xff] }
 0x576   : > { %2938 = vmatmul.msk.f32.vlgmr.msrb.gmra.mxu1 %vm299_vm0, %v691_v39 }
 0x577   : > { %905 = vmatpush.msra.mxu3 %v854_v24 }
 0x579   : > { %906 = vmatpush.msra.mxu3 %v853_v25 }
 0x57b   : > { %907 = vmatpush.msra.mxu3 %v852_v26 }
 0x5e4   : > { %v781_v41 = vpop.f32.mrf.mxu0 }
 0x5e5   : > { %2942 = vmatmul.msk.f32.vlgmr.msra.gmra.mxu2 %vm299_vm0, %v781_v41 }
 0x5f3   : > { %v715_v38 = vpop.f32.mrf.mxu1 }
 0x5f4   : > { %v718_v45 = vadd.f32 %v715_v38, %v627_v44  ;;  %v944_v38 = vld [vmem:[#allocation7 + $0x128] sm:$0xff] }
 0x5f5   : > { %v973_v44 = vld [vmem:[#allocation7 + $0x148] sm:$0xff]  ;;  %962 = vmatpush.msrb.mxu0 %v944_v38 }
 0x5f6   : > { %988 = vmatpush.msrb.mxu2 %v973_v44 }
 0x668   : > { %v805_v47 = vpop.f32.mrf.mxu2 }
 0x669   : > { %v808_v48 = vadd.f32 %v805_v47, %v718_v45  ;;  %v999_v45 = vld [vmem:[#allocation7 + $0x168] sm:$0xff]  ;;  %v972_v47 = vld [vmem:[#allocation7 + $0x140] sm:$0xff] }
 0x66a   : > { %1014 = vmatpush.msrb.mxu1 %v999_v45  ;;  %989 = vmatpush.msrb.mxu2 %v972_v47 }
 0x66b   : > { %v811_v49 = vadd.f32 %v3103_v46, %v808_v48  ;;  %v943_v46 = vld [vmem:[#allocation7 + $0x120] sm:$0xff] }
 0x66c   : > { %v998_v48 = vld [vmem:[#allocation7 + $0x160] sm:$0xff]  ;;  %963 = vmatpush.msrb.mxu0 %v943_v46 }
 0x66d   : > { %v812_v50 = vadd.f32 %v811_v49, %v3608_v29  ;;  %v942_v49 = vld [vmem:[#allocation7 + $0x118] sm:$0xff]  ;;  %1015 = vmatpush.msrb.mxu1 %v998_v48 }
 0x66e   : > { %964 = vmatpush.msrb.mxu0 %v942_v49 }
 0x66f   : > { %v815_v51 = vsel %vm326_vm1, %v812_v50, 0.0 }
 0x670   : > { %816 = vadd.xlane.f32.xlu1 %v815_v51  ;;  %v997_v51 = vld [vmem:[#allocation7 + $0x158] sm:$0xff]  ;;  %965 = vmatpush.msrb.mxu0 %v941_v52 }
 0x671   : > { %1016 = vmatpush.msrb.mxu1 %v997_v51 }
 0x673   : > { %1017 = vmatpush.msrb.mxu1 %v996_v54 }
 0x6e3   : > { %v817_v59 = vpop.xlane.xlu1 %816 }
 0x6e4   : > { %v825_v60 = vmul.f32 %v3665_v58, %v817_v59 }
 0x6e6   : > { %v826_v61 = vsub.f32 %v812_v50, %v825_v60  ;;  %v971_v50 = vld [vmem:[#allocation7 + $0x138] sm:$0xff] }
 0x6e7   : > { %990 = vmatpush.msrb.mxu2 %v971_v50 }
 0x6e8   : > { %v827_v62 = vmul.f32 %v826_v61, %v826_v61 }
 0x6e9   : > { %991 = vmatpush.msrb.mxu2 %v970_v53 }
 0x6ea   : > { %v828_v63 = vsel %vm326_vm1, %v827_v62, 0.0 }
 0x6eb   : > { %829 = vadd.xlane.f32.xlu0 %v828_v63 }
 0x75e   : > { %v830_v7 = vpop.xlane.xlu0 %829 }
 0x75f   : > { %v831_v8 = vmul.f32 %v830_v7, %v3665_v58  ;;  %v3111_v7 = vld [vmem:[#allocation8 + $0x1a] ss:$0 sm:$0xff] }
 0x761   : > { %v832_v10 = vadd.f32 1e-05, %v831_v8 }
 0x763   : > { %3160 = vrsqrt.f32 %v832_v10  ;;  %vm839_vm5 = vweird.f32 %v832_v10 }
 0x769   : > { %v3161_v12 = vpop.eup %3160 }
 0x76a   : > { %v834_v13 = vmul.f32 %v3161_v12, %v832_v10  ;;  %vm840_vm4 = vweird.f32 %v3161_v12  ;;  %v3112_v10 = vld [vmem:[#allocation8 + $0x19] ss:$0 sm:$0xff] }
 0x76b   : > { %vm841_vm6 = vmor %vm839_vm5, %vm840_vm4 }
 0x76c   : > { %v835_v14 = vmul.f32 %v3161_v12, %v834_v13 }
 0x76e   : > { %v836_v15 = vmul.f32 0.5, %v835_v14 }
 0x770   : > { %v837_v16 = vsub.f32 1.5, %v836_v15 }
 0x772   : > { %v838_v17 = vmul.f32 %v3161_v12, %v837_v16 }
 0x774   : > { %v842_v19 = vsel %vm841_vm6, %v3161_v12, %v838_v17 }
 0x775   : > { %v843_v20 = vmul.f32 %v842_v19, %v826_v61 }
 0x777   : > { %v845_v22 = vmul.f32 %v3104_v18, %v843_v20 }
 0x779   : > { %v847_v23 = vadd.f32 %v3105_v21, %v845_v22 }
 0x77b   : > { %2943 = vmatmul.msk.f32.vlgmr.msra.gmra.mxu1 %vm326_vm1, %v847_v23 }
 0x7f8   : > { %v882_v28 = vpop.f32.mrf.mxu1 }
 0x7f9   : > { %v883_v30 = vadd.f32 %v3106_v27, %v882_v28  ;;  %v1082_v27 = vld [vmem:[#allocation7 + $0x170] sm:$0xff] }
 0x7fb   : > { %v885_v31 = vmax.f32 %v883_v30, 0.0 }
 0x7fd   : > { %2944 = vmatmul.msk.f32.vlgmr.msra.gmra.mxu3 %vm888_vm7, %v885_v31 }
 0x880   : > { %v909_v33 = vpop.f32.mrf.mxu3 }
 0x881   : > { %v910_v34 = vadd.f32 %v3107_v32, %v909_v33 }
 0x883   : > { %v912_v35 = vadd.f32 %v910_v34, %v847_v23 }
 0x885   : > { %v915_v36 = vsel %vm326_vm1, %v912_v35, 0.0 }
 0x886   : > { %916 = vadd.xlane.f32.xlu2 %v915_v36 }
 0x8f9   : > { %v917_v37 = vpop.xlane.xlu2 %916 }
 0x8fa   : > { %v918_v39 = vmul.f32 %v917_v37, %v3665_v58 }
 0x8fc   : > { %v919_v40 = vsub.f32 %v912_v35, %v918_v39 }
 0x8fe   : > { %v920_v41 = vmul.f32 %v919_v40, %v919_v40 }
 0x900   : > { %v921_v42 = vsel %vm326_vm1, %v920_v41, 0.0 }
 0x901   : > { %922 = vadd.xlane.f32.xlu1 %v921_v42 }
 0x974   : > { %v923_v55 = vpop.xlane.xlu1 %922 }
 0x975   : > { %v924_v56 = vmul.f32 %v923_v55, %v3665_v58 }
 0x977   : > { %v925_v57 = vadd.f32 1e-05, %v924_v56 }
 0x979   : > { %3162 = vrsqrt.f32 %v925_v57  ;;  %vm932_vm9 = vweird.f32 %v925_v57 }
 0x97f   : > { %v3163_v59 = vpop.eup %3162 }
 0x980   : > { %v927_v60 = vmul.f32 %v3163_v59, %v925_v57  ;;  %vm933_vm8 = vweird.f32 %v3163_v59 }
 0x981   : > { %vm934_vm10 = vmor %vm932_vm9, %vm933_vm8 }
 0x982   : > { %v928_v61 = vmul.f32 %v3163_v59, %v927_v60 }
 0x984   : > { %v929_v62 = vmul.f32 0.5, %v928_v61 }
 0x986   : > { %v930_v63 = vsub.f32 1.5, %v929_v62 }
 0x988   : > { %v931_v0 = vmul.f32 %v3163_v59, %v930_v63 }
 0x98a   : > { %v935_v2 = vsel %vm934_vm10, %v3163_v59, %v931_v0 }
 0x98b   : > { %v936_v3 = vmul.f32 %v935_v2, %v919_v40 }
 0x98d   : > { %v938_v5 = vmul.f32 %v3108_v1, %v936_v3 }
 0x98f   : > { %v3676_v6 = vadd.f32 %v3109_v4, %v938_v5 }
 0x991   : > { %2945 = vmatmul.msk.f32.vlgmr.msrb.gmra.mxu0 %vm326_vm1, %v3676_v6  ;;  %2946 = vmatmul.msk.f32.vlgmr.msrb.gmra.mxu2 %vm326_vm1, %v3676_v6 }
 0x992   : > { %2947 = vmatmul.msk.f32.vlgmr.msrb.gmra.mxu1 %vm326_vm1, %v3676_v6 }
 0xa0e   : > { %v967_v13 = vpop.f32.mrf.mxu0 }
 0xa0f   : > { %v1019_v8 = vpop.f32.mrf.mxu1  ;;  %v968_v15 = vadd.f32 %v3110_v11, %v967_v13 }
 0xa10   : > { %v3684_v9 = vadd.f32 %v3111_v7, %v1019_v8  ;;  %v1149_v8 = vld [vmem:[#allocation7 + $0x178] sm:$0xff] }
 0xa12   : > { %1077 = vmatpush.msra.mxu2 %v3684_v9 }
 0xa14   : > { %v993_v12 = vpop.f32.mrf.mxu2  ;;  %1191 = vmatpush.msrb.mxu2 %v1082_v27 }
 0xa15   : > { %v994_v14 = vadd.f32 %v3112_v10, %v993_v12  ;;  %v1261_v10 = vld [vmem:[#allocation7 + $0x180] sm:$0xff] }
 0xa17   : > { %1085 = vrot.lane.b32.xlu2 %v994_v14, %s3429_s9  ;;  %2948 = vmatpush.xpose.msk.msra.mxu0 %vm299_vm0, %v994_v14 }
 0xa1a   : > { %2949 = vmatmul.msk.f32.vlgmr.msra.gmra.mxu0 %vm299_vm0, %v968_v15 }
 0xa1b   : > { %1168 = vmatpush.msrb.mxu0 %v1149_v8 }
 0xa1d   : > { %1280 = vmatpush.msra.mxu0 %v1261_v10 }
 0xa1f   : > { %1198 = vrot.lane.b32.xlu2 %v994_v14, %s3430_s10 }
 0xa71   : > { %v1086_v16 = vpop.permute.xlu2 %1085 }
 0xa72   : > { %2951 = vmatpush.xpose.msk.msra.mxu1 %vm299_vm0, %v1086_v16 }
 0xa79   : > { %v1199_v17 = vpop.permute.xlu2 %1198 }
 0xa7a   : > { %2956 = vmatpush.xpose.msk.msrb.mxu1 %vm299_vm0, %v1199_v17 }
 0xa97   : > { %v1045_v18 = vpop.f32.mrf.mxu0 }
 0xa98   : > { %v1046_v19 = vadd.f32 %v1045_v18, %v3630_v43 }
 0xa9a   : > { %v1048_v20 = vsel %vm299_vm0, %v1046_v19, -inf }
 0xa9b   : > { %1049 = vmax.xlane.f32.xlu0 %v1048_v20 }
 0xaaf   : > { %1083 = vrot.lane.b32.xlu0 %v968_v15, %s3429_s9 }
 0xab7   : > { %1286 = vrot.lane.b32.xlu0 %v968_v15, %s3428_s13 }
 0xb0e   : > { %v1050_v21 = vpop.xlane.xlu0 %1049 }
 0xb0f   : > { %v1051_v22 = vsub.f32 %v1046_v19, %v1050_v21 }
 0xb11   : > { %v1052_v23 = vmul.f32 1.442695, %v1051_v22  ;;  %v3113_v22 = vld [vmem:[#allocation8 + $0x1b] ss:$0 sm:$0xff] }
 0xb13   : > { %3164 = vpow2.f32 %v1052_v23 }
 0xb19   : > { %v3165_v24 = vpop.eup %3164 }
 0xb1a   : > { %v1054_v25 = vsel %vm299_vm0, %v3165_v24, 0.0 }
 0xb1b   : > { %1055 = vadd.xlane.f32.xlu1 %v1054_v25 }
 0xb21   : > { %v1084_v26 = vpop.permute.xlu0 %1083 }
 0xb22   : > { %2952 = vmatmul.msk.f32.vlgmr.msra.gmra.mxu1 %vm299_vm0, %v1084_v26 }
 0xb29   : > { %v1287_v37 = vpop.permute.xlu0 %1286 }
 0xb34   : > { %1288 = vrot.lane.b32.xlu1 %v994_v14, %s3428_s13 }
 0xb3c   : > { %1196 = vrot.lane.b32.xlu1 %v968_v15, %s3430_s10 }
 0xb8e   : > { %v1056_v28 = vpop.xlane.xlu1 %1055 }
 0xb8f   : > { %3166 = vrcp.f32 %v1056_v28 }
 0xb95   : > { %v3167_v30 = vpop.eup %3166 }
 0xb96   : > { %v1058_v31 = vmul.f32 %v3167_v30, %v3165_v24 }
 0xb98   : > { %2950 = vmatmul.msk.f32.vlgmr.msra.gmra.mxu2 %vm299_vm0, %v1058_v31 }
 0xb9f   : > { %v1108_v32 = vpop.f32.mrf.mxu1 }
 0xba0   : > { %v1109_v33 = vadd.f32 %v1108_v32, %v3630_v43 }
 0xba2   : > { %v1111_v34 = vsel %vm299_vm0, %v1109_v33, -inf }
 0xba3   : > { %1112 = vmax.xlane.f32.xlu0 %v1111_v34  ;;  %v1411_v34 = vld [vmem:[#allocation7 + $0x1a8] sm:$0xff] }
 0xba6   : > { %v1289_v35 = vpop.permute.xlu1 %1288 }
 0xba7   : > { %2960 = vmatpush.xpose.msk.msra.mxu2 %vm299_vm0, %v1289_v35  ;;  %v1410_v35 = vld [vmem:[#allocation7 + $0x1a0] sm:$0xff] }
 0xbae   : > { %v1197_v36 = vpop.permute.xlu1 %1196 }
 0xbaf   : > { %2957 = vmatmul.msk.f32.vlgmr.msrb.gmra.mxu1 %vm299_vm0, %v1197_v36  ;;  %v1409_v36 = vld [vmem:[#allocation7 + $0x198] sm:$0xff] }
 0xc16   : > { %v1113_v39 = vpop.xlane.xlu0 %1112 }
 0xc17   : > { %v1114_v40 = vsub.f32 %v1109_v33, %v1113_v39  ;;  %v1419_v39 = vld [vmem:[#allocation7 + $0x1e8] sm:$0xff] }
 0xc19   : > { %v1115_v41 = vmul.f32 1.442695, %v1114_v40  ;;  %v1418_v40 = vld [vmem:[#allocation7 + $0x1e0] sm:$0xff] }
 0xc1b   : > { %3168 = vpow2.f32 %v1115_v41  ;;  %v1079_v42 = vpop.f32.mrf.mxu2  ;;  %v1417_v41 = vld [vmem:[#allocation7 + $0x1d8] sm:$0xff] }
 0xc1c   : > { %2955 = vmatmul.msk.f32.vlgmr.msrb.gmra.mxu2 %vm299_vm0, %v1079_v42 }
 0xc1d   : > { %1459 = vmatpush.msrb.mxu2 %v1419_v39 }
 0xc1f   : > { %1460 = vmatpush.msrb.mxu2 %v1418_v40  ;;  %v3119_v40 = vld [vmem:[#allocation8 + $0x21] ss:$0 sm:$0xff] }
 0xc21   : > { %v3169_v38 = vpop.eup %3168  ;;  %1461 = vmatpush.msrb.mxu2 %v1417_v41 }
 0xc22   : > { %v1117_v44 = vsel %vm299_vm0, %v3169_v38, 0.0 }
 0xc23   : > { %1118 = vadd.xlane.f32.xlu0 %v1117_v44  ;;  %v1416_v44 = vld [vmem:[#allocation7 + $0x1d0] sm:$0xff] }
 0xc24   : > { %2961 = vmatmul.msk.f32.vlgmr.msra.gmra.mxu2 %vm299_vm0, %v1287_v37  ;;  %v1408_v37 = vld [vmem:[#allocation7 + $0x190] sm:$0xff] }
 0xc25   : > { %1462 = vmatpush.msrb.mxu2 %v1416_v44 }
 0xc2c   : > { %v1221_v45 = vpop.f32.mrf.mxu1 }
 0xc2d   : > { %v1222_v46 = vadd.f32 %v1221_v45, %v3630_v43 }
 0xc2f   : > { %v1224_v47 = vsel %vm299_vm0, %v1222_v46, -inf }
 0xc30   : > { %1225 = vmax.xlane.f32.xlu2 %v1224_v47 }
 0xc96   : > { %v1119_v62 = vpop.xlane.xlu0 %1118 }
 0xc9f   : > { %v1193_v48 = vpop.f32.mrf.mxu2 }
 0xca3   : > { %v1226_v49 = vpop.xlane.xlu2 %1225 }
 0xca4   : > { %v1227_v50 = vsub.f32 %v1222_v46, %v1226_v49  ;;  %v1415_v46 = vld [vmem:[#allocation7 + $0x1c8] sm:$0xff] }
 0xca5   : > { %1463 = vmatpush.msrb.mxu2 %v1415_v46  ;;  %v3122_v46 = vld [vmem:[#allocation8 + $0x29] ss:$0 sm:$0xff] }
 0xca6   : > { %v1228_v51 = vmul.f32 1.442695, %v1227_v50 }
 0xca7   : > { %v1311_v52 = vpop.f32.mrf.mxu2 }
 0xca8   : > { %3170 = vpow2.f32 %v1228_v51  ;;  %v1312_v53 = vadd.f32 %v1311_v52, %v3630_v43 }
 0xcaa   : > { %v1314_v54 = vsel %vm299_vm0, %v1312_v53, -inf }
 0xcab   : > { %1315 = vmax.xlane.f32.xlu1 %v1314_v54 }
 0xcae   : > { %v3171_v55 = vpop.eup %3170 }
 0xcaf   : > { %v1230_v56 = vsel %vm299_vm0, %v3171_v55, 0.0 }
 0xcb0   : > { %1231 = vadd.xlane.f32.xlu2 %v1230_v56  ;;  %v3115_v56 = vld [vmem:[#allocation8 + $0x1f] ss:$0 sm:$0xff] }
 0xcc4   : > { %1123 = vrot.lane.b32.xlu1 %v3684_v9, %s3429_s9 }
 0xcc8   : > { %1235 = vrot.lane.b32.xlu2 %v3684_v9, %s3430_s10 }
 0xd1e   : > { %v1316_v57 = vpop.xlane.xlu1 %1315 }
 0xd1f   : > { %v1317_v59 = vsub.f32 %v1312_v53, %v1316_v57  ;;  %v3114_v53 = vld [vmem:[#allocation8 + $0x1e] ss:$0 sm:$0xff] }
 0xd21   : > { %v1318_v60 = vmul.f32 1.442695, %v1317_v59 }
 0xd23   : > { %3172 = vpow2.f32 %v1318_v60  ;;  %v1232_v0 = vpop.xlane.xlu2 %1231  ;;  %v1414_v60 = vld [vmem:[#allocation7 + $0x1c0] sm:$0xff] }
 0xd24   : > { %3174 = vrcp.f32 %v1119_v62  ;;  %1464 = vmatpush.msrb.mxu2 %v1414_v60  ;;  %v1412_v62 = vld [vmem:[#allocation7 + $0x1b0] sm:$0xff] }
 0xd25   : > { %3176 = vrcp.f32 %v1232_v0 }
 0xd29   : > { %v3173_v61 = vpop.eup %3172 }
 0xd2a   : > { %v1320_v63 = vsel %vm299_vm0, %v3173_v61, 0.0  ;;  %v3175_v1 = vpop.eup %3174 }
 0xd2b   : > { %1321 = vadd.xlane.f32.xlu0 %v1320_v63  ;;  %v1121_v2 = vmul.f32 %v3175_v1, %v3169_v38  ;;  %v1236_v4 = vpop.permute.xlu2 %1235  ;;  %v3177_v5 = vpop.eup %3176  ;;  %v3116_v63 = vld [vmem:[#allocation8 + $0x1c] ss:$0 sm:$0xff] }
 0xd2c   : > { %v1234_v7 = vmul.f32 %v3177_v5, %v3171_v55 }
 0xd36   : > { %v1124_v3 = vpop.permute.xlu1 %1123 }
 0xd37   : > { %1144 = vmatpush.msrb.mxu3 %v1124_v3  ;;  %v3117_v3 = vld [vmem:[#allocation8 + $0x1d] ss:$0 sm:$0xff] }
 0xd38   : > { %2953 = vmatmul.msk.f32.vlgmr.msrb.gmra.mxu3 %vm299_vm0, %v1121_v2 }
 0xd39   : > { %1256 = vmatpush.msra.mxu3 %v1236_v4 }
 0xd3f   : > { %1325 = vrot.lane.b32.xlu0 %v3684_v9, %s3428_s13  ;;  %v1351_v9 = vld [vmem:[#allocation7 + $0x188] sm:$0xff] }
 0xd40   : > { %2958 = vmatmul.msk.f32.vlgmr.msra.gmra.mxu3 %vm299_vm0, %v1234_v7 }
 0xd41   : > { %1370 = vmatpush.msrb.mxu3 %v1351_v9  ;;  %v1558_v9 = vld [vmem:[#allocation7 + $0x248] sm:$0xff] }
 0xd9e   : > { %v1322_v11 = vpop.xlane.xlu0 %1321 }
 0xd9f   : > { %3178 = vrcp.f32 %v1322_v11 }
 0xda5   : > { %v3179_v12 = vpop.eup %3178 }
 0xda6   : > { %v1324_v13 = vmul.f32 %v3179_v12, %v3173_v61  ;;  %v1413_v61 = vld [vmem:[#allocation7 + $0x1b8] sm:$0xff] }
 0xda7   : > { %1465 = vmatpush.msrb.mxu2 %v1413_v61 }
 0xda9   : > { %1466 = vmatpush.msrb.mxu2 %v1412_v62 }
 0xdb1   : > { %v1326_v14 = vpop.permute.xlu0 %1325 }
 0xdb2   : > { %1346 = vmatpush.msra.mxu1 %v1326_v14 }
 0xdb3   : > { %2962 = vmatmul.msk.f32.vlgmr.msra.gmra.mxu1 %vm299_vm0, %v1324_v13 }
 0xdbb   : > { %v1146_v15 = vpop.f32.mrf.mxu3 }
 0xdbc   : > { %2954 = vmatmul.msk.f32.vlgmr.msrb.gmra.mxu0 %vm299_vm0, %v1146_v15  ;;  %v1503_v15 = vld [vmem:[#allocation7 + $0x208] sm:$0xff] }
 0xdbd   : > { %1437 = vmatpush.msrb.mxu0 %v1411_v34  ;;  %1521 = vmatpush.msrb.mxu1 %v1503_v15 }
 0xdbf   : > { %1438 = vmatpush.msrb.mxu0 %v1410_v35 }
 0xdc1   : > { %1439 = vmatpush.msrb.mxu0 %v1409_v36  ;;  %v3118_v36 = vld [vmem:[#allocation8 + $0x20] ss:$0 sm:$0xff] }
 0xdc3   : > { %v1258_v16 = vpop.f32.mrf.mxu3  ;;  %1440 = vmatpush.msrb.mxu0 %v1408_v37 }
 0xdc4   : > { %2959 = vmatmul.msk.f32.vlgmr.msra.gmra.mxu0 %vm299_vm0, %v1258_v16  ;;  %v1532_v16 = vld [vmem:[#allocation7 + $0x228] sm:$0xff] }
 0xdc5   : > { %1547 = vmatpush.msra.mxu3 %v1532_v16  ;;  %1573 = vmatpush.msra.mxu0 %v1558_v9 }
 0xe30   : > { %v1348_v17 = vpop.f32.mrf.mxu1 }
 0xe31   : > { %2963 = vmatmul.msk.f32.vlgmr.msrb.gmra.mxu3 %vm299_vm0, %v1348_v17  ;;  %v1502_v17 = vld [vmem:[#allocation7 + $0x200] sm:$0xff] }
 0xe32   : > { %1522 = vmatpush.msrb.mxu1 %v1502_v17 }
 0xe39   : > { %v1170_v18 = vpop.f32.mrf.mxu0 }
 0xe3a   : > { %v1194_v20 = vadd.f32 %v1193_v48, %v1170_v18  ;;  %v1531_v18 = vld [vmem:[#allocation7 + $0x220] sm:$0xff] }
 0xe3b   : > { %1548 = vmatpush.msra.mxu3 %v1531_v18 }
 0xe41   : > { %v1282_v19 = vpop.f32.mrf.mxu0 }
 0xe42   : > { %v1285_v21 = vadd.f32 %v1282_v19, %v1194_v20  ;;  %v1557_v19 = vld [vmem:[#allocation7 + $0x240] sm:$0xff]  ;;  %v1501_v20 = vld [vmem:[#allocation7 + $0x1f8] sm:$0xff] }
 0xe43   : > { %1574 = vmatpush.msra.mxu0 %v1557_v19  ;;  %1523 = vmatpush.msrb.mxu1 %v1501_v20 }
 0xeb4   : > { %v1372_v23 = vpop.f32.mrf.mxu3 }
 0xeb5   : > { %v1375_v24 = vadd.f32 %v1372_v23, %v1285_v21  ;;  %v1530_v21 = vld [vmem:[#allocation7 + $0x218] sm:$0xff]  ;;  %v1500_v23 = vld [vmem:[#allocation7 + $0x1f0] sm:$0xff] }
 0xeb6   : > { %1549 = vmatpush.msra.mxu3 %v1530_v21  ;;  %1524 = vmatpush.msrb.mxu1 %v1500_v23 }
 0xeb7   : > { %v1378_v25 = vadd.f32 %v3113_v22, %v1375_v24  ;;  %v1556_v22 = vld [vmem:[#allocation7 + $0x238] sm:$0xff]  ;;  %v1529_v24 = vld [vmem:[#allocation7 + $0x210] sm:$0xff] }
 0xeb8   : > { %1575 = vmatpush.msra.mxu0 %v1556_v22  ;;  %1550 = vmatpush.msra.mxu3 %v1529_v24 }
 0xeb9   : > { %v1379_v26 = vadd.f32 %v1378_v25, %v3676_v6  ;;  %v1555_v25 = vld [vmem:[#allocation7 + $0x230] sm:$0xff] }
 0xeba   : > { %1576 = vmatpush.msra.mxu0 %v1555_v25 }
 0xebb   : > { %v1382_v27 = vsel %vm326_vm1, %v1379_v26, 0.0 }
 0xebc   : > { %1383 = vadd.xlane.f32.xlu1 %v1382_v27 }
 0xf2f   : > { %v1384_v28 = vpop.xlane.xlu1 %1383 }
 0xf30   : > { %v1385_v30 = vmul.f32 %v1384_v28, %v3665_v58 }
 0xf32   : > { %v1386_v31 = vsub.f32 %v1379_v26, %v1385_v30 }
 0xf34   : > { %v1387_v32 = vmul.f32 %v1386_v31, %v1386_v31 }
 0xf36   : > { %v1388_v33 = vsel %vm326_vm1, %v1387_v32, 0.0 }
 0xf37   : > { %1389 = vadd.xlane.f32.xlu2 %v1388_v33 }
 0xfaa   : > { %v1390_v42 = vpop.xlane.xlu2 %1389 }
 0xfab   : > { %v1391_v38 = vmul.f32 %v1390_v42, %v3665_v58 }
 0xfad   : > { %v1392_v45 = vadd.f32 1e-05, %v1391_v38  ;;  %v3121_v38 = vld [vmem:[#allocation8 + $0x2a] ss:$0 sm:$0xff] }
 0xfaf   : > { %3180 = vrsqrt.f32 %v1392_v45  ;;  %vm1399_vm12 = vweird.f32 %v1392_v45 }
 0xfb5   : > { %v3181_v47 = vpop.eup %3180 }
 0xfb6   : > { %v1394_v48 = vmul.f32 %v3181_v47, %v1392_v45  ;;  %vm1400_vm11 = vweird.f32 %v3181_v47 }
 0xfb7   : > { %vm1401_vm13 = vmor %vm1399_vm12, %vm1400_vm11 }
 0xfb8   : > { %v1395_v49 = vmul.f32 %v3181_v47, %v1394_v48 }
 0xfba   : > { %v1396_v50 = vmul.f32 0.5, %v1395_v49 }
 0xfbc   : > { %v1397_v51 = vsub.f32 1.5, %v1396_v50 }
 0xfbe   : > { %v1398_v52 = vmul.f32 %v3181_v47, %v1397_v51 }
 0xfc0   : > { %v1402_v54 = vsel %vm1401_vm13, %v3181_v47, %v1398_v52  ;;  %v3120_v47 = vld [vmem:[#allocation8 + $0x28] ss:$0 sm:$0xff] }
 0xfc1   : > { %v1403_v55 = vmul.f32 %v1402_v54, %v1386_v31 }
 0xfc3   : > { %v1405_v57 = vmul.f32 %v3114_v53, %v1403_v55 }
 0xfc5   : > { %v1407_v59 = vadd.f32 %v3115_v56, %v1405_v57 }
 0xfc7   : > { %2964 = vmatmul.msk.f32.vlgmr.msrb.gmra.mxu0 %vm326_vm1, %v1407_v59 }
0x1044   : > { %v1442_v0 = vpop.f32.mrf.mxu0 }
0x1045   : > { %v1443_v1 = vadd.f32 %v3116_v63, %v1442_v0 }
0x1047   : > { %v1445_v2 = vmax.f32 %v1443_v1, 0.0  ;;  %v1641_v1 = vld [vmem:[#allocation7 + $0x250] sm:$0xff] }
0x1049   : > { %2965 = vmatmul.msk.f32.vlgmr.msrb.gmra.mxu2 %vm888_vm7, %v1445_v2 }
0x10cc   : > { %v1468_v4 = vpop.f32.mrf.mxu2 }
0x10cd   : > { %v1469_v5 = vadd.f32 %v3117_v3, %v1468_v4 }
0x10cf   : > { %v1471_v7 = vadd.f32 %v1469_v5, %v1407_v59 }
0x10d1   : > { %v1474_v8 = vsel %vm326_vm1, %v1471_v7, 0.0 }
0x10d2   : > { %1475 = vadd.xlane.f32.xlu0 %v1474_v8 }
0x1145   : > { %v1476_v10 = vpop.xlane.xlu0 %1475 }
0x1146   : > { %v1477_v11 = vmul.f32 %v1476_v10, %v3665_v58 }
0x1148   : > { %v1478_v12 = vsub.f32 %v1471_v7, %v1477_v11 }
0x114a   : > { %v1479_v13 = vmul.f32 %v1478_v12, %v1478_v12 }
0x114c   : > { %v1480_v14 = vsel %vm326_vm1, %v1479_v13, 0.0 }
0x114d   : > { %1481 = vadd.xlane.f32.xlu1 %v1480_v14 }
0x11c0   : > { %v1482_v26 = vpop.xlane.xlu1 %1481 }
0x11c1   : > { %v1483_v27 = vmul.f32 %v1482_v26, %v3665_v58 }
0x11c3   : > { %v1484_v28 = vadd.f32 1e-05, %v1483_v27 }
0x11c5   : > { %3182 = vrsqrt.f32 %v1484_v28  ;;  %vm1491_vm15 = vweird.f32 %v1484_v28 }
0x11cb   : > { %v3183_v30 = vpop.eup %3182 }
0x11cc   : > { %v1486_v31 = vmul.f32 %v3183_v30, %v1484_v28  ;;  %vm1492_vm14 = vweird.f32 %v3183_v30 }
0x11cd   : > { %vm1493_vm2 = vmor %vm1491_vm15, %vm1492_vm14 }
0x11ce   : > { %v1487_v32 = vmul.f32 %v3183_v30, %v1486_v31 }
0x11d0   : > { %v1488_v33 = vmul.f32 0.5, %v1487_v32 }
0x11d2   : > { %v1489_v34 = vsub.f32 1.5, %v1488_v33 }
0x11d4   : > { %v1490_v35 = vmul.f32 %v3183_v30, %v1489_v34 }
0x11d6   : > { %v1494_v37 = vsel %vm1493_vm2, %v3183_v30, %v1490_v35 }
0x11d7   : > { %v1495_v39 = vmul.f32 %v1494_v37, %v1478_v12 }
0x11d9   : > { %v1497_v41 = vmul.f32 %v3118_v36, %v1495_v39 }
0x11db   : > { %v3738_v42 = vadd.f32 %v3119_v40, %v1497_v41 }
0x11dd   : > { %2966 = vmatmul.msk.f32.vlgmr.msrb.gmra.mxu1 %vm326_vm1, %v3738_v42  ;;  %2967 = vmatmul.msk.f32.vlgmr.msra.gmra.mxu3 %vm326_vm1, %v3738_v42 }
0x11de   : > { %2968 = vmatmul.msk.f32.vlgmr.msra.gmra.mxu0 %vm326_vm1, %v3738_v42 }
0x125a   : > { %v1526_v49 = vpop.f32.mrf.mxu1 }
0x125b   : > { %v1578_v44 = vpop.f32.mrf.mxu0  ;;  %v1527_v51 = vadd.f32 %v3120_v47, %v1526_v49  ;;  %v1820_v47 = vld [vmem:[#allocation7 + $0x260] sm:$0xff] }
0x125c   : > { %v3746_v45 = vadd.f32 %v3121_v38, %v1578_v44 }
0x125e   : > { %1636 = vmatpush.msrb.mxu3 %v3746_v45 }
0x1260   : > { %v1552_v48 = vpop.f32.mrf.mxu3  ;;  %1750 = vmatpush.msra.mxu3 %v1641_v1 }
0x1261   : > { %v1553_v50 = vadd.f32 %v3122_v46, %v1552_v48  ;;  %v1708_v46 = vld [vmem:[#allocation7 + $0x258] sm:$0xff] }
0x1263   : > { %1644 = vrot.lane.b32.xlu1 %v1553_v50, %s3429_s9  ;;  %2969 = vmatpush.xpose.msk.msra.mxu1 %vm299_vm0, %v1553_v50 }
0x1266   : > { %2970 = vmatmul.msk.f32.vlgmr.msra.gmra.mxu1 %vm299_vm0, %v1527_v51 }
0x1267   : > { %1727 = vmatpush.msrb.mxu1 %v1708_v46 }
0x1269   : > { %1839 = vmatpush.msra.mxu1 %v1820_v47 }
0x126b   : > { %1757 = vrot.lane.b32.xlu1 %v1553_v50, %s3430_s10 }
0x12d5   : > { %v1645_v52 = vpop.permute.xlu1 %1644 }
0x12d6   : > { %2972 = vmatpush.xpose.msk.msrb.mxu0 %vm299_vm0, %v1645_v52 }
0x12dd   : > { %v1758_v53 = vpop.permute.xlu1 %1757 }
0x12de   : > { %2977 = vmatpush.xpose.msk.msra.mxu0 %vm299_vm0, %v1758_v53 }
0x12e3   : > { %v1604_v54 = vpop.f32.mrf.mxu1 }
0x12e4   : > { %v1605_v55 = vadd.f32 %v1604_v54, %v3630_v43  ;;  %v1910_v54 = vld [vmem:[#allocation7 + $0x268] sm:$0xff] }
0x12e6   : > { %v1607_v56 = vsel %vm299_vm0, %v1605_v55, -inf }
0x12e7   : > { %1608 = vmax.xlane.f32.xlu2 %v1607_v56 }
0x12ff   : > { %1642 = vrot.lane.b32.xlu2 %v1527_v51, %s3429_s9 }
0x1307   : > { %1755 = vrot.lane.b32.xlu2 %v1527_v51, %s3430_s10 }
0x135a   : > { %v1609_v57 = vpop.xlane.xlu2 %1608 }
0x135b   : > { %v1610_v59 = vsub.f32 %v1605_v55, %v1609_v57 }
0x135d   : > { %v1611_v60 = vmul.f32 1.442695, %v1610_v59 }
0x135f   : > { %3184 = vpow2.f32 %v1611_v60  ;;  %v3123_v60 = vld [vmem:[#allocation8 + $0x2b] ss:$0 sm:$0xff] }
0x1362   : > { %v1643_v61 = vpop.permute.xlu2 %1642 }
0x1363   : > { %2973 = vmatmul.msk.f32.vlgmr.msrb.gmra.mxu0 %vm299_vm0, %v1643_v61 }
0x1365   : > { %v3185_v62 = vpop.eup %3184 }
0x1366   : > { %v1613_v63 = vsel %vm299_vm0, %v3185_v62, 0.0 }
0x1367   : > { %1614 = vadd.xlane.f32.xlu0 %v1613_v63 }
0x136a   : > { %v1756_v0 = vpop.permute.xlu2 %1755 }
0x136b   : > { %2978 = vmatmul.msk.f32.vlgmr.msra.gmra.mxu0 %vm299_vm0, %v1756_v0 }
0x137b   : > { %1847 = vrot.lane.b32.xlu0 %v1553_v50, %s3428_s13 }
0x1383   : > { %1845 = vrot.lane.b32.xlu0 %v1527_v51, %s3428_s13 }
0x13da   : > { %v1615_v2 = vpop.xlane.xlu0 %1614 }
0x13db   : > { %3186 = vrcp.f32 %v1615_v2 }
0x13e0   : > { %v1667_v3 = vpop.f32.mrf.mxu0 }
0x13e1   : > { %v3187_v4 = vpop.eup %3186  ;;  %v1668_v5 = vadd.f32 %v1667_v3, %v3630_v43 }
0x13e2   : > { %v1617_v7 = vmul.f32 %v3187_v4, %v3185_v62 }
0x13e3   : > { %v1670_v8 = vsel %vm299_vm0, %v1668_v5, -inf }
0x13e4   : > { %2971 = vmatmul.msk.f32.vlgmr.msrb.gmra.mxu3 %vm299_vm0, %v1617_v7  ;;  %1671 = vmax.xlane.f32.xlu0 %v1670_v8  ;;  %v1970_v8 = vld [vmem:[#allocation7 + $0x288] sm:$0xff] }
0x13e8   : > { %v1780_v10 = vpop.f32.mrf.mxu0 }
0x13e9   : > { %v1781_v11 = vadd.f32 %v1780_v10, %v3630_v43  ;;  %v1969_v10 = vld [vmem:[#allocation7 + $0x280] sm:$0xff] }
0x13eb   : > { %v1783_v12 = vsel %vm299_vm0, %v1781_v11, -inf }
0x13ec   : > { %1784 = vmax.xlane.f32.xlu1 %v1783_v12  ;;  %v1967_v12 = vld [vmem:[#allocation7 + $0x270] sm:$0xff] }
0x13ed   : > { %v1848_v13 = vpop.permute.xlu0 %1847 }
0x13ee   : > { %2981 = vmatpush.xpose.msk.msrb.mxu3 %vm299_vm0, %v1848_v13  ;;  %v1978_v13 = vld [vmem:[#allocation7 + $0x2c8] sm:$0xff] }
0x13f5   : > { %v1846_v19 = vpop.permute.xlu0 %1845 }
0x1405   : > { %1682 = vrot.lane.b32.xlu1 %v3746_v45, %s3429_s9 }
0x1457   : > { %v1672_v21 = vpop.xlane.xlu0 %1671 }
0x1458   : > { %v1673_v24 = vsub.f32 %v1668_v5, %v1672_v21 }
0x145a   : > { %v1674_v25 = vmul.f32 1.442695, %v1673_v24 }
0x145f   : > { %v1785_v14 = vpop.xlane.xlu1 %1784 }
0x1460   : > { %v1786_v15 = vsub.f32 %v1781_v11, %v1785_v14  ;;  %v1968_v11 = vld [vmem:[#allocation7 + $0x278] sm:$0xff]  ;;  %v1977_v14 = vld [vmem:[#allocation7 + $0x2c0] sm:$0xff] }
0x1462   : > { %v1787_v16 = vmul.f32 1.442695, %v1786_v15  ;;  %v1976_v15 = vld [vmem:[#allocation7 + $0x2b8] sm:$0xff] }
0x1464   : > { %3188 = vpow2.f32 %v1787_v16 }
0x1465   : > { %3190 = vpow2.f32 %v1674_v25 }
0x1467   : > { %v1638_v9 = vpop.f32.mrf.mxu3 }
0x1468   : > { %2976 = vmatmul.msk.f32.vlgmr.msra.gmra.mxu3 %vm299_vm0, %v1638_v9 }
0x1469   : > { %2018 = vmatpush.msra.mxu3 %v1978_v13 }
0x146a   : > { %v3189_v17 = vpop.eup %3188 }
0x146b   : > { %v1789_v18 = vsel %vm299_vm0, %v3189_v17, 0.0  ;;  %v3191_v31 = vpop.eup %3190  ;;  %2019 = vmatpush.msra.mxu3 %v1977_v14 }
0x146c   : > { %1790 = vadd.xlane.f32.xlu0 %v1789_v18  ;;  %v1676_v32 = vsel %vm299_vm0, %v3191_v31, 0.0 }
0x146d   : > { %2020 = vmatpush.msra.mxu3 %v1976_v15  ;;  %v3129_v15 = vld [vmem:[#allocation8 + $0x31] ss:$0 sm:$0xff] }
0x1470   : > { %2982 = vmatmul.msk.f32.vlgmr.msrb.gmra.mxu3 %vm299_vm0, %v1846_v19  ;;  %v1974_v19 = vld [vmem:[#allocation7 + $0x2a8] sm:$0xff] }
0x1477   : > { %v1683_v20 = vpop.permute.xlu1 %1682 }
0x1478   : > { %1703 = vmatpush.msra.mxu2 %v1683_v20 }
0x1480   : > { %1794 = vrot.lane.b32.xlu0 %v3746_v45, %s3430_s10 }
0x14df   : > { %v1791_v22 = vpop.xlane.xlu0 %1790 }
0x14eb   : > { %v1752_v23 = vpop.f32.mrf.mxu3 }
0x14f2   : > { %v1795_v26 = vpop.permute.xlu0 %1794 }
0x14f3   : > { %1815 = vmatpush.msrb.mxu2 %v1795_v26  ;;  %v1870_v27 = vpop.f32.mrf.mxu3  ;;  %v3124_v26 = vld [vmem:[#allocation8 + $0x2e] ss:$0 sm:$0xff] }
0x14f4   : > { %v1871_v28 = vadd.f32 %v1870_v27, %v3630_v43 }
0x14f6   : > { %v1873_v30 = vsel %vm299_vm0, %v1871_v28, -inf }
0x14f7   : > { %1874 = vmax.xlane.f32.xlu2 %v1873_v30  ;;  %v3125_v30 = vld [vmem:[#allocation8 + $0x2f] ss:$0 sm:$0xff] }
0x14ff   : > { %1677 = vadd.xlane.f32.xlu2 %v1676_v32 }
0x156a   : > { %v1875_v33 = vpop.xlane.xlu2 %1874 }
0x156b   : > { %v1876_v34 = vsub.f32 %v1871_v28, %v1875_v33  ;;  %v1973_v33 = vld [vmem:[#allocation7 + $0x2a0] sm:$0xff] }
0x156d   : > { %v1877_v35 = vmul.f32 1.442695, %v1876_v34  ;;  %v1972_v34 = vld [vmem:[#allocation7 + $0x298] sm:$0xff] }
0x156f   : > { %3192 = vpow2.f32 %v1877_v35  ;;  %v1971_v35 = vld [vmem:[#allocation7 + $0x290] sm:$0xff] }
0x1572   : > { %v1678_v36 = vpop.xlane.xlu2 %1677 }
0x1573   : > { %3194 = vrcp.f32 %v1678_v36  ;;  %v3126_v36 = vld [vmem:[#allocation8 + $0x2c] ss:$0 sm:$0xff] }
0x1574   : > { %3196 = vrcp.f32 %v1791_v22 }
0x1575   : > { %v3193_v37 = vpop.eup %3192 }
0x1576   : > { %v1879_v39 = vsel %vm299_vm0, %v3193_v37, 0.0 }
0x1577   : > { %1880 = vadd.xlane.f32.xlu2 %v1879_v39 }
0x1579   : > { %v3195_v40 = vpop.eup %3194 }
0x157a   : > { %v1680_v41 = vmul.f32 %v3195_v40, %v3191_v31  ;;  %v3197_v38 = vpop.eup %3196 }
0x157b   : > { %v1793_v44 = vmul.f32 %v3197_v38, %v3189_v17  ;;  %v1975_v17 = vld [vmem:[#allocation7 + $0x2b0] sm:$0xff] }
0x157c   : > { %2974 = vmatmul.msk.f32.vlgmr.msra.gmra.mxu2 %vm299_vm0, %v1680_v41  ;;  %2021 = vmatpush.msra.mxu3 %v1975_v17  ;;  %v3127_v41 = vld [vmem:[#allocation8 + $0x2d] ss:$0 sm:$0xff]  ;;  %v3130_v17 = vld [vmem:[#allocation8 + $0x38] ss:$0 sm:$0xff] }
0x157d   : > { %1929 = vmatpush.msra.mxu2 %v1910_v54  ;;  %v2091_v54 = vld [vmem:[#allocation7 + $0x308] sm:$0xff] }
0x157e   : > { %2022 = vmatpush.msra.mxu3 %v1974_v19 }
0x1580   : > { %2023 = vmatpush.msra.mxu3 %v1973_v33 }
0x1582   : > { %2024 = vmatpush.msra.mxu3 %v1972_v34 }
0x1584   : > { %2979 = vmatmul.msk.f32.vlgmr.msrb.gmra.mxu2 %vm299_vm0, %v1793_v44  ;;  %2025 = vmatpush.msra.mxu3 %v1971_v35 }
0x1585   : > { %2106 = vmatpush.msrb.mxu2 %v2091_v54 }
0x158f   : > { %1884 = vrot.lane.b32.xlu2 %v3746_v45, %s3428_s13 }
0x15ea   : > { %v1881_v48 = vpop.xlane.xlu2 %1880 }
0x15eb   : > { %3198 = vrcp.f32 %v1881_v48 }
0x15f1   : > { %v3199_v49 = vpop.eup %3198 }
0x15f2   : > { %v1883_v50 = vmul.f32 %v3199_v49, %v3193_v37  ;;  %v1885_v51 = vpop.permute.xlu2 %1884 }
0x15f3   : > { %1905 = vmatpush.msrb.mxu0 %v1885_v51 }
0x15f4   : > { %2983 = vmatmul.msk.f32.vlgmr.msrb.gmra.mxu0 %vm299_vm0, %v1883_v50 }
0x15ff   : > { %v1705_v52 = vpop.f32.mrf.mxu2 }
0x1600   : > { %2975 = vmatmul.msk.f32.vlgmr.msrb.gmra.mxu1 %vm299_vm0, %v1705_v52 }
0x1601   : > { %1996 = vmatpush.msrb.mxu1 %v1970_v8 }
0x1603   : > { %1997 = vmatpush.msrb.mxu1 %v1969_v10 }
0x1605   : > { %1998 = vmatpush.msrb.mxu1 %v1968_v11 }
0x1607   : > { %v1817_v53 = vpop.f32.mrf.mxu2  ;;  %1999 = vmatpush.msrb.mxu1 %v1967_v12  ;;  %v3128_v12 = vld [vmem:[#allocation8 + $0x30] ss:$0 sm:$0xff] }
0x1608   : > { %2980 = vmatmul.msk.f32.vlgmr.msra.gmra.mxu1 %vm299_vm0, %v1817_v53  ;;  %v2062_v53 = vld [vmem:[#allocation7 + $0x2e8] sm:$0xff] }
0x1609   : > { %2080 = vmatpush.msra.mxu0 %v2062_v53 }
0x1671   : > { %v1907_v45 = vpop.f32.mrf.mxu0 }
0x1672   : > { %2984 = vmatmul.msk.f32.vlgmr.msra.gmra.mxu2 %vm299_vm0, %v1907_v45  ;;  %v2117_v45 = vld [vmem:[#allocation7 + $0x328] sm:$0xff] }
0x1673   : > { %2132 = vmatpush.msra.mxu1 %v2117_v45 }
0x167d   : > { %v1729_v55 = vpop.f32.mrf.mxu1 }
0x167e   : > { %v1753_v57 = vadd.f32 %v1752_v23, %v1729_v55  ;;  %v2061_v55 = vld [vmem:[#allocation7 + $0x2e0] sm:$0xff] }
0x167f   : > { %2081 = vmatpush.msra.mxu0 %v2061_v55 }
0x1685   : > { %v1841_v56 = vpop.f32.mrf.mxu1 }
0x1686   : > { %v1844_v59 = vadd.f32 %v1841_v56, %v1753_v57  ;;  %v2090_v56 = vld [vmem:[#allocation7 + $0x300] sm:$0xff] }
0x1687   : > { %v2116_v57 = vld [vmem:[#allocation7 + $0x320] sm:$0xff]  ;;  %2107 = vmatpush.msrb.mxu2 %v2090_v56 }
0x1688   : > { %2133 = vmatpush.msra.mxu1 %v2116_v57 }
0x16f5   : > { %v1931_v61 = vpop.f32.mrf.mxu2 }
0x16f6   : > { %v1934_v62 = vadd.f32 %v1931_v61, %v1844_v59  ;;  %v2060_v59 = vld [vmem:[#allocation7 + $0x2d8] sm:$0xff] }
0x16f7   : > { %v2115_v61 = vld [vmem:[#allocation7 + $0x318] sm:$0xff]  ;;  %2082 = vmatpush.msra.mxu0 %v2060_v59 }
0x16f8   : > { %v1937_v63 = vadd.f32 %v3123_v60, %v1934_v62  ;;  %v2089_v60 = vld [vmem:[#allocation7 + $0x2f8] sm:$0xff]  ;;  %v2059_v62 = vld [vmem:[#allocation7 + $0x2d0] sm:$0xff]  ;;  %2134 = vmatpush.msra.mxu1 %v2115_v61 }
0x16f9   : > { %2108 = vmatpush.msrb.mxu2 %v2089_v60  ;;  %2083 = vmatpush.msra.mxu0 %v2059_v62 }
0x16fa   : > { %v1938_v0 = vadd.f32 %v1937_v63, %v3738_v42  ;;  %v2088_v63 = vld [vmem:[#allocation7 + $0x2f0] sm:$0xff] }
0x16fb   : > { %2109 = vmatpush.msrb.mxu2 %v2088_v63 }
0x16fc   : > { %v1941_v1 = vsel %vm326_vm1, %v1938_v0, 0.0 }
0x16fd   : > { %1942 = vadd.xlane.f32.xlu1 %v1941_v1 }
0x1770   : > { %v1943_v2 = vpop.xlane.xlu1 %1942 }
0x1771   : > { %v1944_v3 = vmul.f32 %v1943_v2, %v3665_v58 }
0x1773   : > { %v1945_v4 = vsub.f32 %v1938_v0, %v1944_v3  ;;  %v2114_v0 = vld [vmem:[#allocation7 + $0x310] sm:$0xff] }
0x1774   : > { %2135 = vmatpush.msra.mxu1 %v2114_v0 }
0x1775   : > { %v1946_v5 = vmul.f32 %v1945_v4, %v1945_v4 }
0x1777   : > { %v1947_v7 = vsel %vm326_vm1, %v1946_v5, 0.0 }
0x1778   : > { %1948 = vadd.xlane.f32.xlu0 %v1947_v7 }
0x17eb   : > { %v1949_v16 = vpop.xlane.xlu0 %1948 }
0x17ec   : > { %v1950_v9 = vmul.f32 %v1949_v16, %v3665_v58 }
0x17ee   : > { %v1951_v18 = vadd.f32 1e-05, %v1950_v9 }
0x17f0   : > { %3200 = vrsqrt.f32 %v1951_v18  ;;  %vm1958_vm4 = vweird.f32 %v1951_v18 }
0x17f6   : > { %v3201_v20 = vpop.eup %3200 }
0x17f7   : > { %v1953_v21 = vmul.f32 %v3201_v20, %v1951_v18  ;;  %vm1959_vm3 = vweird.f32 %v3201_v20  ;;  %v3131_v18 = vld [vmem:[#allocation8 + $0x3a] ss:$0 sm:$0xff] }
0x17f8   : > { %vm1960_vm5 = vmor %vm1958_vm4, %vm1959_vm3 }
0x17f9   : > { %v1954_v22 = vmul.f32 %v3201_v20, %v1953_v21 }
0x17fb   : > { %v1955_v23 = vmul.f32 0.5, %v1954_v22 }
0x17fd   : > { %v1956_v24 = vsub.f32 1.5, %v1955_v23  ;;  %v3132_v23 = vld [vmem:[#allocation8 + $0x39] ss:$0 sm:$0xff] }
0x17ff   : > { %v1957_v25 = vmul.f32 %v3201_v20, %v1956_v24 }
0x1801   : > { %v1961_v27 = vsel %vm1960_vm5, %v3201_v20, %v1957_v25 }
0x1802   : > { %v1962_v28 = vmul.f32 %v1961_v27, %v1945_v4 }
0x1804   : > { %v1964_v31 = vmul.f32 %v3124_v26, %v1962_v28 }
0x1806   : > { %v1966_v32 = vadd.f32 %v3125_v30, %v1964_v31 }
0x1808   : > { %2985 = vmatmul.msk.f32.vlgmr.msrb.gmra.mxu1 %vm326_vm1, %v1966_v32 }
0x1885   : > { %v2001_v37 = vpop.f32.mrf.mxu1 }
0x1886   : > { %v2002_v39 = vadd.f32 %v3126_v36, %v2001_v37 }
0x1888   : > { %v2004_v40 = vmax.f32 %v2002_v39, 0.0 }
0x188a   : > { %2986 = vmatmul.msk.f32.vlgmr.msra.gmra.mxu3 %vm888_vm7, %v2004_v40 }
0x190d   : > { %v2027_v38 = vpop.f32.mrf.mxu3 }
0x190e   : > { %v2028_v44 = vadd.f32 %v3127_v41, %v2027_v38  ;;  %v2200_v41 = vld [vmem:[#allocation7 + $0x330] sm:$0xff] }
0x1910   : > { %v2030_v46 = vadd.f32 %v2028_v44, %v1966_v32 }
0x1912   : > { %v2033_v47 = vsel %vm326_vm1, %v2030_v46, 0.0 }
0x1913   : > { %2034 = vadd.xlane.f32.xlu2 %v2033_v47 }
0x1986   : > { %v2035_v48 = vpop.xlane.xlu2 %2034 }
0x1987   : > { %v2036_v49 = vmul.f32 %v2035_v48, %v3665_v58 }
0x1989   : > { %v2037_v50 = vsub.f32 %v2030_v46, %v2036_v49 }
0x198b   : > { %v2038_v51 = vmul.f32 %v2037_v50, %v2037_v50 }
0x198d   : > { %v2039_v52 = vsel %vm326_vm1, %v2038_v51, 0.0 }
0x198e   : > { %2040 = vadd.xlane.f32.xlu1 %v2039_v52 }
0x1a01   : > { %v2041_v1 = vpop.xlane.xlu1 %2040 }
0x1a02   : > { %v2042_v2 = vmul.f32 %v2041_v1, %v3665_v58 }
0x1a04   : > { %v2043_v3 = vadd.f32 1e-05, %v2042_v2 }
0x1a06   : > { %3202 = vrsqrt.f32 %v2043_v3  ;;  %vm2050_vm8 = vweird.f32 %v2043_v3 }
0x1a0c   : > { %v3203_v4 = vpop.eup %3202 }
0x1a0d   : > { %v2045_v5 = vmul.f32 %v3203_v4, %v2043_v3  ;;  %vm2051_vm6 = vweird.f32 %v3203_v4 }
0x1a0e   : > { %vm2052_vm9 = vmor %vm2050_vm8, %vm2051_vm6 }
0x1a0f   : > { %v2046_v7 = vmul.f32 %v3203_v4, %v2045_v5 }
0x1a11   : > { %v2047_v8 = vmul.f32 0.5, %v2046_v7 }
0x1a13   : > { %v2048_v10 = vsub.f32 1.5, %v2047_v8 }
0x1a15   : > { %v2049_v11 = vmul.f32 %v3203_v4, %v2048_v10 }
0x1a17   : > { %v2053_v13 = vsel %vm2052_vm9, %v3203_v4, %v2049_v11 }
0x1a18   : > { %v2054_v14 = vmul.f32 %v2053_v13, %v2037_v50 }
0x1a1a   : > { %v2056_v16 = vmul.f32 %v3128_v12, %v2054_v14 }
0x1a1c   : > { %v3800_v9 = vadd.f32 %v3129_v15, %v2056_v16 }
0x1a1e   : > { %2987 = vmatmul.msk.f32.vlgmr.msra.gmra.mxu0 %vm326_vm1, %v3800_v9  ;;  %2988 = vmatmul.msk.f32.vlgmr.msrb.gmra.mxu2 %vm326_vm1, %v3800_v9 }
0x1a1f   : > { %2989 = vmatmul.msk.f32.vlgmr.msra.gmra.mxu1 %vm326_vm1, %v3800_v9 }
0x1a9b   : > { %v2085_v19 = vpop.f32.mrf.mxu0 }
0x1a9c   : > { %v2086_v20 = vadd.f32 %v3130_v17, %v2085_v19  ;;  %v2137_v21 = vpop.f32.mrf.mxu1  ;;  %v2267_v19 = vld [vmem:[#allocation7 + $0x338] sm:$0xff] }
0x1a9d   : > { %v3808_v22 = vadd.f32 %v3131_v18, %v2137_v21 }
0x1a9e   : > { %2201 = vrot.lane.b32.xlu2 %v2086_v20, %s3429_s9 }
0x1a9f   : > { %2195 = vmatpush.msra.mxu2 %v3808_v22 }
0x1aa1   : > { %v2111_v24 = vpop.f32.mrf.mxu2  ;;  %2309 = vmatpush.msrb.mxu2 %v2200_v41  ;;  %v2618_v41 = vld [vmem:[#allocation7 + $0x3b0] sm:$0xff] }
0x1aa2   : > { %v2112_v25 = vadd.f32 %v3132_v23, %v2111_v24 }
0x1aa4   : > { %2990 = vmatpush.xpose.msk.msrb.mxu0 %vm299_vm0, %v2112_v25 }
0x1aa6   : > { %2316 = vrot.lane.b32.xlu2 %v2112_v25, %s3430_s10 }
0x1aa7   : > { %2991 = vmatmul.msk.f32.vlgmr.msrb.gmra.mxu0 %vm299_vm0, %v2086_v20 }
0x1aa8   : > { %2286 = vmatpush.msra.mxu0 %v2267_v19  ;;  %v3135_v19 = vld [vmem:[#allocation8 + $0x3f] ss:$0 sm:$0xff] }
0x1af8   : > { %v2202_v33 = vpop.permute.xlu2 %2201 }
0x1b00   : > { %v2317_v37 = vpop.permute.xlu2 %2316 }
0x1b24   : > { %v2163_v26 = vpop.f32.mrf.mxu0 }
0x1b25   : > { %v2164_v27 = vadd.f32 %v2163_v26, %v3630_v43 }
0x1b27   : > { %v2166_v28 = vsel %vm299_vm0, %v2164_v27, -inf }
0x1b28   : > { %2167 = vmax.xlane.f32.xlu0 %v2166_v28  ;;  %v2624_v28 = vld [vmem:[#allocation7 + $0x3e0] sm:$0xff] }
0x1b3c   : > { %2203 = vrot.lane.b32.xlu0 %v2112_v25, %s3429_s9 }
0x1b44   : > { %2404 = vrot.lane.b32.xlu0 %v2086_v20, %s3428_s13 }
0x1b4c   : > { %2314 = vrot.lane.b32.xlu0 %v2086_v20, %s3430_s10  ;;  %v2379_v20 = vld [vmem:[#allocation7 + $0x340] sm:$0xff] }
0x1b4d   : > { %2398 = vmatpush.msrb.mxu0 %v2379_v20 }
0x1b9b   : > { %v2168_v30 = vpop.xlane.xlu0 %2167 }
0x1b9c   : > { %v2169_v31 = vsub.f32 %v2164_v27, %v2168_v30  ;;  %v2625_v27 = vld [vmem:[#allocation7 + $0x3e8] sm:$0xff]  ;;  %v2623_v30 = vld [vmem:[#allocation7 + $0x3d8] sm:$0xff] }
0x1b9e   : > { %v2170_v32 = vmul.f32 1.442695, %v2169_v31 }
0x1ba0   : > { %3204 = vpow2.f32 %v2170_v32  ;;  %v2694_v32 = vld [vmem:[#allocation7 + $0x428] sm:$0xff] }
0x1ba6   : > { %v3205_v34 = vpop.eup %3204 }
0x1ba7   : > { %v2172_v35 = vsel %vm299_vm0, %v3205_v34, 0.0 }
0x1ba8   : > { %2173 = vadd.xlane.f32.xlu1 %v2172_v35  ;;  %v2691_v35 = vld [vmem:[#allocation7 + $0x410] sm:$0xff] }
0x1bae   : > { %v2204_v36 = vpop.permute.xlu0 %2203 }
0x1baf   : > { %2993 = vmatpush.xpose.msk.msrb.mxu1 %vm299_vm0, %v2204_v36  ;;  %v2469_v36 = vld [vmem:[#allocation7 + $0x348] sm:$0xff] }
0x1bb2   : > { %2994 = vmatmul.msk.f32.vlgmr.msrb.gmra.mxu1 %vm299_vm0, %v2202_v33  ;;  %v2693_v33 = vld [vmem:[#allocation7 + $0x420] sm:$0xff] }
0x1bb3   : > { %2998 = vmatpush.xpose.msk.msra.mxu1 %vm299_vm0, %v2317_v37  ;;  %v2621_v37 = vld [vmem:[#allocation7 + $0x3c8] sm:$0xff] }
0x1bb6   : > { %v2405_v39 = vpop.permute.xlu0 %2404 }
0x1bbe   : > { %v2315_v40 = vpop.permute.xlu0 %2314 }
0x1bbf   : > { %2999 = vmatmul.msk.f32.vlgmr.msra.gmra.mxu1 %vm299_vm0, %v2315_v40  ;;  %v2619_v40 = vld [vmem:[#allocation7 + $0x3b8] sm:$0xff] }
0x1bc1   : > { %2406 = vrot.lane.b32.xlu1 %v2112_v25, %s3428_s13 }
0x1c1b   : > { %v2174_v38 = vpop.xlane.xlu1 %2173 }
0x1c1c   : > { %3206 = vrcp.f32 %v2174_v38 }
0x1c22   : > { %v3207_v44 = vpop.eup %3206 }
0x1c23   : > { %v2176_v46 = vmul.f32 %v3207_v44, %v3205_v34  ;;  %v2692_v34 = vld [vmem:[#allocation7 + $0x418] sm:$0xff] }
0x1c25   : > { %2992 = vmatmul.msk.f32.vlgmr.msra.gmra.mxu2 %vm299_vm0, %v2176_v46 }
0x1c2f   : > { %v2226_v47 = vpop.f32.mrf.mxu1 }
0x1c30   : > { %v2227_v48 = vadd.f32 %v2226_v47, %v3630_v43 }
0x1c32   : > { %v2229_v49 = vsel %vm299_vm0, %v2227_v48, -inf }
0x1c33   : > { %v2407_v50 = vpop.permute.xlu1 %2406  ;;  %2230 = vmax.xlane.f32.xlu1 %v2229_v49 }
0x1c34   : > { %3002 = vmatpush.xpose.msk.msra.mxu2 %vm299_vm0, %v2407_v50 }
0x1c3c   : > { %v2339_v51 = vpop.f32.mrf.mxu1 }
0x1c3d   : > { %v2340_v52 = vadd.f32 %v2339_v51, %v3630_v43 }
0x1c3f   : > { %v2342_v53 = vsel %vm299_vm0, %v2340_v52, -inf }
0x1c40   : > { %2343 = vmax.xlane.f32.xlu2 %v2342_v53 }
0x1ca6   : > { %v2231_v54 = vpop.xlane.xlu1 %2230 }
0x1ca7   : > { %v2232_v45 = vsub.f32 %v2227_v48, %v2231_v54  ;;  %v3133_v48 = vld [vmem:[#allocation8 + $0x3b] ss:$0 sm:$0xff] }
0x1ca8   : > { %v2197_v55 = vpop.f32.mrf.mxu2 }
0x1ca9   : > { %v2233_v56 = vmul.f32 1.442695, %v2232_v45  ;;  %2997 = vmatmul.msk.f32.vlgmr.msrb.gmra.mxu2 %vm299_vm0, %v2197_v55 }
0x1cab   : > { %3208 = vpow2.f32 %v2233_v56 }
0x1cb1   : > { %v3209_v57 = vpop.eup %3208  ;;  %3003 = vmatmul.msk.f32.vlgmr.msra.gmra.mxu2 %vm299_vm0, %v2405_v39  ;;  %v2620_v39 = vld [vmem:[#allocation7 + $0x3c0] sm:$0xff] }
0x1cb2   : > { %v2235_v59 = vsel %vm299_vm0, %v3209_v57, 0.0 }
0x1cb3   : > { %2236 = vadd.xlane.f32.xlu1 %v2235_v59  ;;  %v2344_v60 = vpop.xlane.xlu2 %2343  ;;  %v2528_v59 = vld [vmem:[#allocation7 + $0x360] sm:$0xff] }
0x1cb4   : > { %v2345_v61 = vsub.f32 %v2340_v52, %v2344_v60  ;;  %v2527_v60 = vld [vmem:[#allocation7 + $0x358] sm:$0xff] }
0x1cb6   : > { %v2346_v62 = vmul.f32 1.442695, %v2345_v61  ;;  %v2526_v61 = vld [vmem:[#allocation7 + $0x350] sm:$0xff] }
0x1cb8   : > { %3210 = vpow2.f32 %v2346_v62  ;;  %v2668_v62 = vld [vmem:[#allocation7 + $0x400] sm:$0xff] }
0x1cbe   : > { %v3211_v63 = vpop.eup %3210 }
0x1cbf   : > { %v2348_v0 = vsel %vm299_vm0, %v3211_v63, 0.0 }
0x1cc0   : > { %2349 = vadd.xlane.f32.xlu2 %v2348_v0 }
0x1cd8   : > { %2353 = vrot.lane.b32.xlu2 %v3808_v22, %s3430_s10 }
0x1d26   : > { %v2237_v10 = vpop.xlane.xlu1 %2236 }
0x1d2c   : > { %v3838_v1 = vpop.f32.mrf.mxu2 }
0x1d33   : > { %v2350_v12 = vpop.xlane.xlu2 %2349 }
0x1d34   : > { %v2429_v2 = vpop.f32.mrf.mxu2 }
0x1d35   : > { %v2430_v3 = vadd.f32 %v2429_v2, %v3630_v43  ;;  %v2666_v2 = vld [vmem:[#allocation7 + $0x3f0] sm:$0xff] }
0x1d37   : > { %v2432_v4 = vsel %vm299_vm0, %v2430_v3, -inf }
0x1d38   : > { %2433 = vmax.xlane.f32.xlu0 %v2432_v4  ;;  %v2537_v4 = vld [vmem:[#allocation7 + $0x3a8] sm:$0xff] }
0x1d39   : > { %2577 = vmatpush.msrb.mxu2 %v2537_v4  ;;  %v3140_v4 = vld [vmem:[#allocation8 + $0x48] ss:$0 sm:$0xff] }
0x1d3b   : > { %v2354_v16 = vpop.permute.xlu2 %2353 }
0x1d4c   : > { %2241 = vrot.lane.b32.xlu0 %v3808_v22, %s3429_s9 }
0x1dab   : > { %v2434_v5 = vpop.xlane.xlu0 %2433 }
0x1dac   : > { %v2435_v7 = vsub.f32 %v2430_v3, %v2434_v5  ;;  %v2536_v5 = vld [vmem:[#allocation7 + $0x3a0] sm:$0xff] }
0x1dad   : > { %2578 = vmatpush.msrb.mxu2 %v2536_v5 }
0x1dae   : > { %v2436_v8 = vmul.f32 1.442695, %v2435_v7  ;;  %v2535_v7 = vld [vmem:[#allocation7 + $0x398] sm:$0xff] }
0x1daf   : > { %2579 = vmatpush.msrb.mxu2 %v2535_v7 }
0x1db0   : > { %3212 = vpow2.f32 %v2436_v8  ;;  %v2534_v8 = vld [vmem:[#allocation7 + $0x390] sm:$0xff] }
0x1db1   : > { %3214 = vrcp.f32 %v2237_v10  ;;  %2580 = vmatpush.msrb.mxu2 %v2534_v8 }
0x1db2   : > { %3216 = vrcp.f32 %v2350_v12 }
0x1db6   : > { %v3213_v11 = vpop.eup %3212 }
0x1db7   : > { %v2438_v13 = vsel %vm299_vm0, %v3213_v11, 0.0  ;;  %v3215_v14 = vpop.eup %3214 }
0x1db8   : > { %2439 = vadd.xlane.f32.xlu1 %v2438_v13  ;;  %v2239_v43 = vmul.f32 %v3215_v14, %v3209_v57  ;;  %v3217_v17 = vpop.eup %3216  ;;  %v2529_v57 = vld [vmem:[#allocation7 + $0x368] sm:$0xff] }
0x1db9   : > { %v2352_v18 = vmul.f32 %v3217_v17, %v3211_v63  ;;  %v2667_v63 = vld [vmem:[#allocation7 + $0x3f8] sm:$0xff] }
0x1dbe   : > { %v2242_v15 = vpop.permute.xlu0 %2241 }
0x1dbf   : > { %2262 = vmatpush.msrb.mxu3 %v2242_v15 }
0x1dc0   : > { %2995 = vmatmul.msk.f32.vlgmr.msrb.gmra.mxu3 %vm299_vm0, %v2239_v43 }
0x1dc1   : > { %2374 = vmatpush.msra.mxu3 %v2354_v16  ;;  %v3134_v16 = vld [vmem:[#allocation8 + $0x3e] ss:$0 sm:$0xff] }
0x1dc3   : > { %2488 = vmatpush.msrb.mxu3 %v2469_v36 }
0x1dc8   : > { %3000 = vmatmul.msk.f32.vlgmr.msra.gmra.mxu3 %vm299_vm0, %v2352_v18 }
0x1dc9   : > { %2658 = vmatpush.msra.mxu3 %v2621_v37 }
0x1dcb   : > { %2659 = vmatpush.msra.mxu3 %v2620_v39 }
0x1dcd   : > { %2660 = vmatpush.msra.mxu3 %v2619_v40  ;;  %v2719_v40 = vld [vmem:[#allocation7 + $0x448] sm:$0xff] }
0x1dcf   : > { %2661 = vmatpush.msra.mxu3 %v2618_v41  ;;  %v2718_v41 = vld [vmem:[#allocation7 + $0x440] sm:$0xff] }
0x1dd1   : > { %2443 = vrot.lane.b32.xlu1 %v3808_v22, %s3428_s13  ;;  %v2622_v22 = vld [vmem:[#allocation7 + $0x3d0] sm:$0xff] }
0x1e2b   : > { %v2440_v21 = vpop.xlane.xlu1 %2439 }
0x1e2c   : > { %3218 = vrcp.f32 %v2440_v21 }
0x1e32   : > { %v3219_v23 = vpop.eup %3218 }
0x1e33   : > { %v2442_v24 = vmul.f32 %v3219_v23, %v3213_v11  ;;  %v2533_v11 = vld [vmem:[#allocation7 + $0x388] sm:$0xff]  ;;  %v2532_v23 = vld [vmem:[#allocation7 + $0x380] sm:$0xff] }
0x1e34   : > { %2581 = vmatpush.msrb.mxu2 %v2533_v11  ;;  %v3141_v11 = vld [vmem:[#allocation8 + $0x49] ss:$0 sm:$0xff] }
0x1e36   : > { %2582 = vmatpush.msrb.mxu2 %v2532_v23 }
0x1e43   : > { %v2444_v25 = vpop.permute.xlu1 %2443  ;;  %v2264_v26 = vpop.f32.mrf.mxu3 }
0x1e44   : > { %2996 = vmatmul.msk.f32.vlgmr.msra.gmra.mxu0 %vm299_vm0, %v2264_v26  ;;  %2464 = vmatpush.msrb.mxu1 %v2444_v25  ;;  %v2530_v25 = vld [vmem:[#allocation7 + $0x370] sm:$0xff]  ;;  %v3136_v26 = vld [vmem:[#allocation8 + $0x3c] ss:$0 sm:$0xff] }
0x1e45   : > { %3004 = vmatmul.msk.f32.vlgmr.msrb.gmra.mxu1 %vm299_vm0, %v2442_v24  ;;  %2555 = vmatpush.msra.mxu0 %v2529_v57  ;;  %v2531_v24 = vld [vmem:[#allocation7 + $0x378] sm:$0xff] }
0x1e46   : > { %2638 = vmatpush.msra.mxu1 %v2625_v27  ;;  %2583 = vmatpush.msrb.mxu2 %v2531_v24 }
0x1e47   : > { %2556 = vmatpush.msra.mxu0 %v2528_v59  ;;  %v2750_v59 = vld [vmem:[#allocation7 + $0x460] sm:$0xff] }
0x1e48   : > { %2639 = vmatpush.msra.mxu1 %v2624_v28  ;;  %2584 = vmatpush.msrb.mxu2 %v2530_v25 }
0x1e49   : > { %2557 = vmatpush.msra.mxu0 %v2527_v60  ;;  %v2749_v60 = vld [vmem:[#allocation7 + $0x458] sm:$0xff] }
0x1e4a   : > { %2640 = vmatpush.msra.mxu1 %v2623_v30 }
0x1e4b   : > { %v2376_v31 = vpop.f32.mrf.mxu3  ;;  %2558 = vmatpush.msra.mxu0 %v2526_v61  ;;  %v2748_v61 = vld [vmem:[#allocation7 + $0x450] sm:$0xff] }
0x1e4c   : > { %3001 = vmatmul.msk.f32.vlgmr.msrb.gmra.mxu0 %vm299_vm0, %v2376_v31  ;;  %2641 = vmatpush.msra.mxu1 %v2622_v22  ;;  %v3137_v22 = vld [vmem:[#allocation8 + $0x3d] ss:$0 sm:$0xff] }
0x1e4d   : > { %3008 = vmatmul.msk.f32.vlgmr.msra.gmra.mxu1 %vm326_vm1, %v3676_v6 }
0x1e4e   : > { %2707 = vmatpush.msrb.mxu1 %v2694_v32 }
0x1e50   : > { %2708 = vmatpush.msrb.mxu1 %v2693_v33 }
0x1e52   : > { %2709 = vmatpush.msrb.mxu1 %v2692_v34 }
0x1e54   : > { %2710 = vmatpush.msrb.mxu1 %v2691_v35 }
0x1e55   : > { %3011 = vmatmul.msk.f32.vlgmr.msrb.gmra.mxu1 %vm326_vm1, %v3800_v9 }
0x1ec1   : > { %v2288_v38 = vpop.f32.mrf.mxu0 }
0x1ec2   : > { %v2466_v6 = vpop.f32.mrf.mxu1  ;;  %v2312_v46 = vadd.f32 %v3838_v1, %v2288_v38  ;;  %v2716_v38 = vld [vmem:[#allocation7 + $0x430] sm:$0xff] }
0x1ec3   : > { %3005 = vmatmul.msk.f32.vlgmr.msrb.gmra.mxu3 %vm299_vm0, %v2466_v6  ;;  %v2717_v6 = vld [vmem:[#allocation7 + $0x438] sm:$0xff] }
0x1ec4   : > { %2735 = vmatpush.msrb.mxu3 %v2719_v40 }
0x1ec6   : > { %2736 = vmatpush.msrb.mxu3 %v2718_v41 }
0x1ec8   : > { %2737 = vmatpush.msrb.mxu3 %v2717_v6 }
0x1ec9   : > { %v2400_v44 = vpop.f32.mrf.mxu0 }
0x1eca   : > { %v2403_v47 = vadd.f32 %v2400_v44, %v2312_v46  ;;  %2738 = vmatpush.msrb.mxu3 %v2716_v38 }
0x1ecb   : > { %3009 = vmatmul.msk.f32.vlgmr.msra.gmra.mxu3 %vm326_vm1, %v3608_v29 }
0x1f46   : > { %v2490_v49 = vpop.f32.mrf.mxu3 }
0x1f47   : > { %v2493_v50 = vadd.f32 %v2490_v49, %v2403_v47 }
0x1f49   : > { %v2496_v51 = vadd.f32 %v3133_v48, %v2493_v50 }
0x1f4b   : > { %v2497_v52 = vadd.f32 %v2496_v51, %v3800_v9  ;;  %v2669_v9 = vld [vmem:[#allocation7 + $0x408] sm:$0xff] }
0x1f4c   : > { %2682 = vmatpush.msrb.mxu0 %v2669_v9  ;;  %v2643_v9 = vpop.f32.mrf.mxu1 }
0x1f4d   : > { %v2500_v53 = vsel %vm326_vm1, %v2497_v52, 0.0 }
0x1f4e   : > { %2501 = vadd.xlane.f32.xlu0 %v2500_v53  ;;  %2683 = vmatpush.msrb.mxu0 %v2668_v62  ;;  %v2663_v62 = vpop.f32.mrf.mxu3 }
0x1f50   : > { %2684 = vmatpush.msrb.mxu0 %v2667_v63 }
0x1f52   : > { %2685 = vmatpush.msrb.mxu0 %v2666_v2 }
0x1f54   : > { %v2712_v2 = vpop.f32.mrf.mxu1 }
0x1fc1   : > { %v2502_v54 = vpop.xlane.xlu0 %2501 }
0x1fc2   : > { %v2503_v45 = vmul.f32 %v2502_v54, %v3665_v58  ;;  %v3138_v54 = vld [vmem:[#allocation8 + $0x40] ss:$0 sm:$0xff] }
0x1fc4   : > { %v2504_v55 = vsub.f32 %v2497_v52, %v2503_v45 }
0x1fc6   : > { %v2505_v56 = vmul.f32 %v2504_v55, %v2504_v55 }
0x1fc8   : > { %v2506_v29 = vsel %vm326_vm1, %v2505_v56, 0.0  ;;  %v3139_v56 = vld [vmem:[#allocation8 + $0x41] ss:$0 sm:$0xff] }
0x1fc9   : > { %2507 = vadd.xlane.f32.xlu2 %v2506_v29 }
0x203c   : > { %v2508_v0 = vpop.xlane.xlu2 %2507 }
0x203d   : > { %v2509_v1 = vmul.f32 %v2508_v0, %v3665_v58  ;;  %v2664_v0 = vadd.f32 %v2663_v62, %v2643_v9 }
0x203f   : > { %v2510_v3 = vadd.f32 1e-05, %v2509_v1 }
0x2041   : > { %3220 = vrsqrt.f32 %v2510_v3  ;;  %vm2517_vm10 = vweird.f32 %v2510_v3 }
0x2047   : > { %v3221_v10 = vpop.eup %3220 }
0x2048   : > { %v2512_v12 = vmul.f32 %v3221_v10, %v2510_v3  ;;  %vm2518_vm0 = vweird.f32 %v3221_v10 }
0x2049   : > { %vm2519_vm11 = vmor %vm2517_vm10, %vm2518_vm0 }
0x204a   : > { %v2513_v13 = vmul.f32 %v3221_v10, %v2512_v12 }
0x204c   : > { %v2514_v14 = vmul.f32 0.5, %v2513_v13 }
0x204e   : > { %v2515_v43 = vsub.f32 1.5, %v2514_v14 }
0x2050   : > { %v2516_v15 = vmul.f32 %v3221_v10, %v2515_v43 }
0x2052   : > { %v2520_v17 = vsel %vm2519_vm11, %v3221_v10, %v2516_v15 }
0x2053   : > { %v2521_v18 = vmul.f32 %v2520_v17, %v2504_v55 }
0x2055   : > { %v2523_v20 = vmul.f32 %v3134_v16, %v2521_v18 }
0x2057   : > { %v2525_v21 = vadd.f32 %v3135_v19, %v2523_v20 }
0x2059   : > { %3006 = vmatmul.msk.f32.vlgmr.msra.gmra.mxu0 %vm326_vm1, %v2525_v21 }
0x2061   : > { %3010 = vmatmul.msk.f32.vlgmr.msrb.gmra.mxu0 %vm326_vm1, %v3738_v42 }
0x20d6   : > { %v2560_v27 = vpop.f32.mrf.mxu0 }
0x20d7   : > { %v2561_v28 = vadd.f32 %v3136_v26, %v2560_v27 }
0x20d9   : > { %v2563_v30 = vmax.f32 %v2561_v28, 0.0 }
0x20db   : > { %3007 = vmatmul.msk.f32.vlgmr.msrb.gmra.mxu2 %vm888_vm7, %v2563_v30 }
0x20de   : > { %v2687_v63 = vpop.f32.mrf.mxu0 }
0x20df   : > { %v2690_v1 = vadd.f32 %v2687_v63, %v2664_v0 }
0x20e1   : > { %v2715_v3 = vadd.f32 %v2712_v2, %v2690_v1 }
0x215e   : > { %v2586_v31 = vpop.f32.mrf.mxu2 }
0x215f   : > { %v2587_v32 = vadd.f32 %v3137_v22, %v2586_v31 }
0x2161   : > { %v2589_v33 = vadd.f32 %v2587_v32, %v2525_v21 }
0x2163   : > { %v2592_v34 = vsel %vm326_vm1, %v2589_v33, 0.0 }
0x2164   : > { %2593 = vadd.xlane.f32.xlu1 %v2592_v34 }
0x21d7   : > { %v2594_v42 = vpop.xlane.xlu1 %2593 }
0x21d8   : > { %v2595_v35 = vmul.f32 %v2594_v42, %v3665_v58 }
0x21da   : > { %v2596_v36 = vsub.f32 %v2589_v33, %v2595_v35 }
0x21dc   : > { %v2597_v37 = vmul.f32 %v2596_v36, %v2596_v36 }
0x21de   : > { %v2598_v39 = vsel %vm326_vm1, %v2597_v37, 0.0 }
0x21df   : > { %2599 = vadd.xlane.f32.xlu0 %v2598_v39 }
0x2252   : > { %v2600_v44 = vpop.xlane.xlu0 %2599 }
0x2253   : > { %v2601_v46 = vmul.f32 %v2600_v44, %v3665_v58  ;;  %v2751_v58 = vld [vmem:[#allocation7 + $0x468] sm:$0xff] }
0x2254   : > { %2769 = vmatpush.msra.mxu0 %v2751_v58 }
0x2255   : > { %v2602_v47 = vadd.f32 1e-05, %v2601_v46 }
0x2256   : > { %2770 = vmatpush.msra.mxu0 %v2750_v59 }
0x2257   : > { %3222 = vrsqrt.f32 %v2602_v47  ;;  %vm2609_vm12 = vweird.f32 %v2602_v47 }
0x2258   : > { %2771 = vmatpush.msra.mxu0 %v2749_v60 }
0x225a   : > { %2772 = vmatpush.msra.mxu0 %v2748_v61 }
0x225d   : > { %v3223_v48 = vpop.eup %3222 }
0x225e   : > { %v2604_v49 = vmul.f32 %v3223_v48, %v2602_v47  ;;  %vm2610_vm7 = vweird.f32 %v3223_v48 }
0x225f   : > { %vm2611_vm13 = vmor %vm2609_vm12, %vm2610_vm7 }
0x2260   : > { %v2605_v50 = vmul.f32 %v3223_v48, %v2604_v49 }
0x2262   : > { %v2606_v51 = vmul.f32 0.5, %v2605_v50 }
0x2264   : > { %v2607_v52 = vsub.f32 1.5, %v2606_v51 }
0x2266   : > { %v2608_v53 = vmul.f32 %v3223_v48, %v2607_v52 }
0x2268   : > { %v2612_v45 = vsel %vm2611_vm13, %v3223_v48, %v2608_v53 }
0x2269   : > { %v2613_v55 = vmul.f32 %v2612_v45, %v2596_v36 }
0x226b   : > { %v2615_v29 = vmul.f32 %v3138_v54, %v2613_v55 }
0x226d   : > { %v2617_v57 = vadd.f32 %v3139_v56, %v2615_v29 }
0x226f   : > { %3012 = vmatmul.msk.f32.vlgmr.msrb.gmra.mxu3 %vm326_vm1, %v2617_v57 }
0x22f2   : > { %v2740_v5 = vpop.f32.mrf.mxu3 }
0x22f3   : > { %v2743_v7 = vadd.f32 %v2740_v5, %v2715_v3 }
0x22f5   : > { %v2746_v8 = vadd.f32 %v3140_v4, %v2743_v7 }
0x22f7   : > { %v2747_v10 = vmax.f32 %v2746_v8, 0.0 }
0x22f9   : > { %3013 = vmatmul.msk.f32.vlgmr.msra.gmra.mxu0 %vm326_vm1, %v2747_v10 }
0x2376   : > { %v2774_v12 = vpop.f32.mrf.mxu0 }
0x2377   : > { %v2775_v13 = vadd.f32 %v3141_v11, %v2774_v12 }
0x2379   : > { %2777 = vst [vmem:[%s286_s27] sm:$0xff] %v2775_v13 }
0x237a   : > { %3371 = shalt.err (!%p3368_p10)
}
0x237b   : > { %3030 = dma.vmem_to_hbm [thread:$0]  (%p3527_p4), %s2792_s25, 128, %s2794_s26, %s2779_s28  }
0x237c PF: > { %s2805_s21 = sand.u32 1, %s3410_s15   ;;  %p3925_p11 = scmp.ge.s32.totalorder %s3422_s18, 2 }
0x237d   : > { %s2806_s23 = scalar_lea.sflag [#allocation4], %s2805_s21 }
0x237e   : > { %p3047_p5 = pnand %p3925_p11, %p3531_p6 }
0x2380   : > { %p3048_p13 = pneg %p3047_p5 }
0x2382   : > { %3405 = dma.done.wait (%p3048_p13), %s2806_s23, 128  }
0x2383   : > { %3407 = vsyncadd (%p3048_p13), %s2806_s23, 4294967168  ;;  %s3926_s5 = sld [smem:[#allocation16_spill]]  ;;  %p21_p0 = scmp.ge.s32.totalorder %s3501_s8, 4  }
0x2384   : > { %s3927_s15 = smov %s3414_s16  ;;  %s3928_s16 = smov %s3418_s17 }
0x2385   : > { %s3930_s18 = smov %s3501_s8  ;;  %23 = sbr.rel (!%p21_p0) target bundleno = 11 (0xb), region = 102 }
0x2389   : > { %s3929_s17 = smov %s3926_s5 }
0x238a   :  { %2812 = vsyncpa [#allocation3], 1 }
0x238b   :  { %2814 = vsyncpa [#allocation3 + $0x1], 1 }
0x238c   :  { %2815 = vsyncpa [#allocation6], 1 }
0x238d   :  { %2817 = vsyncpa [#allocation6 + $0x1], 1 }
0x238e   :  { %2818 = vsyncpa [#allocation9], 1 }
0x238f   :  { %2819 = vsyncpa [#allocation4], 1 }
0x2390   :  { %2821 = vsyncpa [#allocation4 + $0x1], 1 }

</bundles_post_ra>
